<compile_context>
chip_gen: v7x
topology: tpu7x:2x2x1
jax: 0.10.0
libtpu: 0.0.40
codegen_flags: <defaults>
</compile_context>

<pallas_src>
import jax
import jax.numpy as jnp
from jax.experimental import pallas as pl
from jax.experimental.pallas import tpu as pltpu

BN_EPS = 1e-5
D_IN, D1, D2, D3, D_OUT = 3486, 1024, 256, 64, 2
TK = 1792                 # layer-1 K tile (grid = 2)
K1_PAD = 3584             # 2 * TK, zero-padded reduction dim for layer 1


def _bn_relu(y, gamma, beta):
    """BatchNorm1d (training-mode batch stats, biased var) + ReLU, in f32."""
    mean = jnp.mean(y, axis=0, keepdims=True)
    c = y - mean
    var = jnp.mean(c * c, axis=0, keepdims=True)
    y = c * jax.lax.rsqrt(var + BN_EPS)
    return jnp.maximum(y * gamma + beta, 0.0)


def _fused_kernel(x_ref, w1_ref, p1_ref, w2_ref, p2_ref, w3_ref, p3_ref,
                  w4_ref, b4_ref, o_ref, acc_ref):
    """Whole net in one kernel; grid axis = K tiles of layer 1."""
    k = pl.program_id(0)

    @pl.when(k == 0)
    def _():
        acc_ref[...] = jnp.zeros_like(acc_ref)

    # Layer-1 partial matmul on this K tile: bf16 x bf16 -> f32 (native MXU
    # path, no f32 weight temp materialized).
    acc_ref[...] += jnp.dot(x_ref[...], w1_ref[...],
                            preferred_element_type=jnp.float32)

    @pl.when(k == pl.num_programs(0) - 1)
    def _():
        # Finish layer 1: bias + BN + ReLU (f32).
        h = _bn_relu(acc_ref[...] + p1_ref[0:1, :], p1_ref[1:2, :], p1_ref[2:3, :])
        # Layer 2 (bf16 activations x bf16 weights -> f32).
        h = jnp.dot(h.astype(jnp.bfloat16), w2_ref[...],
                    preferred_element_type=jnp.float32)
        h = _bn_relu(h + p2_ref[0:1, :], p2_ref[1:2, :], p2_ref[2:3, :])
        # Layer 3.
        h = jnp.dot(h.astype(jnp.bfloat16), w3_ref[...],
                    preferred_element_type=jnp.float32)
        h = _bn_relu(h + p3_ref[0:1, :], p3_ref[1:2, :], p3_ref[2:3, :])
        # Layer 4 (no BN / ReLU).
        y = jnp.dot(h.astype(jnp.bfloat16), w4_ref[...],
                    preferred_element_type=jnp.float32) + b4_ref[...]
        o_ref[...] = y.astype(o_ref.dtype)


@jax.jit
def connect_net_forward(x, packed):
    w1, p1, w2, p2, w3, p3, w4, b4 = packed
    B = x.shape[0]
    # Single wrapper op: cast to bf16 (halves x traffic) + zero-pad K to 3584.
    x_bf = jnp.pad(x.astype(jnp.bfloat16), ((0, 0), (0, K1_PAD - x.shape[1])))

    return pl.pallas_call(
        _fused_kernel,
        out_shape=jax.ShapeDtypeStruct((B, D_OUT), jnp.float32),
        grid_spec=pltpu.PrefetchScalarGridSpec(
            num_scalar_prefetch=0,
            grid=(K1_PAD // TK,),
            in_specs=[
                pl.BlockSpec((B, TK), lambda k: (0, k)),      # x K-tile (bf16)
                pl.BlockSpec((TK, D1), lambda k: (k, 0)),     # W1 K-tile (bf16)
                pl.BlockSpec((3, D1), lambda k: (0, 0)),      # [b1; g1; beta1]
                pl.BlockSpec((D1, D2), lambda k: (0, 0)),     # W2 (resident)
                pl.BlockSpec((3, D2), lambda k: (0, 0)),
                pl.BlockSpec((D2, D3), lambda k: (0, 0)),     # W3
                pl.BlockSpec((3, D3), lambda k: (0, 0)),
                pl.BlockSpec((D3, D_OUT), lambda k: (0, 0)),  # W4
                pl.BlockSpec((1, D_OUT), lambda k: (0, 0)),   # b4
            ],
            out_specs=pl.BlockSpec((B, D_OUT), lambda k: (0, 0)),
            scratch_shapes=[pltpu.VMEM((B, D1), jnp.float32)],  # layer-1 acc
        ),
        compiler_params=pltpu.CompilerParams(
            dimension_semantics=("arbitrary",)),
    )(x_bf, w1, p1, w2, p2, w3, p3, w4, b4)


def init_params(key):
    """Deterministic synthetic parameters (shapes match connect_net.__init__)."""
    dims = [(D_IN, D1), (D1, D2), (D2, D3), (D3, D_OUT)]
    params = []
    for cin, cout in dims:
        kw, kb, key = jax.random.split(key, 3)
        bound = 1.0 / jnp.sqrt(cin)
        w = jax.random.uniform(kw, (cin, cout), jnp.float32, -bound, bound)
        b = jax.random.uniform(kb, (1, cout), jnp.float32, -bound, bound)
        gamma = jnp.ones((1, cout), jnp.float32)   # BatchNorm1d defaults
        beta = jnp.zeros((1, cout), jnp.float32)
        params.append((w, b, gamma, beta))
    return params


def pack_params(params):
    """Pad W1 along K, cast weights to bf16, pack (b, gamma, beta) per BN layer."""
    (w1, b1, g1, be1), (w2, b2, g2, be2), (w3, b3, g3, be3), (w4, b4, _, _) = params
    w1p = jnp.pad(w1, ((0, K1_PAD - w1.shape[0]), (0, 0))).astype(jnp.bfloat16)
    p1 = jnp.concatenate([b1, g1, be1], axis=0)
    p2 = jnp.concatenate([b2, g2, be2], axis=0)
    p3 = jnp.concatenate([b3, g3, be3], axis=0)
    return (w1p, p1, w2.astype(jnp.bfloat16), p2, w3.astype(jnp.bfloat16), p3,
            w4.astype(jnp.bfloat16), b4)


def connect_net_ref(x, packed):
    """Pure-JAX reference with the same bf16 rounding of weights/activations."""
    w1, p1, w2, p2, w3, p3, w4, b4 = packed

    def bf(a):  # round to bf16, compute in f32
        return a.astype(jnp.bfloat16).astype(jnp.float32)

    def bn_relu(y, p):
        mean = jnp.mean(y, axis=0, keepdims=True)
        c = y - mean
        var = jnp.mean(c * c, axis=0, keepdims=True)
        return jnp.maximum(c * jax.lax.rsqrt(var + BN_EPS) * p[1:2] + p[2:3], 0.0)

    h = bf(x) @ w1[: x.shape[1]].astype(jnp.float32) + p1[0:1]
    h = bn_relu(h, p1)
    h = bf(h) @ w2.astype(jnp.float32) + p2[0:1]
    h = bn_relu(h, p2)
    h = bf(h) @ w3.astype(jnp.float32) + p3[0:1]
    h = bn_relu(h, p3)
    return bf(h) @ w4.astype(jnp.float32) + b4


# TODO(synk): nn.BatchNorm1d running_mean/running_var state updates are not
# emitted; the forward pass uses training-mode batch statistics only.

if __name__ == "__main__":
    key = jax.random.PRNGKey(0)
    kx, kp = jax.random.split(key)
    B = 8  # BatchNorm1d training-mode batch stats need B > 1
    x = jax.random.normal(kx, (B, D_IN), jnp.float32)
    params = init_params(kp)
    packed = pack_params(params)

    out = connect_net_forward(x, packed)
    out = jax.block_until_ready(out)

    ref = connect_net_ref(x, packed)
    assert out.shape == (B, D_OUT), out.shape
    max_err = float(jnp.max(jnp.abs(out - ref)))
    assert jnp.allclose(out, ref, atol=2e-3, rtol=2e-3), max_err

    print("KERNEL_OK")
</pallas_src>

<mosaic_0001>
module attributes {stable_mosaic.version = 11 : i64} {
  func.func @_fused_kernel(%arg0: i32, %arg1: memref<8x1792xbf16, #tpu.memory_space<vmem>>, %arg2: memref<1792x1024xbf16, #tpu.memory_space<vmem>>, %arg3: memref<3x1024xf32, #tpu.memory_space<vmem>>, %arg4: memref<1024x256xbf16, #tpu.memory_space<vmem>>, %arg5: memref<3x256xf32, #tpu.memory_space<vmem>>, %arg6: memref<256x64xbf16, #tpu.memory_space<vmem>>, %arg7: memref<3x64xf32, #tpu.memory_space<vmem>>, %arg8: memref<64x2xbf16, #tpu.memory_space<vmem>>, %arg9: memref<1x2xf32, #tpu.memory_space<vmem>>, %arg10: memref<8x2xf32, #tpu.memory_space<vmem>>, %arg11: memref<8x1024xf32, #tpu.memory_space<vmem>>) attributes {dimension_semantics = [#tpu.dimension_semantics<arbitrary>], iteration_bounds = array<i64: 2>, scalar_prefetch = 0 : i64, scratch_operands = 1 : i64, tpu.core_type = #tpu.core_type<tc>, window_params = [{transform_indices = @transform_0, window_bounds = array<i64: 8, 1792>}, {transform_indices = @transform_1, window_bounds = array<i64: 1792, 1024>}, {pipeline_mode = #tpu.pipeline_mode<synchronous>, transform_indices = @transform_2, window_bounds = array<i64: 3, 1024>}, {pipeline_mode = #tpu.pipeline_mode<synchronous>, transform_indices = @transform_3, window_bounds = array<i64: 1024, 256>}, {pipeline_mode = #tpu.pipeline_mode<synchronous>, transform_indices = @transform_4, window_bounds = array<i64: 3, 256>}, {pipeline_mode = #tpu.pipeline_mode<synchronous>, transform_indices = @transform_5, window_bounds = array<i64: 256, 64>}, {pipeline_mode = #tpu.pipeline_mode<synchronous>, transform_indices = @transform_6, window_bounds = array<i64: 3, 64>}, {pipeline_mode = #tpu.pipeline_mode<synchronous>, transform_indices = @transform_7, window_bounds = array<i64: 64, 2>}, {pipeline_mode = #tpu.pipeline_mode<synchronous>, transform_indices = @transform_8, window_bounds = array<i64: 1, 2>}, {pipeline_mode = #tpu.pipeline_mode<synchronous>, transform_indices = @transform_9, window_bounds = array<i64: 8, 2>}]} {
    %c0_i32 = arith.constant 0 : i32
    %0 = arith.cmpi eq, %arg0, %c0_i32 : i32
    %1 = arith.extui %0 : i1 to i32
    %c0_i32_0 = arith.constant 0 : i32
    %2 = arith.cmpi ne, %1, %c0_i32_0 : i32
    scf.if %2 {
      %cst_9 = arith.constant 0.000000e+00 : f32
      %12 = vector.broadcast %cst_9 : f32 to vector<8x1024xf32>
      %c0_10 = arith.constant 0 : index
      %c0_11 = arith.constant 0 : index
      %13 = vector.load %arg11[%c0_10, %c0_11] : memref<8x1024xf32, #tpu.memory_space<vmem>>, vector<8x1024xf32>
      tpu.vector_store %arg11[%c0_10, %c0_11], %12 {strides = array<i32>} : memref<8x1024xf32, #tpu.memory_space<vmem>>, vector<8x1024xf32>,
    } else {
    }
    %c0 = arith.constant 0 : index
    %c0_1 = arith.constant 0 : index
    %3 = vector.load %arg11[%c0, %c0_1] : memref<8x1024xf32, #tpu.memory_space<vmem>>, vector<8x1024xf32>
    %c0_2 = arith.constant 0 : index
    %c0_3 = arith.constant 0 : index
    %4 = vector.load %arg1[%c0_2, %c0_3] : memref<8x1792xbf16, #tpu.memory_space<vmem>>, vector<8x1792xbf16>
    %c0_4 = arith.constant 0 : index
    %c0_5 = arith.constant 0 : index
    %5 = vector.load %arg2[%c0_4, %c0_5] : memref<1792x1024xbf16, #tpu.memory_space<vmem>>, vector<1792x1024xbf16>
    %cst = arith.constant dense<0.000000e+00> : vector<8x1024xf32>
    %6 = tpu.matmul %4, %5, %cst {dimension_numbers = #tpu.dot_dimension_numbers<[1], [0], [0], [1], [0, 0, 1, 1], [], []>} : vector<8x1792xbf16>, vector<1792x1024xbf16>, vector<8x1024xf32> -> vector<8x1024xf32>
    %7 = arith.addf %3, %6 : vector<8x1024xf32>
    %c0_6 = arith.constant 0 : index
    %c0_7 = arith.constant 0 : index
    %8 = vector.load %arg11[%c0_6, %c0_7] : memref<8x1024xf32, #tpu.memory_space<vmem>>, vector<8x1024xf32>
    tpu.vector_store %arg11[%c0_6, %c0_7], %7 {strides = array<i32>} : memref<8x1024xf32, #tpu.memory_space<vmem>>, vector<8x1024xf32>,
    %c1_i32 = arith.constant 1 : i32
    %9 = arith.cmpi eq, %arg0, %c1_i32 : i32
    %10 = arith.extui %9 : i1 to i32
    %c0_i32_8 = arith.constant 0 : i32
    %11 = arith.cmpi ne, %10, %c0_i32_8 : i32
    scf.if %11 {
      %c0_9 = arith.constant 0 : index
      %c0_10 = arith.constant 0 : index
      %12 = vector.load %arg11[%c0_9, %c0_10] : memref<8x1024xf32, #tpu.memory_space<vmem>>, vector<8x1024xf32>
      %c0_11 = arith.constant 0 : index
      %c0_12 = arith.constant 0 : index
      %13 = vector.load %arg3[%c0_11, %c0_12] : memref<3x1024xf32, #tpu.memory_space<vmem>>, vector<1x1024xf32>
      %14 = vector.broadcast %13 : vector<1x1024xf32> to vector<8x1024xf32>
      %15 = arith.addf %12, %14 : vector<8x1024xf32>
      %c1 = arith.constant 1 : index
      %c0_13 = arith.constant 0 : index
      %16 = vector.load %arg3[%c1, %c0_13] : memref<3x1024xf32, #tpu.memory_space<vmem>>, vector<1x1024xf32>
      %c2 = arith.constant 2 : index
      %c0_14 = arith.constant 0 : index
      %17 = vector.load %arg3[%c2, %c0_14] : memref<3x1024xf32, #tpu.memory_space<vmem>>, vector<1x1024xf32>
      %cst_15 = arith.constant dense<0.000000e+00> : vector<1024xf32>
      %18 = vector.multi_reduction <add>, %15, %cst_15 [0] : vector<8x1024xf32> to vector<1024xf32>
      %19 = vector.shape_cast %18 : vector<1024xf32> to vector<1x1024xf32>
      %cst_16 = arith.constant 8.000000e+00 : f32
      %20 = vector.broadcast %cst_16 : f32 to vector<1x1024xf32>
      %21 = arith.divf %19, %20 : vector<1x1024xf32>
      %22 = vector.broadcast %21 : vector<1x1024xf32> to vector<8x1024xf32>
      %23 = arith.subf %15, %22 : vector<8x1024xf32>
      %24 = arith.mulf %23, %23 : vector<8x1024xf32>
      %cst_17 = arith.constant dense<0.000000e+00> : vector<1024xf32>
      %25 = vector.multi_reduction <add>, %24, %cst_17 [0] : vector<8x1024xf32> to vector<1024xf32>
      %26 = vector.shape_cast %25 : vector<1024xf32> to vector<1x1024xf32>
      %cst_18 = arith.constant 8.000000e+00 : f32
      %27 = vector.broadcast %cst_18 : f32 to vector<1x1024xf32>
      %28 = arith.divf %26, %27 : vector<1x1024xf32>
      %cst_19 = arith.constant 9.99999974E-6 : f32
      %29 = vector.broadcast %cst_19 : f32 to vector<1x1024xf32>
      %30 = arith.addf %28, %29 : vector<1x1024xf32>
      %31 = math.rsqrt %30 : vector<1x1024xf32>
      %32 = vector.broadcast %31 : vector<1x1024xf32> to vector<8x1024xf32>
      %33 = arith.mulf %23, %32 : vector<8x1024xf32>
      %34 = vector.broadcast %16 : vector<1x1024xf32> to vector<8x1024xf32>
      %35 = arith.mulf %33, %34 : vector<8x1024xf32>
      %36 = vector.broadcast %17 : vector<1x1024xf32> to vector<8x1024xf32>
      %37 = arith.addf %35, %36 : vector<8x1024xf32>
      %cst_20 = arith.constant 0.000000e+00 : f32
      %38 = vector.broadcast %cst_20 : f32 to vector<8x1024xf32>
      %39 = arith.maximumf %37, %38 : vector<8x1024xf32>
      %40 = arith.truncf %39 : vector<8x1024xf32> to vector<8x1024xbf16>
      %c0_21 = arith.constant 0 : index
      %c0_22 = arith.constant 0 : index
      %41 = vector.load %arg4[%c0_21, %c0_22] : memref<1024x256xbf16, #tpu.memory_space<vmem>>, vector<1024x256xbf16>
      %cst_23 = arith.constant dense<0.000000e+00> : vector<8x256xf32>
      %42 = tpu.matmul %40, %41, %cst_23 {dimension_numbers = #tpu.dot_dimension_numbers<[1], [0], [0], [1], [0, 0, 1, 1], [], []>} : vector<8x1024xbf16>, vector<1024x256xbf16>, vector<8x256xf32> -> vector<8x256xf32>
      %c0_24 = arith.constant 0 : index
      %c0_25 = arith.constant 0 : index
      %43 = vector.load %arg5[%c0_24, %c0_25] : memref<3x256xf32, #tpu.memory_space<vmem>>, vector<1x256xf32>
      %44 = vector.broadcast %43 : vector<1x256xf32> to vector<8x256xf32>
      %45 = arith.addf %42, %44 : vector<8x256xf32>
      %c1_26 = arith.constant 1 : index
      %c0_27 = arith.constant 0 : index
      %46 = vector.load %arg5[%c1_26, %c0_27] : memref<3x256xf32, #tpu.memory_space<vmem>>, vector<1x256xf32>
      %c2_28 = arith.constant 2 : index
      %c0_29 = arith.constant 0 : index
      %47 = vector.load %arg5[%c2_28, %c0_29] : memref<3x256xf32, #tpu.memory_space<vmem>>, vector<1x256xf32>
      %cst_30 = arith.constant dense<0.000000e+00> : vector<256xf32>
      %48 = vector.multi_reduction <add>, %45, %cst_30 [0] : vector<8x256xf32> to vector<256xf32>
      %49 = vector.shape_cast %48 : vector<256xf32> to vector<1x256xf32>
      %cst_31 = arith.constant 8.000000e+00 : f32
      %50 = vector.broadcast %cst_31 : f32 to vector<1x256xf32>
      %51 = arith.divf %49, %50 : vector<1x256xf32>
      %52 = vector.broadcast %51 : vector<1x256xf32> to vector<8x256xf32>
      %53 = arith.subf %45, %52 : vector<8x256xf32>
      %54 = arith.mulf %53, %53 : vector<8x256xf32>
      %cst_32 = arith.constant dense<0.000000e+00> : vector<256xf32>
      %55 = vector.multi_reduction <add>, %54, %cst_32 [0] : vector<8x256xf32> to vector<256xf32>
      %56 = vector.shape_cast %55 : vector<256xf32> to vector<1x256xf32>
      %cst_33 = arith.constant 8.000000e+00 : f32
      %57 = vector.broadcast %cst_33 : f32 to vector<1x256xf32>
      %58 = arith.divf %56, %57 : vector<1x256xf32>
      %cst_34 = arith.constant 9.99999974E-6 : f32
      %59 = vector.broadcast %cst_34 : f32 to vector<1x256xf32>
      %60 = arith.addf %58, %59 : vector<1x256xf32>
      %61 = math.rsqrt %60 : vector<1x256xf32>
      %62 = vector.broadcast %61 : vector<1x256xf32> to vector<8x256xf32>
      %63 = arith.mulf %53, %62 : vector<8x256xf32>
      %64 = vector.broadcast %46 : vector<1x256xf32> to vector<8x256xf32>
      %65 = arith.mulf %63, %64 : vector<8x256xf32>
      %66 = vector.broadcast %47 : vector<1x256xf32> to vector<8x256xf32>
      %67 = arith.addf %65, %66 : vector<8x256xf32>
      %cst_35 = arith.constant 0.000000e+00 : f32
      %68 = vector.broadcast %cst_35 : f32 to vector<8x256xf32>
      %69 = arith.maximumf %67, %68 : vector<8x256xf32>
      %70 = arith.truncf %69 : vector<8x256xf32> to vector<8x256xbf16>
      %c0_36 = arith.constant 0 : index
      %c0_37 = arith.constant 0 : index
      %71 = vector.load %arg6[%c0_36, %c0_37] : memref<256x64xbf16, #tpu.memory_space<vmem>>, vector<256x64xbf16>
      %cst_38 = arith.constant dense<0.000000e+00> : vector<8x64xf32>
      %72 = tpu.matmul %70, %71, %cst_38 {dimension_numbers = #tpu.dot_dimension_numbers<[1], [0], [0], [1], [0, 0, 1, 1], [], []>} : vector<8x256xbf16>, vector<256x64xbf16>, vector<8x64xf32> -> vector<8x64xf32>
      %c0_39 = arith.constant 0 : index
      %c0_40 = arith.constant 0 : index
      %73 = vector.load %arg7[%c0_39, %c0_40] : memref<3x64xf32, #tpu.memory_space<vmem>>, vector<1x64xf32>
      %74 = vector.broadcast %73 : vector<1x64xf32> to vector<8x64xf32>
      %75 = arith.addf %72, %74 : vector<8x64xf32>
      %c1_41 = arith.constant 1 : index
      %c0_42 = arith.constant 0 : index
      %76 = vector.load %arg7[%c1_41, %c0_42] : memref<3x64xf32, #tpu.memory_space<vmem>>, vector<1x64xf32>
      %c2_43 = arith.constant 2 : index
      %c0_44 = arith.constant 0 : index
      %77 = vector.load %arg7[%c2_43, %c0_44] : memref<3x64xf32, #tpu.memory_space<vmem>>, vector<1x64xf32>
      %cst_45 = arith.constant dense<0.000000e+00> : vector<64xf32>
      %78 = vector.multi_reduction <add>, %75, %cst_45 [0] : vector<8x64xf32> to vector<64xf32>
      %79 = vector.shape_cast %78 : vector<64xf32> to vector<1x64xf32>
      %cst_46 = arith.constant 8.000000e+00 : f32
      %80 = vector.broadcast %cst_46 : f32 to vector<1x64xf32>
      %81 = arith.divf %79, %80 : vector<1x64xf32>
      %82 = vector.broadcast %81 : vector<1x64xf32> to vector<8x64xf32>
      %83 = arith.subf %75, %82 : vector<8x64xf32>
      %84 = arith.mulf %83, %83 : vector<8x64xf32>
      %cst_47 = arith.constant dense<0.000000e+00> : vector<64xf32>
      %85 = vector.multi_reduction <add>, %84, %cst_47 [0] : vector<8x64xf32> to vector<64xf32>
      %86 = vector.shape_cast %85 : vector<64xf32> to vector<1x64xf32>
      %cst_48 = arith.constant 8.000000e+00 : f32
      %87 = vector.broadcast %cst_48 : f32 to vector<1x64xf32>
      %88 = arith.divf %86, %87 : vector<1x64xf32>
      %cst_49 = arith.constant 9.99999974E-6 : f32
      %89 = vector.broadcast %cst_49 : f32 to vector<1x64xf32>
      %90 = arith.addf %88, %89 : vector<1x64xf32>
      %91 = math.rsqrt %90 : vector<1x64xf32>
      %92 = vector.broadcast %91 : vector<1x64xf32> to vector<8x64xf32>
      %93 = arith.mulf %83, %92 : vector<8x64xf32>
      %94 = vector.broadcast %76 : vector<1x64xf32> to vector<8x64xf32>
      %95 = arith.mulf %93, %94 : vector<8x64xf32>
      %96 = vector.broadcast %77 : vector<1x64xf32> to vector<8x64xf32>
      %97 = arith.addf %95, %96 : vector<8x64xf32>
      %cst_50 = arith.constant 0.000000e+00 : f32
      %98 = vector.broadcast %cst_50 : f32 to vector<8x64xf32>
      %99 = arith.maximumf %97, %98 : vector<8x64xf32>
      %100 = arith.truncf %99 : vector<8x64xf32> to vector<8x64xbf16>
      %c0_51 = arith.constant 0 : index
      %c0_52 = arith.constant 0 : index
      %101 = vector.load %arg8[%c0_51, %c0_52] : memref<64x2xbf16, #tpu.memory_space<vmem>>, vector<64x2xbf16>
      %cst_53 = arith.constant dense<0.000000e+00> : vector<8x2xf32>
      %102 = tpu.matmul %100, %101, %cst_53 {dimension_numbers = #tpu.dot_dimension_numbers<[1], [0], [0], [1], [0, 0, 1, 1], [], []>} : vector<8x64xbf16>, vector<64x2xbf16>, vector<8x2xf32> -> vector<8x2xf32>
      %c0_54 = arith.constant 0 : index
      %c0_55 = arith.constant 0 : index
      %103 = vector.load %arg9[%c0_54, %c0_55] : memref<1x2xf32, #tpu.memory_space<vmem>>, vector<1x2xf32>
      %104 = vector.broadcast %103 : vector<1x2xf32> to vector<8x2xf32>
      %105 = arith.addf %102, %104 : vector<8x2xf32>
      %c0_56 = arith.constant 0 : index
      %c0_57 = arith.constant 0 : index
      %106 = vector.load %arg10[%c0_56, %c0_57] : memref<8x2xf32, #tpu.memory_space<vmem>>, vector<8x2xf32>
      tpu.vector_store %arg10[%c0_56, %c0_57], %105 {strides = array<i32>} : memref<8x2xf32, #tpu.memory_space<vmem>>, vector<8x2xf32>,
    } else {
    }
    return
  }
  func.func @transform_0(%arg0: i32) -> (i32, i32) {
    %c0_i32 = arith.constant 0 : i32
    %c0_i32_0 = arith.constant 0 : i32
    return %c0_i32, %arg0 : i32, i32
  }
  func.func @transform_1(%arg0: i32) -> (i32, i32) {
    %c0_i32 = arith.constant 0 : i32
    %c0_i32_0 = arith.constant 0 : i32
    return %arg0, %c0_i32 : i32, i32
  }
  func.func @transform_2(%arg0: i32) -> (i32, i32) {
    %c0_i32 = arith.constant 0 : i32
    %c0_i32_0 = arith.constant 0 : i32
    %c0_i32_1 = arith.constant 0 : i32
    return %c0_i32, %c0_i32_0 : i32, i32
  }
  func.func @transform_3(%arg0: i32) -> (i32, i32) {
    %c0_i32 = arith.constant 0 : i32
    %c0_i32_0 = arith.constant 0 : i32
    %c0_i32_1 = arith.constant 0 : i32
    return %c0_i32, %c0_i32_0 : i32, i32
  }
  func.func @transform_4(%arg0: i32) -> (i32, i32) {
    %c0_i32 = arith.constant 0 : i32
    %c0_i32_0 = arith.constant 0 : i32
    %c0_i32_1 = arith.constant 0 : i32
    return %c0_i32, %c0_i32_0 : i32, i32
  }
  func.func @transform_5(%arg0: i32) -> (i32, i32) {
    %c0_i32 = arith.constant 0 : i32
    %c0_i32_0 = arith.constant 0 : i32
    %c0_i32_1 = arith.constant 0 : i32
    return %c0_i32, %c0_i32_0 : i32, i32
  }
  func.func @transform_6(%arg0: i32) -> (i32, i32) {
    %c0_i32 = arith.constant 0 : i32
    %c0_i32_0 = arith.constant 0 : i32
    %c0_i32_1 = arith.constant 0 : i32
    return %c0_i32, %c0_i32_0 : i32, i32
  }
  func.func @transform_7(%arg0: i32) -> (i32, i32) {
    %c0_i32 = arith.constant 0 : i32
    %c0_i32_0 = arith.constant 0 : i32
    %c0_i32_1 = arith.constant 0 : i32
    return %c0_i32, %c0_i32_0 : i32, i32
  }
  func.func @transform_8(%arg0: i32) -> (i32, i32) {
    %c0_i32 = arith.constant 0 : i32
    %c0_i32_0 = arith.constant 0 : i32
    %c0_i32_1 = arith.constant 0 : i32
    return %c0_i32, %c0_i32_0 : i32, i32
  }
  func.func @transform_9(%arg0: i32) -> (i32, i32) {
    %c0_i32 = arith.constant 0 : i32
    %c0_i32_0 = arith.constant 0 : i32
    %c0_i32_1 = arith.constant 0 : i32
    return %c0_i32, %c0_i32_0 : i32, i32
  }
}

</mosaic_0001>

<bundles_post_ra>
// kernel: connect_net_forward.1
= control target key start
LH: loop header
LB: loop body
LE: loop exit
PB: predicated region body
PF: predicated region fallthrough
CT: control target
= control target key end

     0   :  { %s12138_s0 = inlined_call_operand.vmem [shape: bf16[8,3584], index: 0, kind: input, shape index: {}]   ;;  %s12139_s1 = inlined_call_operand.hbm [shape: bf16[3584,1024], index: 1, kind: input, shape index: {}]   ;;  %s12140_s2 = inlined_call_operand.hbm [shape: f32[3,1024], index: 2, kind: input, shape index: {}]   ;;  %s12141_s3 = inlined_call_operand.hbm [shape: bf16[1024,256], index: 3, kind: input, shape index: {}]   ;;  %s12142_s4 = inlined_call_operand.hbm [shape: f32[3,256], index: 4, kind: input, shape index: {}]   ;;  %s12143_s5 = inlined_call_operand.vmem [shape: bf16[256,64], index: 5, kind: input, shape index: {}]   ;;  %s12144_s6 = inlined_call_operand.hbm [shape: f32[3,64], index: 6, kind: input, shape index: {}]   ;;  %s12145_s7 = inlined_call_operand.vmem [shape: bf16[64,2], index: 7, kind: input, shape index: {}]   ;;  %s12146_s8 = inlined_call_operand.hbm [shape: f32[1,2], index: 8, kind: input, shape index: {}]   ;;  %s12147_s9 = inlined_call_operand.vmem [shape: f32[8,2], index: 9, kind: output, shape index: {}]  }
   0x1   :  { %12150 = sst [smem:[#allocation17_spill]] %s12140_s2 }
   0x2   :  { %12151 = sst [smem:[#allocation18_spill]] %s12142_s4 }
   0x3   :  { %12152 = sst [smem:[#allocation19_spill]] %s12147_s9 }
   0x4   :  { %14 = vsyncpa [#allocation4], 0 }
   0x5   :  { %16 = vsyncpa [#allocation4 + $0x1], 0 }
   0x6   :  { %17 = vsyncpa [#allocation6], 0 }
   0x7   :  { %18 = vsyncpa [#allocation9], 0 }
   0x8   :  { %19 = vsyncpa [#allocation12], 0  ;;  %s10551_s30 = smov 0   ;;  %s10553_s10 = smov 0  }
   0x9   :  { %s10555_s11 = smov 0   ;;  %s10557_s12 = smov 0  }
   0xa LB: > { %s10488_s13 = smov [#allocation5]   ;;  %s10572_s15 = sadd.s32 4294967295, %s10486_s12   ;;  %s10486_s12 = sphi %s10557_s12, %s12173_s12   ;;  %s10482_s11 = sphi %s10555_s11, %s12172_s11   ;;  %s10478_s10 = sphi %s10553_s10, %s12171_s10   ;;  %s10474_s30 = sphi %s10551_s30, %s12170_s30  }
   0xb   : > { %s263_s14 = sshll.u32 %s10488_s13, 4  ;;  %p8786_p0 = scmp.ge.s32.totalorder %s10486_s12, 1  ;;  %s264_s14 = int_to_ptr.vmem [resolvable:$true] %s263_s14 }
   0xc   : > { %p12148_p1 = scmp.eq.s32.totalorder %s10572_s15, 0  ;;  %p250_p2 = scmp.lt.s32.totalorder %s10486_s12, 3 }
   0xd   : > { %s10489_s17 = smov [#allocation8]   ;;  %s10490_s19 = smov [#allocation7]  }
   0xe   : > { %p10578_p4 = pnand %p8786_p0, %p250_p2  ;;  %s287_s18 = sshll.u32 %s10489_s17, 4  ;;  %s10584_s18 = int_to_ptr.vmem [resolvable:$true] %s287_s18 }
   0xf   : > { %s273_s20 = sshll.u32 %s10490_s19, 4  ;;  %s12155_s2 = sld [smem:[#allocation17_spill]]  ;;  %s10592_s20 = int_to_ptr.vmem [resolvable:$true] %s273_s20 }
  0x10   : > { %s12153_s16 = scalar_select %p10578_p4, 1, 0 }
  0x11   : > { %p9947_p5 = pneg %p10578_p4 }
  0x13   : > { %p10588_p6 = pnand %p9947_p5, %p12148_p1 }
  0x15   : > { %s10270_s24 = scalar_lea.hbm %s12155_s2, 512  ;;  %p10602_p8 = pneg %p10588_p6 }
  0x16   : > { %p10271_p7 = scmp.ne.s32.totalorder %s12155_s2, %s10270_s24  ;;  %p10277_p11 = scmp.lt.u32.totalorder %s10270_s24, %s12155_s2 }
  0x18   : > { %p10273_p9 = pnand %p10602_p8, %p10271_p7 }
  0x1a   : > { %p10274_p10 = pneg %p10273_p9 }
  0x1c   : > { %p10279_p12 = pnand %p10277_p11, %p10274_p10 }
  0x1e   : > { %10282 = shalt.err (!%p10279_p12)
}
  0x1f   : > { %s10283_s13 = scalar_lea.vmem %s264_s14, 512  ;;  %p10291_p5 = scmp.lt.s32.totalorder %s264_s14, %s264_s14 }
  0x20   : > { %p10284_p13 = scmp.ne.s32.totalorder %s264_s14, %s10283_s13  ;;  %p10292_p3 = scmp.lt.s32.totalorder %s10283_s13, %s10283_s13 }
  0x22   : > { %p10286_p0 = pnand %p10284_p13, %p10602_p8  ;;  %p10293_p1 = por %p10292_p3, %p10291_p5 }
  0x24   : > { %p10287_p2 = pneg %p10286_p0 }
  0x26   : > { %p10294_p4 = pnand %p10293_p1, %p10287_p2 }
  0x28   : > { %10297 = shalt.err (!%p10294_p4)
}
  0x29   : > { %9950 = dma.hbm_to_vmem [thread:$0]  (!%p10588_p6), %s12155_s2, 512, %s264_s14, [#allocation6]  }
  0x2a   : > { %s12157_s4 = sld [smem:[#allocation18_spill]] }
  0x30   : > { %s10298_s24 = scalar_lea.hbm %s12157_s4, 128 }
  0x31   : > { %p10299_p7 = scmp.ne.s32.totalorder %s12157_s4, %s10298_s24  ;;  %p10305_p1 = scmp.lt.u32.totalorder %s10298_s24, %s12157_s4 }
  0x33   : > { %p10301_p9 = pnand %p10299_p7, %p10602_p8 }
  0x35   : > { %p10302_p3 = pneg %p10301_p9 }
  0x37   : > { %p10307_p4 = pnand %p10305_p1, %p10302_p3 }
  0x39   : > { %10310 = shalt.err (!%p10307_p4)
}
  0x3a   : > { %s10311_s14 = scalar_lea.vmem %s10584_s18, 128  ;;  %p10319_p13 = scmp.lt.s32.totalorder %s10584_s18, %s10584_s18 }
  0x3b   : > { %p10312_p10 = scmp.ne.s32.totalorder %s10584_s18, %s10311_s14  ;;  %p10320_p0 = scmp.lt.s32.totalorder %s10311_s14, %s10311_s14 }
  0x3d   : > { %p10314_p11 = pnand %p10312_p10, %p10602_p8  ;;  %p10321_p2 = por %p10320_p0, %p10319_p13 }
  0x3f   : > { %p10315_p12 = pneg %p10314_p11 }
  0x41   : > { %p10322_p5 = pnand %p10321_p2, %p10315_p12 }
  0x43   : > { %10325 = shalt.err (!%p10322_p5)
}
  0x44   : > { %9956 = dma.hbm_to_vmem [thread:$0]  (!%p10588_p6), %s12157_s4, 128, %s10584_s18, [#allocation9]  }
  0x45   : > { %s10326_s23 = scalar_lea.hbm %s12141_s3, 16384 }
  0x46   : > { %p10327_p7 = scmp.ne.s32.totalorder %s12141_s3, %s10326_s23  ;;  %p10333_p1 = scmp.lt.u32.totalorder %s10326_s23, %s12141_s3 }
  0x48   : > { %p10329_p9 = pnand %p10327_p7, %p10602_p8 }
  0x4a   : > { %p10330_p3 = pneg %p10329_p9 }
  0x4c   : > { %p10335_p4 = pnand %p10333_p1, %p10330_p3 }
  0x4e   : > { %10338 = shalt.err (!%p10335_p4)
}
  0x4f   : > { %s10339_s18 = scalar_lea.vmem %s10592_s20, 16384  ;;  %p10347_p13 = scmp.lt.s32.totalorder %s10592_s20, %s10592_s20 }
  0x50   : > { %p10340_p10 = scmp.ne.s32.totalorder %s10592_s20, %s10339_s18  ;;  %p10348_p0 = scmp.lt.s32.totalorder %s10339_s18, %s10339_s18 }
  0x52   : > { %p10342_p11 = pnand %p10340_p10, %p10602_p8  ;;  %p10349_p2 = por %p10348_p0, %p10347_p13 }
  0x54   : > { %p10343_p12 = pneg %p10342_p11 }
  0x56   : > { %p10350_p5 = pnand %p10349_p2, %p10343_p12 }
  0x58   : > { %10353 = shalt.err (!%p10350_p5)
}
  0x59   : > { %s10491_s29 = smov 128   ;;  %s10492_s14 = smov 8  }
  0x5a   : > { %9953 = dma.hbm_to_vmem [thread:$0]  (!%p10588_p6), %s12141_s3, 16384, %s10592_s20, [#allocation6], %s10491_s29, %s10491_s29, %s10492_s14  }
  0x5b   : > { %s10493_s19 = smov [#allocation10]   ;;  %s10494_s23 = smov [#allocation11]  }
  0x5c   : > { %s301_s22 = sshll.u32 %s10493_s19, 4  ;;  %s315_s24 = sshll.u32 %s10494_s23, 4  ;;  %s302_s22 = int_to_ptr.vmem [resolvable:$true] %s301_s22  ;;  %s316_s24 = int_to_ptr.vmem [resolvable:$true] %s315_s24 }
  0x5d   : > { %s10354_s28 = scalar_lea.hbm %s12144_s6, 64 }
  0x5e   : > { %p10355_p7 = scmp.ne.s32.totalorder %s12144_s6, %s10354_s28  ;;  %p10361_p1 = scmp.lt.u32.totalorder %s10354_s28, %s12144_s6 }
  0x60   : > { %p10357_p9 = pnand %p10355_p7, %p10602_p8 }
  0x62   : > { %p10358_p3 = pneg %p10357_p9 }
  0x64   : > { %p10363_p4 = pnand %p10361_p1, %p10358_p3 }
  0x66   : > { %10366 = shalt.err (!%p10363_p4)
}
  0x67   : > { %s10367_s20 = scalar_lea.vmem %s302_s22, 64  ;;  %p10375_p13 = scmp.lt.s32.totalorder %s302_s22, %s302_s22 }
  0x68   : > { %p10368_p10 = scmp.ne.s32.totalorder %s302_s22, %s10367_s20  ;;  %p10376_p0 = scmp.lt.s32.totalorder %s10367_s20, %s10367_s20 }
  0x6a   : > { %p10370_p11 = pnand %p10368_p10, %p10602_p8  ;;  %p10377_p2 = por %p10376_p0, %p10375_p13 }
  0x6c   : > { %p10371_p12 = pneg %p10370_p11 }
  0x6e   : > { %p10378_p5 = pnand %p10377_p2, %p10371_p12 }
  0x70   : > { %10381 = shalt.err (!%p10378_p5)
}
  0x71   : > { %9959 = dma.hbm_to_vmem [thread:$0]  (!%p10588_p6), %s12144_s6, 64, %s302_s22, [#allocation9]  }
  0x72   : > { %s10382_s14 = scalar_lea.hbm %s12146_s8, 16 }
  0x73   : > { %p10383_p7 = scmp.ne.s32.totalorder %s12146_s8, %s10382_s14  ;;  %p10389_p1 = scmp.lt.u32.totalorder %s10382_s14, %s12146_s8 }
  0x75   : > { %p10385_p9 = pnand %p10383_p7, %p10602_p8 }
  0x77   : > { %p10386_p3 = pneg %p10385_p9 }
  0x79   : > { %p10391_p4 = pnand %p10389_p1, %p10386_p3 }
  0x7b   : > { %10394 = shalt.err (!%p10391_p4)
}
  0x7c   : > { %s10395_s25 = scalar_lea.vmem %s316_s24, 16  ;;  %s10402_s22 = scalar_lea.vmem %s316_s24, 32 }
  0x7d   : > { %p10396_p10 = scmp.ne.s32.totalorder %s316_s24, %s10395_s25  ;;  %p10403_p13 = scmp.lt.s32.totalorder %s316_s24, %s316_s24 }
  0x7e   : > { %p10404_p0 = scmp.lt.s32.totalorder %s10402_s22, %s10395_s25 }
  0x7f   : > { %p10398_p11 = pnand %p10396_p10, %p10602_p8 }
  0x80   : > { %p10405_p2 = por %p10404_p0, %p10403_p13 }
  0x81   : > { %p10399_p12 = pneg %p10398_p11 }
  0x83   : > { %p10406_p5 = pnand %p10405_p2, %p10399_p12 }
  0x85   : > { %10409 = shalt.err (!%p10406_p5)
}
  0x86   : > { %9962 = dma.hbm_to_vmem [thread:$0]  (!%p10588_p6), %s12146_s8, 16, %s316_s24, [#allocation12]  }
  0x87   : > { %s10701_s27 = sadd.s32 1, %s10486_s12   ;;  %s58_s18 = sadd.s32 1, %s10482_s11 }
  0x88   : > { %s55_s21 = ssub.s32 %s10486_s12, %s10701_s27  ;;  %p65_p7 = scmp.ne.s32.totalorder %s10482_s11, %s10478_s10 }
  0x89   : > { %p56_p8 = scmp.eq.s32.totalorder %s55_s21, 0  ;;  %p66_p9 = scmp.eq.s32.totalorder %s10486_s12, 0 }
  0x8a   : > { %p71_p3 = scmp.ne.s32.totalorder %s10478_s10, %s10474_s30  ;;  %p12158_p4 = scmp.eq.s32.totalorder %s10572_s15, 0 }
  0x8b   : > { %s10712_s20 = scalar_select %p56_p8, %s10482_s11, %s58_s18  }
  0x8c   : > { %p67_p1 = por %p66_p9, %p65_p7  ;;  %p10716_p10 = por %p12158_p4, %p71_p3 }
  0x8d   : > { %p9972_p11 = scmp.lt.s32.totalorder %s10486_s12, 2  ;;  %s335_s29 = sand.u32 1, %s10482_s11  }
  0x8e   : > { %s9923_s24 = smul.u32 7168, %s335_s29  ;;  %s10415_s26 = scalar_lea.hbm %s12139_s1, 229376 }
  0x8f   : > { %s9871_s4 = smul.u32 114688, %s10486_s12  ;;  %p10723_p6 = pnand %p9972_p11, %p67_p1 }
  0x90   : > { %s339_s17 = scalar_lea.vmem [#allocation3], %s9923_s24  ;;  %s10734_s12 = scalar_lea.sflag [#allocation4], %s335_s29 }
  0x91   : > { %s10730_s30 = scalar_lea.hbm %s12139_s1, %s9871_s4  ;;  %s347_s19 = sshll.u32 %s339_s17, 4  ;;  %s10732_s19 = int_to_ptr.vmem [resolvable:$true] %s347_s19 }
  0x92   : > { %s10410_s23 = scalar_lea.hbm %s10730_s30, 114688  ;;  %p10412_p13 = pneg %p10723_p6 }
  0x93   : > { %p10411_p12 = scmp.ne.s32.totalorder %s10730_s30, %s10410_s23  ;;  %p10416_p5 = scmp.lt.u32.totalorder %s10730_s30, %s12139_s1 }
  0x94   : > { %p10417_p8 = scmp.lt.u32.totalorder %s10415_s26, %s10410_s23  ;;  %p10419_p9 = scmp.lt.u32.totalorder %s10410_s23, %s10730_s30 }
  0x95   : > { %p10413_p0 = pnand %p10412_p13, %p10411_p12 }
  0x96   : > { %p10418_p7 = por %p10417_p8, %p10416_p5 }
  0x97   : > { %p10414_p2 = pneg %p10413_p0 }
  0x98   : > { %p10420_p3 = por %p10419_p9, %p10418_p7 }
  0x9a   : > { %p10421_p1 = pnand %p10420_p3, %p10414_p2 }
  0x9c   : > { %10424 = shalt.err (!%p10421_p1)
}
  0x9d   : > { %s10425_s18 = scalar_lea.vmem %s10732_s19, 114688  ;;  %s10495_s29 = smov [#allocation3]  }
  0x9e   : > { %p10426_p4 = scmp.ne.s32.totalorder %s10732_s19, %s10425_s18  ;;  %s10430_s24 = sshll.u32 %s10495_s29, 4  ;;  %s10431_s24 = int_to_ptr.vmem [resolvable:$false] %s10430_s24 }
  0x9f   : > { %s10432_s4 = scalar_lea.vmem %s10431_s24, 229376  ;;  %p10433_p0 = scmp.lt.s32.totalorder %s10732_s19, %s10431_s24 }
  0xa0   : > { %p10428_p11 = pnand %p10426_p4, %p10412_p13  ;;  %p10434_p5 = scmp.lt.s32.totalorder %s10432_s4, %s10425_s18 }
  0xa2   : > { %p10429_p12 = pneg %p10428_p11  ;;  %p10435_p8 = por %p10434_p5, %p10433_p0 }
  0xa4   : > { %p10436_p7 = pnand %p10435_p8, %p10429_p12 }
  0xa6   : > { %10439 = shalt.err (!%p10436_p7)
}
  0xa7   : > { %s10496_s14 = smov 512   ;;  %s10497_s13 = smov 32  }
  0xa8   : > { %9966 = dma.hbm_to_vmem [thread:$0]  (!%p10723_p6), %s10730_s30, 114688, %s10732_s19, %s10734_s12, %s10496_s14, %s10496_s14, %s10497_s13  }
  0xa9   : > { %p12161_p13 = scmp.ne.s32.totalorder %s12153_s16, 0 }
  0xaa   : > { %s361_s17 = sand.u32 (!%p12161_p13), 1, %s10478_s10  }
  0xab   : > { %359 = sbr.rel (%p12161_p13) target bundleno = 2205 (0x89d), region = 56  ;;  %s362_s25 = scalar_lea.sflag (!%p12161_p13), [#allocation4], %s361_s17 }
  0xac   : > { %s9924_s23 = smul.u32 (!%p12161_p13), 7168, %s361_s17 }
  0xae   : > { %s10765_s22 = scalar_lea.vmem (!%p12161_p13), [#allocation3], %s9924_s23 }
  0xb2   : > { %10457 = dma.done.wait (%p10716_p10), %s362_s25, 114688  }
  0xb3   : > { %10459 = vsyncadd (%p10716_p10), %s362_s25, 4294852608  ;;  %p12162_p2 = scmp.eq.s32.totalorder %s10572_s15, 0 }
  0xb5   : > { %10461 = dma.done.wait (%p12162_p2), [#allocation6], 16896   ;;  %p12163_p6 = pmov %p12162_p2 }
  0xb6   : > { %p12164_p9 = pmov %p12162_p2 }
  0xb7   : > { %10463 = vsyncadd (%p12163_p6), [#allocation6], 4294950400 }
  0xb8   : > { %10465 = dma.done.wait (%p12164_p9), [#allocation9], 192   ;;  %p12165_p3 = pmov %p12162_p2 }
  0xb9   : > { %p12166_p1 = pmov %p12162_p2 }
  0xba   : > { %10467 = vsyncadd (%p12165_p3), [#allocation9], 4294967104 }
  0xbb   : > { %10469 = dma.done.wait (%p12166_p1), [#allocation12], 16   ;;  %p12167_p4 = pmov %p12166_p1 }
  0xbc   : > { %s420_s16 = smul.u32 14, %s10572_s15  ;;  %p12168_p11 = scmp.ne.s32.totalorder %s10572_s15, 0 }
  0xbd   : > { %10471 = vsyncadd (%p12167_p4), [#allocation12], 4294967280  ;;  %v10498_v0 = vmov (!%p12168_p11), 0.0  }
  0xbe   : > { %p421_p10 = scmp.lt.s32.totalorder %s420_s16, 27  ;;  %431 = sbr.rel (%p12168_p11) target bundleno = 197 (0xc5), region = 84  ;;  %432 = vst [vmem:[#allocation2] sm:$0xff] (!%p12168_p11), %v10498_v0  ;;  %433 = vst [vmem:[#allocation2 + $0x8] sm:$0xff] (!%p12168_p11), %v10498_v0 }
  0xbf   : > { %434 = vst [vmem:[#allocation2 + $0x10] sm:$0xff] (!%p12168_p11), %v10498_v0  ;;  %435 = vst [vmem:[#allocation2 + $0x18] sm:$0xff] (!%p12168_p11), %v10498_v0 }
  0xc0   : > { %s12175_s16 = smov (!%p421_p10, %s420_s16), 27  ;;  %436 = vst [vmem:[#allocation2 + $0x20] sm:$0xff] (!%p12168_p11), %v10498_v0  ;;  %437 = vst [vmem:[#allocation2 + $0x28] sm:$0xff] (!%p12168_p11), %v10498_v0 }
  0xc1   : > { %s8801_s2 = sshll.u32 %s12175_s16, 2  ;;  %438 = vst [vmem:[#allocation2 + $0x30] sm:$0xff] (!%p12168_p11), %v10498_v0  ;;  %439 = vst [vmem:[#allocation2 + $0x38] sm:$0xff] (!%p12168_p11), %v10498_v0 }
  0xc2   : > { %s10787_s19 = scalar_lea.vmem %s12138_s0, %s8801_s2 }
  0xc5 PF: > { %v455_v1 = vld [vmem:[%s10765_s22] sm:$0xff]  ;;  %v10823_v55 = vld [vmem:[%s10787_s19 + $0x8] sm:$0xff]  ;;  %p9713_p12 = scmp.ne.s32.totalorder %s10572_s15, 1 }
  0xc6   : > { %v459_v2 = vld [vmem:[%s10765_s22 + $0x20] sm:$0xff]  ;;  %v10833_v60 = vcombine.high %v10823_v55, %v10823_v55  ;;  %vm10500_vm0 = vmmov (!%p9713_p12), 0   ;;  %vm8568_vm1 = vcmask (!%p9713_p12), 523264   ;;  %vm8684_vm2 = vcmask (!%p9713_p12), 15360   ;;  %s12169_s26 = sld [smem:[#allocation19_spill]] (!%p9713_p12) }
  0xc7   : > { %v583_v3 = vld [vmem:[%s10765_s22 + $0x400] sm:$0xff]  ;;  %v8818_v4 = vcombine.high %v455_v1, %v459_v2  ;;  %v8817_v6 = vcombine.low %v455_v1, %v459_v2 }
  0xc8   : > { %v587_v5 = vld [vmem:[%s10765_s22 + $0x420] sm:$0xff]  ;;  %5953 = vmatprep.mubr.bf16.mxu1 %v10833_v60 }
  0xc9   : > { %v463_v7 = vld [vmem:[%s10765_s22 + $0x40] sm:$0xff]  ;;  %v8946_v9 = vcombine.high %v583_v3, %v587_v5  ;;  %v8945_v10 = vcombine.low %v583_v3, %v587_v5  ;;  %5880 = vmatprep.subr.bf16.mxu0 %v8818_v4 }
  0xca   : > { %v467_v8 = vld [vmem:[%s10765_s22 + $0x60] sm:$0xff]  ;;  %5881 = vmatpush1.bf16.msra.mxu0 %v8817_v6 }
  0xcb   : > { %v8826_v11 = vcombine.high %v463_v7, %v467_v8  ;;  %v591_v12 = vld [vmem:[%s10765_s22 + $0x440] sm:$0xff]  ;;  %5921 = vmatprep.subr.bf16.mxu1 %v8946_v9  ;;  %v8825_v19 = vcombine.low %v463_v7, %v467_v8 }
  0xcc   : > { %v595_v13 = vld [vmem:[%s10765_s22 + $0x460] sm:$0xff]  ;;  %5922 = vmatpush1.bf16.msra.mxu1 %v8945_v10 }
  0xcd   : > { %v471_v14 = vld [vmem:[%s10765_s22 + $0x80] sm:$0xff]  ;;  %v8954_v15 = vcombine.high %v591_v12, %v595_v13  ;;  %5882 = vmatprep.subr.bf16.mxu0 %v8826_v11  ;;  %v8953_v20 = vcombine.low %v591_v12, %v595_v13 }
  0xce   : > { %v475_v16 = vld [vmem:[%s10765_s22 + $0xa0] sm:$0xff]  ;;  %5883 = vmatpush1.bf16.msra.mxu0 %v8825_v19 }
  0xcf   : > { %v599_v17 = vld [vmem:[%s10765_s22 + $0x480] sm:$0xff]  ;;  %v8834_v21 = vcombine.high %v471_v14, %v475_v16  ;;  %5923 = vmatprep.subr.bf16.mxu1 %v8954_v15  ;;  %v8833_v27 = vcombine.low %v471_v14, %v475_v16 }
  0xd0   : > { %v603_v18 = vld [vmem:[%s10765_s22 + $0x4a0] sm:$0xff]  ;;  %5924 = vmatpush1.bf16.msra.mxu1 %v8953_v20 }
  0xd1   : > { %v8962_v22 = vcombine.high %v599_v17, %v603_v18  ;;  %v479_v23 = vld [vmem:[%s10765_s22 + $0xc0] sm:$0xff]  ;;  %5884 = vmatprep.subr.bf16.mxu0 %v8834_v21  ;;  %v8961_v28 = vcombine.low %v599_v17, %v603_v18 }
  0xd2   : > { %v483_v24 = vld [vmem:[%s10765_s22 + $0xe0] sm:$0xff]  ;;  %5885 = vmatpush1.bf16.msra.mxu0 %v8833_v27 }
  0xd3   : > { %v607_v25 = vld [vmem:[%s10765_s22 + $0x4c0] sm:$0xff]  ;;  %v8842_v29 = vcombine.high %v479_v23, %v483_v24  ;;  %5925 = vmatprep.subr.bf16.mxu1 %v8962_v22  ;;  %v8841_v35 = vcombine.low %v479_v23, %v483_v24 }
  0xd4   : > { %v611_v26 = vld [vmem:[%s10765_s22 + $0x4e0] sm:$0xff]  ;;  %5926 = vmatpush1.bf16.msra.mxu1 %v8961_v28 }
  0xd5   : > { %v8970_v30 = vcombine.high %v607_v25, %v611_v26  ;;  %v487_v31 = vld [vmem:[%s10765_s22 + $0x100] sm:$0xff]  ;;  %5886 = vmatprep.subr.bf16.mxu0 %v8842_v29  ;;  %v8969_v36 = vcombine.low %v607_v25, %v611_v26 }
  0xd6   : > { %v491_v32 = vld [vmem:[%s10765_s22 + $0x120] sm:$0xff]  ;;  %5887 = vmatpush1.bf16.msra.mxu0 %v8841_v35 }
  0xd7   : > { %v615_v33 = vld [vmem:[%s10765_s22 + $0x500] sm:$0xff]  ;;  %v8850_v37 = vcombine.high %v487_v31, %v491_v32  ;;  %5927 = vmatprep.subr.bf16.mxu1 %v8970_v30  ;;  %v8849_v43 = vcombine.low %v487_v31, %v491_v32 }
  0xd8   : > { %v619_v34 = vld [vmem:[%s10765_s22 + $0x520] sm:$0xff]  ;;  %5928 = vmatpush1.bf16.msra.mxu1 %v8969_v36 }
  0xd9   : > { %v8978_v38 = vcombine.high %v615_v33, %v619_v34  ;;  %v495_v39 = vld [vmem:[%s10765_s22 + $0x140] sm:$0xff]  ;;  %5888 = vmatprep.subr.bf16.mxu0 %v8850_v37  ;;  %v8977_v44 = vcombine.low %v615_v33, %v619_v34 }
  0xda   : > { %v499_v40 = vld [vmem:[%s10765_s22 + $0x160] sm:$0xff]  ;;  %5889 = vmatpush1.bf16.msra.mxu0 %v8849_v43 }
  0xdb   : > { %v623_v41 = vld [vmem:[%s10765_s22 + $0x540] sm:$0xff]  ;;  %v8858_v45 = vcombine.high %v495_v39, %v499_v40  ;;  %5929 = vmatprep.subr.bf16.mxu1 %v8978_v38  ;;  %v8857_v51 = vcombine.low %v495_v39, %v499_v40 }
  0xdc   : > { %v627_v42 = vld [vmem:[%s10765_s22 + $0x560] sm:$0xff]  ;;  %5930 = vmatpush1.bf16.msra.mxu1 %v8977_v44 }
  0xdd   : > { %v8986_v46 = vcombine.high %v623_v41, %v627_v42  ;;  %v503_v47 = vld [vmem:[%s10765_s22 + $0x180] sm:$0xff]  ;;  %5890 = vmatprep.subr.bf16.mxu0 %v8858_v45  ;;  %v8985_v52 = vcombine.low %v623_v41, %v627_v42 }
  0xde   : > { %v507_v48 = vld [vmem:[%s10765_s22 + $0x1a0] sm:$0xff]  ;;  %5891 = vmatpush1.bf16.msra.mxu0 %v8857_v51 }
  0xdf   : > { %v631_v49 = vld [vmem:[%s10765_s22 + $0x580] sm:$0xff]  ;;  %v8866_v53 = vcombine.high %v503_v47, %v507_v48  ;;  %5931 = vmatprep.subr.bf16.mxu1 %v8986_v46  ;;  %v8865_v63 = vcombine.low %v503_v47, %v507_v48 }
  0xe0   : > { %v635_v50 = vld [vmem:[%s10765_s22 + $0x5a0] sm:$0xff]  ;;  %5932 = vmatpush1.bf16.msra.mxu1 %v8985_v52 }
  0xe1   : > { %v10820_v54 = vld [vmem:[%s10787_s19] sm:$0xff]  ;;  %v8994_v56 = vcombine.high %v631_v49, %v635_v50  ;;  %5892 = vmatprep.subr.bf16.mxu0 %v8866_v53  ;;  %v8993_v0 = vcombine.low %v631_v49, %v635_v50 }
  0xe2   : > { %v511_v57 = vld [vmem:[%s10765_s22 + $0x1c0] sm:$0xff]  ;;  %v10829_v59 = vcombine.high %v10820_v54, %v10820_v54  ;;  %5893 = vmatpush1.bf16.msra.mxu0 %v8865_v63 }
  0xe3   : > { %v515_v58 = vld [vmem:[%s10765_s22 + $0x1e0] sm:$0xff]  ;;  %5933 = vmatprep.subr.bf16.mxu1 %v8994_v56 }
  0xe4   : > { %v639_v61 = vld [vmem:[%s10765_s22 + $0x5c0] sm:$0xff]  ;;  %5912 = vmatprep.mubr.bf16.mxu0 %v10829_v59  ;;  %v8874_v1 = vcombine.high %v511_v57, %v515_v58  ;;  %v8873_v7 = vcombine.low %v511_v57, %v515_v58  ;;  %5934 = vmatpush1.bf16.msra.mxu1 %v8993_v0 }
  0xe5   : > { %v643_v62 = vld [vmem:[%s10765_s22 + $0x5e0] sm:$0xff] }
  0xe6   : > { %v9002_v2 = vcombine.high %v639_v61, %v643_v62  ;;  %v519_v3 = vld [vmem:[%s10765_s22 + $0x200] sm:$0xff]  ;;  %5894 = vmatprep.subr.bf16.mxu0 %v8874_v1  ;;  %v9001_v8 = vcombine.low %v639_v61, %v643_v62 }
  0xe7   : > { %v523_v4 = vld [vmem:[%s10765_s22 + $0x220] sm:$0xff]  ;;  %5895 = vmatpush1.bf16.msra.mxu0 %v8873_v7 }
  0xe8   : > { %v647_v5 = vld [vmem:[%s10765_s22 + $0x600] sm:$0xff]  ;;  %v8882_v9 = vcombine.high %v519_v3, %v523_v4  ;;  %5935 = vmatprep.subr.bf16.mxu1 %v9002_v2  ;;  %v8881_v15 = vcombine.low %v519_v3, %v523_v4 }
  0xe9   : > { %v651_v6 = vld [vmem:[%s10765_s22 + $0x620] sm:$0xff]  ;;  %5936 = vmatpush1.bf16.msra.mxu1 %v9001_v8 }
  0xea   : > { %v9010_v10 = vcombine.high %v647_v5, %v651_v6  ;;  %v527_v11 = vld [vmem:[%s10765_s22 + $0x240] sm:$0xff]  ;;  %5896 = vmatprep.subr.bf16.mxu0 %v8882_v9  ;;  %v9009_v16 = vcombine.low %v647_v5, %v651_v6 }
  0xeb   : > { %v531_v12 = vld [vmem:[%s10765_s22 + $0x260] sm:$0xff]  ;;  %5897 = vmatpush1.bf16.msra.mxu0 %v8881_v15 }
  0xec   : > { %v655_v13 = vld [vmem:[%s10765_s22 + $0x640] sm:$0xff]  ;;  %v8890_v17 = vcombine.high %v527_v11, %v531_v12  ;;  %5937 = vmatprep.subr.bf16.mxu1 %v9010_v10  ;;  %v8889_v23 = vcombine.low %v527_v11, %v531_v12 }
  0xed   : > { %v659_v14 = vld [vmem:[%s10765_s22 + $0x660] sm:$0xff]  ;;  %5938 = vmatpush1.bf16.msra.mxu1 %v9009_v16 }
  0xee   : > { %v9018_v18 = vcombine.high %v655_v13, %v659_v14  ;;  %v535_v19 = vld [vmem:[%s10765_s22 + $0x280] sm:$0xff]  ;;  %5898 = vmatprep.subr.bf16.mxu0 %v8890_v17  ;;  %v9017_v24 = vcombine.low %v655_v13, %v659_v14  ;;  %v10879_v17 = vcombine.low %v10820_v54, %v10820_v54 }
  0xef   : > { %v539_v20 = vld [vmem:[%s10765_s22 + $0x2a0] sm:$0xff]  ;;  %5899 = vmatpush1.bf16.msra.mxu0 %v8889_v23  ;;  %v10891_v23 = vld [vmem:[%s10787_s19 + $0x18] sm:$0xff] }
  0xf0   : > { %v663_v21 = vld [vmem:[%s10765_s22 + $0x680] sm:$0xff]  ;;  %v8898_v25 = vcombine.high %v535_v19, %v539_v20  ;;  %5939 = vmatprep.subr.bf16.mxu1 %v9018_v18  ;;  %v8897_v31 = vcombine.low %v535_v19, %v539_v20  ;;  %v10884_v20 = vld [vmem:[%s10787_s19 + $0x10] sm:$0xff] }
  0xf1   : > { %v667_v22 = vld [vmem:[%s10765_s22 + $0x6a0] sm:$0xff]  ;;  %5940 = vmatpush1.bf16.msra.mxu1 %v9017_v24 }
  0xf2   : > { %v9026_v26 = vcombine.high %v663_v21, %v667_v22  ;;  %v543_v27 = vld [vmem:[%s10765_s22 + $0x2c0] sm:$0xff]  ;;  %5900 = vmatprep.subr.bf16.mxu0 %v8898_v25  ;;  %v9025_v32 = vcombine.low %v663_v21, %v667_v22  ;;  %v10888_v21 = vcombine.low %v10823_v55, %v10823_v55 }
  0xf3   : > { %v547_v28 = vld [vmem:[%s10765_s22 + $0x2e0] sm:$0xff]  ;;  %5901 = vmatpush1.bf16.msra.mxu0 %v8897_v31 }
  0xf4   : > { %v671_v29 = vld [vmem:[%s10765_s22 + $0x6c0] sm:$0xff]  ;;  %v8906_v33 = vcombine.high %v543_v27, %v547_v28  ;;  %5941 = vmatprep.subr.bf16.mxu1 %v9026_v26  ;;  %v8905_v39 = vcombine.low %v543_v27, %v547_v28  ;;  %v10897_v28 = vcombine.high %v10884_v20, %v10884_v20 }
  0xf5   : > { %v675_v30 = vld [vmem:[%s10765_s22 + $0x6e0] sm:$0xff]  ;;  %5942 = vmatpush1.bf16.msra.mxu1 %v9025_v32 }
  0xf6   : > { %v9034_v34 = vcombine.high %v671_v29, %v675_v30  ;;  %v551_v35 = vld [vmem:[%s10765_s22 + $0x300] sm:$0xff]  ;;  %5902 = vmatprep.subr.bf16.mxu0 %v8906_v33  ;;  %v9033_v40 = vcombine.low %v671_v29, %v675_v30  ;;  %v10904_v30 = vcombine.high %v10891_v23, %v10891_v23 }
  0xf7   : > { %v555_v36 = vld [vmem:[%s10765_s22 + $0x320] sm:$0xff]  ;;  %5903 = vmatpush1.bf16.msra.mxu0 %v8905_v39 }
  0xf8   : > { %v679_v37 = vld [vmem:[%s10765_s22 + $0x700] sm:$0xff]  ;;  %v8914_v41 = vcombine.high %v551_v35, %v555_v36  ;;  %5943 = vmatprep.subr.bf16.mxu1 %v9034_v34  ;;  %v8913_v47 = vcombine.low %v551_v35, %v555_v36 }
  0xf9   : > { %v683_v38 = vld [vmem:[%s10765_s22 + $0x720] sm:$0xff]  ;;  %5944 = vmatpush1.bf16.msra.mxu1 %v9033_v40 }
  0xfa   : > { %v9042_v42 = vcombine.high %v679_v37, %v683_v38  ;;  %v559_v43 = vld [vmem:[%s10765_s22 + $0x340] sm:$0xff]  ;;  %5904 = vmatprep.subr.bf16.mxu0 %v8914_v41  ;;  %v9041_v48 = vcombine.low %v679_v37, %v683_v38 }
  0xfb   : > { %v563_v44 = vld [vmem:[%s10765_s22 + $0x360] sm:$0xff]  ;;  %5905 = vmatpush1.bf16.msra.mxu0 %v8913_v47 }
  0xfc   : > { %v687_v45 = vld [vmem:[%s10765_s22 + $0x740] sm:$0xff]  ;;  %v8922_v49 = vcombine.high %v559_v43, %v563_v44  ;;  %5945 = vmatprep.subr.bf16.mxu1 %v9042_v42  ;;  %v8921_v57 = vcombine.low %v559_v43, %v563_v44 }
  0xfd   : > { %v691_v46 = vld [vmem:[%s10765_s22 + $0x760] sm:$0xff]  ;;  %5946 = vmatpush1.bf16.msra.mxu1 %v9041_v48 }
  0xfe   : > { %v9050_v50 = vcombine.high %v687_v45, %v691_v46  ;;  %v567_v51 = vld [vmem:[%s10765_s22 + $0x380] sm:$0xff]  ;;  %5906 = vmatprep.subr.bf16.mxu0 %v8922_v49  ;;  %v9049_v58 = vcombine.low %v687_v45, %v691_v46 }
  0xff   : > { %v571_v52 = vld [vmem:[%s10765_s22 + $0x3a0] sm:$0xff]  ;;  %5907 = vmatpush1.bf16.msra.mxu0 %v8921_v57 }
 0x100   : > { %v695_v53 = vld [vmem:[%s10765_s22 + $0x780] sm:$0xff]  ;;  %v8930_v61 = vcombine.high %v567_v51, %v571_v52  ;;  %5947 = vmatprep.subr.bf16.mxu1 %v9050_v50  ;;  %v8929_v3 = vcombine.low %v567_v51, %v571_v52 }
 0x101   : > { %v699_v56 = vld [vmem:[%s10765_s22 + $0x7a0] sm:$0xff]  ;;  %5948 = vmatpush1.bf16.msra.mxu1 %v9049_v58 }
 0x102   : > { %v9058_v62 = vcombine.high %v695_v53, %v699_v56  ;;  %v575_v63 = vld [vmem:[%s10765_s22 + $0x3c0] sm:$0xff]  ;;  %5908 = vmatprep.subr.bf16.mxu0 %v8930_v61  ;;  %v9057_v4 = vcombine.low %v695_v53, %v699_v56 }
 0x103   : > { %v579_v0 = vld [vmem:[%s10765_s22 + $0x3e0] sm:$0xff]  ;;  %5909 = vmatpush1.bf16.msra.mxu0 %v8929_v3 }
 0x104   : > { %v703_v1 = vld [vmem:[%s10765_s22 + $0x7c0] sm:$0xff]  ;;  %v8938_v5 = vcombine.high %v575_v63, %v579_v0  ;;  %5949 = vmatprep.subr.bf16.mxu1 %v9058_v62  ;;  %v8937_v11 = vcombine.low %v575_v63, %v579_v0 }
 0x105   : > { %v707_v2 = vld [vmem:[%s10765_s22 + $0x7e0] sm:$0xff]  ;;  %5950 = vmatpush1.bf16.msra.mxu1 %v9057_v4 }
 0x106   : > { %v9066_v6 = vcombine.high %v703_v1, %v707_v2  ;;  %v711_v7 = vld [vmem:[%s10765_s22 + $0x800] sm:$0xff]  ;;  %5910 = vmatprep.subr.bf16.mxu0 %v8938_v5  ;;  %v9065_v12 = vcombine.low %v703_v1, %v707_v2 }
 0x107   : > { %v715_v8 = vld [vmem:[%s10765_s22 + $0x820] sm:$0xff]  ;;  %5911 = vmatpush1.bf16.msra.mxu0 %v8937_v11 }
 0x108   : > { %v839_v9 = vld [vmem:[%s10765_s22 + $0xc00] sm:$0xff]  ;;  %v9074_v13 = vcombine.high %v711_v7, %v715_v8  ;;  %5951 = vmatprep.subr.bf16.mxu1 %v9066_v6  ;;  %v9073_v22 = vcombine.low %v711_v7, %v715_v8 }
 0x109   : > { %v843_v10 = vld [vmem:[%s10765_s22 + $0xc20] sm:$0xff]  ;;  %5952 = vmatpush1.bf16.msra.mxu1 %v9065_v12 }
 0x10a   : > { %v9202_v14 = vcombine.high %v839_v9, %v843_v10  ;;  %v719_v15 = vld [vmem:[%s10765_s22 + $0x840] sm:$0xff]  ;;  %5962 = vmatprep.subr.bf16.mxu0 %v9074_v13  ;;  %v9201_v24 = vcombine.low %v839_v9, %v843_v10  ;;  %5913 = vmatmul.mubr.bf16.vlgmr.msra.gmra.mrb[0].mxu0 %v10879_v17 }
 0x10b   : > { %v723_v16 = vld [vmem:[%s10765_s22 + $0x860] sm:$0xff]  ;;  %5963 = vmatpush1.bf16.msra.mxu0 %v9073_v22  ;;  %5994 = vmatprep.mubr.bf16.mxu0 %v10897_v28 }
 0x10c   : > { %v847_v18 = vld [vmem:[%s10765_s22 + $0xc40] sm:$0xff]  ;;  %v9082_v25 = vcombine.high %v719_v15, %v723_v16  ;;  %6003 = vmatprep.subr.bf16.mxu1 %v9202_v14  ;;  %5954 = vmatmul.mubr.bf16.vlgmr.msra.gmra.mrb[0].mxu1 %v10888_v21  ;;  %v9081_v31 = vcombine.low %v719_v15, %v723_v16 }
 0x10d   : > { %v851_v19 = vld [vmem:[%s10765_s22 + $0xc60] sm:$0xff]  ;;  %6004 = vmatpush1.bf16.msra.mxu1 %v9201_v24  ;;  %6035 = vmatprep.mubr.bf16.mxu1 %v10904_v30 }
 0x10e   : > { %v9210_v54 = vcombine.high %v847_v18, %v851_v19  ;;  %v727_v26 = vld [vmem:[%s10765_s22 + $0x880] sm:$0xff]  ;;  %5964 = vmatprep.subr.bf16.mxu0 %v9082_v25  ;;  %v9209_v32 = vcombine.low %v847_v18, %v851_v19 }
 0x10f   : > { %v731_v27 = vld [vmem:[%s10765_s22 + $0x8a0] sm:$0xff]  ;;  %5965 = vmatpush1.bf16.msra.mxu0 %v9081_v31 }
 0x110   : > { %v855_v55 = vld [vmem:[%s10765_s22 + $0xc80] sm:$0xff]  ;;  %v9090_v33 = vcombine.high %v727_v26, %v731_v27  ;;  %6005 = vmatprep.subr.bf16.mxu1 %v9210_v54  ;;  %v9089_v39 = vcombine.low %v727_v26, %v731_v27 }
 0x111   : > { %v859_v29 = vld [vmem:[%s10765_s22 + $0xca0] sm:$0xff]  ;;  %6006 = vmatpush1.bf16.msra.mxu1 %v9209_v32 }
 0x112   : > { %v9218_v34 = vcombine.high %v855_v55, %v859_v29  ;;  %v735_v35 = vld [vmem:[%s10765_s22 + $0x8c0] sm:$0xff]  ;;  %5966 = vmatprep.subr.bf16.mxu0 %v9090_v33  ;;  %v9217_v40 = vcombine.low %v855_v55, %v859_v29 }
 0x113   : > { %v739_v36 = vld [vmem:[%s10765_s22 + $0x8e0] sm:$0xff]  ;;  %5967 = vmatpush1.bf16.msra.mxu0 %v9089_v39 }
 0x114   : > { %v863_v37 = vld [vmem:[%s10765_s22 + $0xcc0] sm:$0xff]  ;;  %v9098_v41 = vcombine.high %v735_v35, %v739_v36  ;;  %6007 = vmatprep.subr.bf16.mxu1 %v9218_v34  ;;  %v9097_v47 = vcombine.low %v735_v35, %v739_v36 }
 0x115   : > { %v867_v38 = vld [vmem:[%s10765_s22 + $0xce0] sm:$0xff]  ;;  %6008 = vmatpush1.bf16.msra.mxu1 %v9217_v40 }
 0x116   : > { %v9226_v42 = vcombine.high %v863_v37, %v867_v38  ;;  %v743_v43 = vld [vmem:[%s10765_s22 + $0x900] sm:$0xff]  ;;  %5968 = vmatprep.subr.bf16.mxu0 %v9098_v41  ;;  %v9225_v48 = vcombine.low %v863_v37, %v867_v38 }
 0x117   : > { %v747_v44 = vld [vmem:[%s10765_s22 + $0x920] sm:$0xff]  ;;  %5969 = vmatpush1.bf16.msra.mxu0 %v9097_v47 }
 0x118   : > { %v871_v45 = vld [vmem:[%s10765_s22 + $0xd00] sm:$0xff]  ;;  %v9106_v49 = vcombine.high %v743_v43, %v747_v44  ;;  %6009 = vmatprep.subr.bf16.mxu1 %v9226_v42  ;;  %v9105_v57 = vcombine.low %v743_v43, %v747_v44 }
 0x119   : > { %v875_v46 = vld [vmem:[%s10765_s22 + $0xd20] sm:$0xff]  ;;  %6010 = vmatpush1.bf16.msra.mxu1 %v9225_v48 }
 0x11a   : > { %v9234_v50 = vcombine.high %v871_v45, %v875_v46  ;;  %v751_v51 = vld [vmem:[%s10765_s22 + $0x940] sm:$0xff]  ;;  %5970 = vmatprep.subr.bf16.mxu0 %v9106_v49  ;;  %v9233_v58 = vcombine.low %v871_v45, %v875_v46 }
 0x11b   : > { %v755_v52 = vld [vmem:[%s10765_s22 + $0x960] sm:$0xff]  ;;  %5971 = vmatpush1.bf16.msra.mxu0 %v9105_v57 }
 0x11c   : > { %v879_v53 = vld [vmem:[%s10765_s22 + $0xd40] sm:$0xff]  ;;  %v9114_v61 = vcombine.high %v751_v51, %v755_v52  ;;  %6011 = vmatprep.subr.bf16.mxu1 %v9234_v50  ;;  %v9113_v3 = vcombine.low %v751_v51, %v755_v52 }
 0x11d   : > { %v883_v56 = vld [vmem:[%s10765_s22 + $0xd60] sm:$0xff]  ;;  %6012 = vmatpush1.bf16.msra.mxu1 %v9233_v58 }
 0x11e   : > { %v9242_v62 = vcombine.high %v879_v53, %v883_v56  ;;  %v759_v63 = vld [vmem:[%s10765_s22 + $0x980] sm:$0xff]  ;;  %5972 = vmatprep.subr.bf16.mxu0 %v9114_v61  ;;  %v9241_v4 = vcombine.low %v879_v53, %v883_v56 }
 0x11f   : > { %v763_v0 = vld [vmem:[%s10765_s22 + $0x9a0] sm:$0xff]  ;;  %5973 = vmatpush1.bf16.msra.mxu0 %v9113_v3 }
 0x120   : > { %v887_v1 = vld [vmem:[%s10765_s22 + $0xd80] sm:$0xff]  ;;  %v9122_v5 = vcombine.high %v759_v63, %v763_v0  ;;  %6013 = vmatprep.subr.bf16.mxu1 %v9242_v62  ;;  %v9121_v11 = vcombine.low %v759_v63, %v763_v0 }
 0x121   : > { %v891_v2 = vld [vmem:[%s10765_s22 + $0xda0] sm:$0xff]  ;;  %6014 = vmatpush1.bf16.msra.mxu1 %v9241_v4 }
 0x122   : > { %v9250_v6 = vcombine.high %v887_v1, %v891_v2  ;;  %v767_v7 = vld [vmem:[%s10765_s22 + $0x9c0] sm:$0xff]  ;;  %5974 = vmatprep.subr.bf16.mxu0 %v9122_v5  ;;  %v9249_v12 = vcombine.low %v887_v1, %v891_v2 }
 0x123   : > { %v771_v8 = vld [vmem:[%s10765_s22 + $0x9e0] sm:$0xff]  ;;  %5975 = vmatpush1.bf16.msra.mxu0 %v9121_v11 }
 0x124   : > { %v895_v9 = vld [vmem:[%s10765_s22 + $0xdc0] sm:$0xff]  ;;  %v9130_v13 = vcombine.high %v767_v7, %v771_v8  ;;  %6015 = vmatprep.subr.bf16.mxu1 %v9250_v6  ;;  %v9129_v22 = vcombine.low %v767_v7, %v771_v8 }
 0x125   : > { %v899_v10 = vld [vmem:[%s10765_s22 + $0xde0] sm:$0xff]  ;;  %6016 = vmatpush1.bf16.msra.mxu1 %v9249_v12 }
 0x126   : > { %v9258_v14 = vcombine.high %v895_v9, %v899_v10  ;;  %v775_v15 = vld [vmem:[%s10765_s22 + $0xa00] sm:$0xff]  ;;  %5976 = vmatprep.subr.bf16.mxu0 %v9130_v13  ;;  %v9257_v24 = vcombine.low %v895_v9, %v899_v10 }
 0x127   : > { %v779_v16 = vld [vmem:[%s10765_s22 + $0xa20] sm:$0xff]  ;;  %5977 = vmatpush1.bf16.msra.mxu0 %v9129_v22 }
 0x128   : > { %v903_v18 = vld [vmem:[%s10765_s22 + $0xe00] sm:$0xff]  ;;  %v9138_v25 = vcombine.high %v775_v15, %v779_v16  ;;  %6017 = vmatprep.subr.bf16.mxu1 %v9258_v14  ;;  %v9137_v31 = vcombine.low %v775_v15, %v779_v16 }
 0x129   : > { %v907_v19 = vld [vmem:[%s10765_s22 + $0xe20] sm:$0xff]  ;;  %6018 = vmatpush1.bf16.msra.mxu1 %v9257_v24 }
 0x12a   : > { %v9266_v54 = vcombine.high %v903_v18, %v907_v19  ;;  %v783_v26 = vld [vmem:[%s10765_s22 + $0xa40] sm:$0xff]  ;;  %5978 = vmatprep.subr.bf16.mxu0 %v9138_v25  ;;  %v9265_v32 = vcombine.low %v903_v18, %v907_v19 }
 0x12b   : > { %v787_v27 = vld [vmem:[%s10765_s22 + $0xa60] sm:$0xff]  ;;  %5979 = vmatpush1.bf16.msra.mxu0 %v9137_v31 }
 0x12c   : > { %v911_v55 = vld [vmem:[%s10765_s22 + $0xe40] sm:$0xff]  ;;  %v9146_v33 = vcombine.high %v783_v26, %v787_v27  ;;  %6019 = vmatprep.subr.bf16.mxu1 %v9266_v54  ;;  %v9145_v39 = vcombine.low %v783_v26, %v787_v27 }
 0x12d   : > { %v915_v29 = vld [vmem:[%s10765_s22 + $0xe60] sm:$0xff]  ;;  %6020 = vmatpush1.bf16.msra.mxu1 %v9265_v32 }
 0x12e   : > { %v9274_v34 = vcombine.high %v911_v55, %v915_v29  ;;  %v791_v35 = vld [vmem:[%s10765_s22 + $0xa80] sm:$0xff]  ;;  %5980 = vmatprep.subr.bf16.mxu0 %v9146_v33  ;;  %v9273_v40 = vcombine.low %v911_v55, %v915_v29 }
 0x12f   : > { %v795_v36 = vld [vmem:[%s10765_s22 + $0xaa0] sm:$0xff]  ;;  %5981 = vmatpush1.bf16.msra.mxu0 %v9145_v39 }
 0x130   : > { %v919_v37 = vld [vmem:[%s10765_s22 + $0xe80] sm:$0xff]  ;;  %v9154_v41 = vcombine.high %v791_v35, %v795_v36  ;;  %6021 = vmatprep.subr.bf16.mxu1 %v9274_v34  ;;  %v9153_v47 = vcombine.low %v791_v35, %v795_v36 }
 0x131   : > { %v923_v38 = vld [vmem:[%s10765_s22 + $0xea0] sm:$0xff]  ;;  %6022 = vmatpush1.bf16.msra.mxu1 %v9273_v40 }
 0x132   : > { %v9282_v42 = vcombine.high %v919_v37, %v923_v38  ;;  %v799_v43 = vld [vmem:[%s10765_s22 + $0xac0] sm:$0xff]  ;;  %5982 = vmatprep.subr.bf16.mxu0 %v9154_v41  ;;  %v9281_v48 = vcombine.low %v919_v37, %v923_v38  ;;  %v10969_v37 = vcombine.low %v10884_v20, %v10884_v20  ;;  %v10978_v41 = vcombine.low %v10891_v23, %v10891_v23 }
 0x133   : > { %v803_v44 = vld [vmem:[%s10765_s22 + $0xae0] sm:$0xff]  ;;  %5983 = vmatpush1.bf16.msra.mxu0 %v9153_v47 }
 0x134   : > { %v927_v45 = vld [vmem:[%s10765_s22 + $0xec0] sm:$0xff]  ;;  %v9162_v49 = vcombine.high %v799_v43, %v803_v44  ;;  %6023 = vmatprep.subr.bf16.mxu1 %v9282_v42  ;;  %v9161_v57 = vcombine.low %v799_v43, %v803_v44  ;;  %v10981_v43 = vld [vmem:[%s10787_s19 + $0x28] sm:$0xff] }
 0x135   : > { %v931_v46 = vld [vmem:[%s10765_s22 + $0xee0] sm:$0xff]  ;;  %6024 = vmatpush1.bf16.msra.mxu1 %v9281_v48 }
 0x136   : > { %v9290_v50 = vcombine.high %v927_v45, %v931_v46  ;;  %v807_v51 = vld [vmem:[%s10765_s22 + $0xb00] sm:$0xff]  ;;  %5984 = vmatprep.subr.bf16.mxu0 %v9162_v49  ;;  %v9289_v58 = vcombine.low %v927_v45, %v931_v46 }
 0x137   : > { %v811_v52 = vld [vmem:[%s10765_s22 + $0xb20] sm:$0xff]  ;;  %5985 = vmatpush1.bf16.msra.mxu0 %v9161_v57 }
 0x138   : > { %v935_v53 = vld [vmem:[%s10765_s22 + $0xf00] sm:$0xff]  ;;  %v9170_v61 = vcombine.high %v807_v51, %v811_v52  ;;  %6025 = vmatprep.subr.bf16.mxu1 %v9290_v50  ;;  %v9169_v3 = vcombine.low %v807_v51, %v811_v52  ;;  %v10994_v50 = vcombine.high %v10981_v43, %v10981_v43 }
 0x139   : > { %v939_v56 = vld [vmem:[%s10765_s22 + $0xf20] sm:$0xff]  ;;  %6026 = vmatpush1.bf16.msra.mxu1 %v9289_v58 }
 0x13a   : > { %v9298_v62 = vcombine.high %v935_v53, %v939_v56  ;;  %v815_v63 = vld [vmem:[%s10765_s22 + $0xb40] sm:$0xff]  ;;  %5986 = vmatprep.subr.bf16.mxu0 %v9170_v61  ;;  %v9297_v4 = vcombine.low %v935_v53, %v939_v56 }
 0x13b   : > { %v819_v0 = vld [vmem:[%s10765_s22 + $0xb60] sm:$0xff]  ;;  %5987 = vmatpush1.bf16.msra.mxu0 %v9169_v3 }
 0x13c   : > { %v943_v1 = vld [vmem:[%s10765_s22 + $0xf40] sm:$0xff]  ;;  %v9178_v5 = vcombine.high %v815_v63, %v819_v0  ;;  %6027 = vmatprep.subr.bf16.mxu1 %v9298_v62  ;;  %v9177_v11 = vcombine.low %v815_v63, %v819_v0 }
 0x13d   : > { %v947_v2 = vld [vmem:[%s10765_s22 + $0xf60] sm:$0xff]  ;;  %6028 = vmatpush1.bf16.msra.mxu1 %v9297_v4 }
 0x13e   : > { %v9306_v6 = vcombine.high %v943_v1, %v947_v2  ;;  %v823_v7 = vld [vmem:[%s10765_s22 + $0xb80] sm:$0xff]  ;;  %5988 = vmatprep.subr.bf16.mxu0 %v9178_v5  ;;  %v9305_v12 = vcombine.low %v943_v1, %v947_v2 }
 0x13f   : > { %v827_v8 = vld [vmem:[%s10765_s22 + $0xba0] sm:$0xff]  ;;  %5989 = vmatpush1.bf16.msra.mxu0 %v9177_v11 }
 0x140   : > { %v951_v9 = vld [vmem:[%s10765_s22 + $0xf80] sm:$0xff]  ;;  %v9186_v13 = vcombine.high %v823_v7, %v827_v8  ;;  %6029 = vmatprep.subr.bf16.mxu1 %v9306_v6  ;;  %v9185_v22 = vcombine.low %v823_v7, %v827_v8 }
 0x141   : > { %v955_v10 = vld [vmem:[%s10765_s22 + $0xfa0] sm:$0xff]  ;;  %6030 = vmatpush1.bf16.msra.mxu1 %v9305_v12 }
 0x142   : > { %v9314_v14 = vcombine.high %v951_v9, %v955_v10  ;;  %v831_v15 = vld [vmem:[%s10765_s22 + $0xbc0] sm:$0xff]  ;;  %5990 = vmatprep.subr.bf16.mxu0 %v9186_v13  ;;  %v9313_v24 = vcombine.low %v951_v9, %v955_v10 }
 0x143   : > { %v835_v16 = vld [vmem:[%s10765_s22 + $0xbe0] sm:$0xff]  ;;  %5991 = vmatpush1.bf16.msra.mxu0 %v9185_v22 }
 0x144   : > { %v959_v18 = vld [vmem:[%s10765_s22 + $0xfc0] sm:$0xff]  ;;  %v9194_v25 = vcombine.high %v831_v15, %v835_v16  ;;  %6031 = vmatprep.subr.bf16.mxu1 %v9314_v14  ;;  %v9193_v31 = vcombine.low %v831_v15, %v835_v16 }
 0x145   : > { %v963_v19 = vld [vmem:[%s10765_s22 + $0xfe0] sm:$0xff]  ;;  %6032 = vmatpush1.bf16.msra.mxu1 %v9313_v24 }
 0x146   : > { %v9322_v54 = vcombine.high %v959_v18, %v963_v19  ;;  %v967_v26 = vld [vmem:[%s10765_s22 + $0x1000] sm:$0xff]  ;;  %5992 = vmatprep.subr.bf16.mxu0 %v9194_v25  ;;  %v9321_v32 = vcombine.low %v959_v18, %v963_v19 }
 0x147   : > { %v971_v27 = vld [vmem:[%s10765_s22 + $0x1020] sm:$0xff]  ;;  %5993 = vmatpush1.bf16.msra.mxu0 %v9193_v31 }
 0x148   : > { %v1095_v55 = vld [vmem:[%s10765_s22 + $0x1400] sm:$0xff]  ;;  %v9330_v33 = vcombine.high %v967_v26, %v971_v27  ;;  %6033 = vmatprep.subr.bf16.mxu1 %v9322_v54  ;;  %v9329_v42 = vcombine.low %v967_v26, %v971_v27 }
 0x149   : > { %v1099_v29 = vld [vmem:[%s10765_s22 + $0x1420] sm:$0xff]  ;;  %6034 = vmatpush1.bf16.msra.mxu1 %v9321_v32 }
 0x14a   : > { %v9458_v34 = vcombine.high %v1095_v55, %v1099_v29  ;;  %v975_v35 = vld [vmem:[%s10765_s22 + $0x1040] sm:$0xff]  ;;  %6044 = vmatprep.subr.bf16.mxu0 %v9330_v33  ;;  %v9457_v44 = vcombine.low %v1095_v55, %v1099_v29  ;;  %5995 = vmatmul.mubr.bf16.vlgmr.msra.gmra.mrb[4].mxu0 %v10969_v37 }
 0x14b   : > { %v979_v36 = vld [vmem:[%s10765_s22 + $0x1060] sm:$0xff]  ;;  %6045 = vmatpush1.bf16.msra.mxu0 %v9329_v42 }
 0x14c   : > { %v1103_v38 = vld [vmem:[%s10765_s22 + $0x1440] sm:$0xff]  ;;  %v9338_v45 = vcombine.high %v975_v35, %v979_v36  ;;  %6085 = vmatprep.subr.bf16.mxu1 %v9458_v34  ;;  %6036 = vmatmul.mubr.bf16.vlgmr.msra.gmra.mrb[4].mxu1 %v10978_v41  ;;  %v9337_v51 = vcombine.low %v975_v35, %v979_v36 }
 0x14d   : > { %v1107_v39 = vld [vmem:[%s10765_s22 + $0x1460] sm:$0xff]  ;;  %6086 = vmatpush1.bf16.msra.mxu1 %v9457_v44  ;;  %6117 = vmatprep.mubr.bf16.mxu1 %v10994_v50 }
 0x14e   : > { %v10974_v40 = vld [vmem:[%s10787_s19 + $0x20] sm:$0xff]  ;;  %v9466_v20 = vcombine.high %v1103_v38, %v1107_v39  ;;  %6046 = vmatprep.subr.bf16.mxu0 %v9338_v45  ;;  %v9465_v52 = vcombine.low %v1103_v38, %v1107_v39 }
 0x14f   : > { %v983_v46 = vld [vmem:[%s10765_s22 + $0x1080] sm:$0xff]  ;;  %v10987_v48 = vcombine.high %v10974_v40, %v10974_v40  ;;  %6047 = vmatpush1.bf16.msra.mxu0 %v9337_v51 }
 0x150   : > { %v987_v47 = vld [vmem:[%s10765_s22 + $0x10a0] sm:$0xff]  ;;  %6087 = vmatprep.subr.bf16.mxu1 %v9466_v20 }
 0x151   : > { %v1111_v23 = vld [vmem:[%s10765_s22 + $0x1480] sm:$0xff]  ;;  %v9346_v53 = vcombine.high %v983_v46, %v987_v47  ;;  %6076 = vmatprep.mubr.bf16.mxu0 %v10987_v48  ;;  %v9345_v63 = vcombine.low %v983_v46, %v987_v47  ;;  %6088 = vmatpush1.bf16.msra.mxu1 %v9465_v52 }
 0x152   : > { %v1115_v49 = vld [vmem:[%s10765_s22 + $0x14a0] sm:$0xff] }
 0x153   : > { %v9474_v56 = vcombine.high %v1111_v23, %v1115_v49  ;;  %v991_v57 = vld [vmem:[%s10765_s22 + $0x10c0] sm:$0xff]  ;;  %6048 = vmatprep.subr.bf16.mxu0 %v9346_v53  ;;  %v9473_v0 = vcombine.low %v1111_v23, %v1115_v49 }
 0x154   : > { %v995_v58 = vld [vmem:[%s10765_s22 + $0x10e0] sm:$0xff]  ;;  %6049 = vmatpush1.bf16.msra.mxu0 %v9345_v63 }
 0x155   : > { %v1119_v61 = vld [vmem:[%s10765_s22 + $0x14c0] sm:$0xff]  ;;  %v9354_v1 = vcombine.high %v991_v57, %v995_v58  ;;  %6089 = vmatprep.subr.bf16.mxu1 %v9474_v56  ;;  %v9353_v7 = vcombine.low %v991_v57, %v995_v58 }
 0x156   : > { %v1123_v62 = vld [vmem:[%s10765_s22 + $0x14e0] sm:$0xff]  ;;  %6090 = vmatpush1.bf16.msra.mxu1 %v9473_v0 }
 0x157   : > { %v9482_v2 = vcombine.high %v1119_v61, %v1123_v62  ;;  %v999_v3 = vld [vmem:[%s10765_s22 + $0x1100] sm:$0xff]  ;;  %6050 = vmatprep.subr.bf16.mxu0 %v9354_v1  ;;  %v9481_v8 = vcombine.low %v1119_v61, %v1123_v62 }
 0x158   : > { %v1003_v4 = vld [vmem:[%s10765_s22 + $0x1120] sm:$0xff]  ;;  %6051 = vmatpush1.bf16.msra.mxu0 %v9353_v7 }
 0x159   : > { %v1127_v5 = vld [vmem:[%s10765_s22 + $0x1500] sm:$0xff]  ;;  %v9362_v9 = vcombine.high %v999_v3, %v1003_v4  ;;  %6091 = vmatprep.subr.bf16.mxu1 %v9482_v2  ;;  %v9361_v15 = vcombine.low %v999_v3, %v1003_v4 }
 0x15a   : > { %v1131_v6 = vld [vmem:[%s10765_s22 + $0x1520] sm:$0xff]  ;;  %6092 = vmatpush1.bf16.msra.mxu1 %v9481_v8 }
 0x15b   : > { %v9490_v10 = vcombine.high %v1127_v5, %v1131_v6  ;;  %v1007_v11 = vld [vmem:[%s10765_s22 + $0x1140] sm:$0xff]  ;;  %6052 = vmatprep.subr.bf16.mxu0 %v9362_v9  ;;  %v9489_v16 = vcombine.low %v1127_v5, %v1131_v6 }
 0x15c   : > { %v1011_v12 = vld [vmem:[%s10765_s22 + $0x1160] sm:$0xff]  ;;  %6053 = vmatpush1.bf16.msra.mxu0 %v9361_v15 }
 0x15d   : > { %v1135_v13 = vld [vmem:[%s10765_s22 + $0x1540] sm:$0xff]  ;;  %v9370_v18 = vcombine.high %v1007_v11, %v1011_v12  ;;  %6093 = vmatprep.subr.bf16.mxu1 %v9490_v10  ;;  %v9369_v26 = vcombine.low %v1007_v11, %v1011_v12 }
 0x15e   : > { %v1139_v14 = vld [vmem:[%s10765_s22 + $0x1560] sm:$0xff]  ;;  %6094 = vmatpush1.bf16.msra.mxu1 %v9489_v16 }
 0x15f   : > { %v9498_v19 = vcombine.high %v1135_v13, %v1139_v14  ;;  %v1015_v22 = vld [vmem:[%s10765_s22 + $0x1180] sm:$0xff]  ;;  %6054 = vmatprep.subr.bf16.mxu0 %v9370_v18  ;;  %v9497_v27 = vcombine.low %v1135_v13, %v1139_v14 }
 0x160   : > { %v1019_v24 = vld [vmem:[%s10765_s22 + $0x11a0] sm:$0xff]  ;;  %6055 = vmatpush1.bf16.msra.mxu0 %v9369_v26 }
 0x161   : > { %v1143_v25 = vld [vmem:[%s10765_s22 + $0x1580] sm:$0xff]  ;;  %v9378_v55 = vcombine.high %v1015_v22, %v1019_v24  ;;  %6095 = vmatprep.subr.bf16.mxu1 %v9498_v19  ;;  %v9377_v35 = vcombine.low %v1015_v22, %v1019_v24 }
 0x162   : > { %v1147_v54 = vld [vmem:[%s10765_s22 + $0x15a0] sm:$0xff]  ;;  %6096 = vmatpush1.bf16.msra.mxu1 %v9497_v27 }
 0x163   : > { %v9506_v29 = vcombine.high %v1143_v25, %v1147_v54  ;;  %v1023_v31 = vld [vmem:[%s10765_s22 + $0x11c0] sm:$0xff]  ;;  %6056 = vmatprep.subr.bf16.mxu0 %v9378_v55  ;;  %v9505_v36 = vcombine.low %v1143_v25, %v1147_v54 }
 0x164   : > { %v1027_v32 = vld [vmem:[%s10765_s22 + $0x11e0] sm:$0xff]  ;;  %6057 = vmatpush1.bf16.msra.mxu0 %v9377_v35 }
 0x165   : > { %v1151_v33 = vld [vmem:[%s10765_s22 + $0x15c0] sm:$0xff]  ;;  %v9386_v38 = vcombine.high %v1023_v31, %v1027_v32  ;;  %6097 = vmatprep.subr.bf16.mxu1 %v9506_v29  ;;  %v9385_v46 = vcombine.low %v1023_v31, %v1027_v32 }
 0x166   : > { %v1155_v34 = vld [vmem:[%s10765_s22 + $0x15e0] sm:$0xff]  ;;  %6098 = vmatpush1.bf16.msra.mxu1 %v9505_v36 }
 0x167   : > { %v9514_v39 = vcombine.high %v1151_v33, %v1155_v34  ;;  %v1031_v42 = vld [vmem:[%s10765_s22 + $0x1200] sm:$0xff]  ;;  %6058 = vmatprep.subr.bf16.mxu0 %v9386_v38  ;;  %v9513_v47 = vcombine.low %v1151_v33, %v1155_v34 }
 0x168   : > { %v1035_v44 = vld [vmem:[%s10765_s22 + $0x1220] sm:$0xff]  ;;  %6059 = vmatpush1.bf16.msra.mxu0 %v9385_v46 }
 0x169   : > { %v1159_v45 = vld [vmem:[%s10765_s22 + $0x1600] sm:$0xff]  ;;  %v9394_v23 = vcombine.high %v1031_v42, %v1035_v44  ;;  %6099 = vmatprep.subr.bf16.mxu1 %v9514_v39  ;;  %v9393_v57 = vcombine.low %v1031_v42, %v1035_v44 }
 0x16a   : > { %v1163_v20 = vld [vmem:[%s10765_s22 + $0x1620] sm:$0xff]  ;;  %6100 = vmatpush1.bf16.msra.mxu1 %v9513_v47 }
 0x16b   : > { %v9522_v49 = vcombine.high %v1159_v45, %v1163_v20  ;;  %v1039_v51 = vld [vmem:[%s10765_s22 + $0x1240] sm:$0xff]  ;;  %6060 = vmatprep.subr.bf16.mxu0 %v9394_v23  ;;  %v9521_v58 = vcombine.low %v1159_v45, %v1163_v20 }
 0x16c   : > { %v1043_v52 = vld [vmem:[%s10765_s22 + $0x1260] sm:$0xff]  ;;  %6061 = vmatpush1.bf16.msra.mxu0 %v9393_v57 }
 0x16d   : > { %v1167_v53 = vld [vmem:[%s10765_s22 + $0x1640] sm:$0xff]  ;;  %v9402_v61 = vcombine.high %v1039_v51, %v1043_v52  ;;  %6101 = vmatprep.subr.bf16.mxu1 %v9522_v49  ;;  %v9401_v3 = vcombine.low %v1039_v51, %v1043_v52 }
 0x16e   : > { %v1171_v56 = vld [vmem:[%s10765_s22 + $0x1660] sm:$0xff]  ;;  %6102 = vmatpush1.bf16.msra.mxu1 %v9521_v58 }
 0x16f   : > { %v9530_v62 = vcombine.high %v1167_v53, %v1171_v56  ;;  %v1047_v63 = vld [vmem:[%s10765_s22 + $0x1280] sm:$0xff]  ;;  %6062 = vmatprep.subr.bf16.mxu0 %v9402_v61  ;;  %v9529_v4 = vcombine.low %v1167_v53, %v1171_v56  ;;  %v456_v61 = vld [vmem:[%s10765_s22 + $0x8] sm:$0xff] }
 0x170   : > { %v1051_v0 = vld [vmem:[%s10765_s22 + $0x12a0] sm:$0xff]  ;;  %6063 = vmatpush1.bf16.msra.mxu0 %v9401_v3 }
 0x171   : > { %v1175_v1 = vld [vmem:[%s10765_s22 + $0x1680] sm:$0xff]  ;;  %v9410_v5 = vcombine.high %v1047_v63, %v1051_v0  ;;  %6103 = vmatprep.subr.bf16.mxu1 %v9530_v62  ;;  %v9409_v11 = vcombine.low %v1047_v63, %v1051_v0  ;;  %v460_v62 = vld [vmem:[%s10765_s22 + $0x28] sm:$0xff] }
 0x172   : > { %v1179_v2 = vld [vmem:[%s10765_s22 + $0x16a0] sm:$0xff]  ;;  %6104 = vmatpush1.bf16.msra.mxu1 %v9529_v4 }
 0x173   : > { %v9538_v6 = vcombine.high %v1175_v1, %v1179_v2  ;;  %v1055_v7 = vld [vmem:[%s10765_s22 + $0x12c0] sm:$0xff]  ;;  %6064 = vmatprep.subr.bf16.mxu0 %v9410_v5  ;;  %v9537_v12 = vcombine.low %v1175_v1, %v1179_v2  ;;  %v8820_v2 = vcombine.high %v456_v61, %v460_v62  ;;  %v11059_v5 = vcombine.low %v10974_v40, %v10974_v40 }
 0x174   : > { %v1059_v8 = vld [vmem:[%s10765_s22 + $0x12e0] sm:$0xff]  ;;  %6065 = vmatpush1.bf16.msra.mxu0 %v9409_v11  ;;  %v8819_v11 = vcombine.low %v456_v61, %v460_v62 }
 0x175   : > { %v1183_v9 = vld [vmem:[%s10765_s22 + $0x16c0] sm:$0xff]  ;;  %v9418_v13 = vcombine.high %v1055_v7, %v1059_v8  ;;  %6105 = vmatprep.subr.bf16.mxu1 %v9538_v6  ;;  %v9417_v22 = vcombine.low %v1055_v7, %v1059_v8  ;;  %v464_v6 = vld [vmem:[%s10765_s22 + $0x48] sm:$0xff]  ;;  %v11064_v8 = vld [vmem:[%s10787_s19 + $0x30] sm:$0xff] }
 0x176   : > { %v1187_v10 = vld [vmem:[%s10765_s22 + $0x16e0] sm:$0xff]  ;;  %6106 = vmatpush1.bf16.msra.mxu1 %v9537_v12  ;;  %v468_v7 = vld [vmem:[%s10765_s22 + $0x68] sm:$0xff] }
 0x177   : > { %v9546_v14 = vcombine.high %v1183_v9, %v1187_v10  ;;  %v1063_v15 = vld [vmem:[%s10765_s22 + $0x1300] sm:$0xff]  ;;  %6066 = vmatprep.subr.bf16.mxu0 %v9418_v13  ;;  %v9545_v24 = vcombine.low %v1183_v9, %v1187_v10  ;;  %v11068_v9 = vcombine.low %v10981_v43, %v10981_v43  ;;  %v8828_v13 = vcombine.high %v464_v6, %v468_v7  ;;  %v472_v43 = vld [vmem:[%s10765_s22 + $0x88] sm:$0xff] }
 0x178   : > { %v1067_v16 = vld [vmem:[%s10765_s22 + $0x1320] sm:$0xff]  ;;  %6067 = vmatpush1.bf16.msra.mxu0 %v9417_v22 }
 0x179   : > { %v1191_v18 = vld [vmem:[%s10765_s22 + $0x1700] sm:$0xff]  ;;  %v9426_v25 = vcombine.high %v1063_v15, %v1067_v16  ;;  %6107 = vmatprep.subr.bf16.mxu1 %v9546_v14  ;;  %v9425_v31 = vcombine.low %v1063_v15, %v1067_v16  ;;  %v11074_v15 = vcombine.high %v11064_v8, %v11064_v8  ;;  %v476_v16 = vld [vmem:[%s10765_s22 + $0xa8] sm:$0xff] }
 0x17a   : > { %v1195_v19 = vld [vmem:[%s10765_s22 + $0x1720] sm:$0xff]  ;;  %6108 = vmatpush1.bf16.msra.mxu1 %v9545_v24  ;;  %v8836_v24 = vcombine.high %v472_v43, %v476_v16 }
 0x17b   : > { %v9554_v54 = vcombine.high %v1191_v18, %v1195_v19  ;;  %v1071_v26 = vld [vmem:[%s10765_s22 + $0x1340] sm:$0xff]  ;;  %6068 = vmatprep.subr.bf16.mxu0 %v9426_v25  ;;  %v9553_v32 = vcombine.low %v1191_v18, %v1195_v19  ;;  %v8827_v19 = vcombine.low %v464_v6, %v468_v7 }
 0x17c   : > { %v1075_v27 = vld [vmem:[%s10765_s22 + $0x1360] sm:$0xff]  ;;  %6069 = vmatpush1.bf16.msra.mxu0 %v9425_v31 }
 0x17d   : > { %v1199_v55 = vld [vmem:[%s10765_s22 + $0x1740] sm:$0xff]  ;;  %v9434_v33 = vcombine.high %v1071_v26, %v1075_v27  ;;  %6109 = vmatprep.subr.bf16.mxu1 %v9554_v54  ;;  %v9433_v42 = vcombine.low %v1071_v26, %v1075_v27  ;;  %v480_v26 = vld [vmem:[%s10765_s22 + $0xc8] sm:$0xff] }
 0x17e   : > { %v1203_v29 = vld [vmem:[%s10765_s22 + $0x1760] sm:$0xff]  ;;  %6110 = vmatpush1.bf16.msra.mxu1 %v9553_v32  ;;  %v484_v27 = vld [vmem:[%s10765_s22 + $0xe8] sm:$0xff] }
 0x17f   : > { %v9562_v34 = vcombine.high %v1199_v55, %v1203_v29  ;;  %v1079_v35 = vld [vmem:[%s10765_s22 + $0x1380] sm:$0xff]  ;;  %6070 = vmatprep.subr.bf16.mxu0 %v9434_v33  ;;  %v9561_v44 = vcombine.low %v1199_v55, %v1203_v29  ;;  %v8835_v29 = vcombine.low %v472_v43, %v476_v16  ;;  %v8844_v32 = vcombine.high %v480_v26, %v484_v27 }
 0x180   : > { %v1083_v36 = vld [vmem:[%s10765_s22 + $0x13a0] sm:$0xff]  ;;  %6071 = vmatpush1.bf16.msra.mxu0 %v9433_v42 }
 0x181   : > { %v1207_v38 = vld [vmem:[%s10765_s22 + $0x1780] sm:$0xff]  ;;  %v9442_v45 = vcombine.high %v1079_v35, %v1083_v36  ;;  %6111 = vmatprep.subr.bf16.mxu1 %v9562_v34  ;;  %v9441_v51 = vcombine.low %v1079_v35, %v1083_v36  ;;  %v488_v35 = vld [vmem:[%s10765_s22 + $0x108] sm:$0xff] }
 0x182   : > { %v1211_v39 = vld [vmem:[%s10765_s22 + $0x17a0] sm:$0xff]  ;;  %6112 = vmatpush1.bf16.msra.mxu1 %v9561_v44  ;;  %v492_v36 = vld [vmem:[%s10765_s22 + $0x128] sm:$0xff] }
 0x183   : > { %v9570_v20 = vcombine.high %v1207_v38, %v1211_v39  ;;  %v1087_v46 = vld [vmem:[%s10765_s22 + $0x13c0] sm:$0xff]  ;;  %6072 = vmatprep.subr.bf16.mxu0 %v9442_v45  ;;  %v9569_v52 = vcombine.low %v1207_v38, %v1211_v39  ;;  %v8843_v39 = vcombine.low %v480_v26, %v484_v27  ;;  %v8852_v44 = vcombine.high %v488_v35, %v492_v36 }
 0x184   : > { %v1091_v47 = vld [vmem:[%s10765_s22 + $0x13e0] sm:$0xff]  ;;  %6073 = vmatpush1.bf16.msra.mxu0 %v9441_v51 }
 0x185   : > { %v1215_v23 = vld [vmem:[%s10765_s22 + $0x17c0] sm:$0xff]  ;;  %v9450_v53 = vcombine.high %v1087_v46, %v1091_v47  ;;  %6113 = vmatprep.subr.bf16.mxu1 %v9570_v20  ;;  %v9449_v63 = vcombine.low %v1087_v46, %v1091_v47  ;;  %v496_v46 = vld [vmem:[%s10765_s22 + $0x148] sm:$0xff] }
 0x186   : > { %v1219_v49 = vld [vmem:[%s10765_s22 + $0x17e0] sm:$0xff]  ;;  %6114 = vmatpush1.bf16.msra.mxu1 %v9569_v52  ;;  %v500_v47 = vld [vmem:[%s10765_s22 + $0x168] sm:$0xff] }
 0x187   : > { %v9578_v56 = vcombine.high %v1215_v23, %v1219_v49  ;;  %v1223_v57 = vld [vmem:[%s10765_s22 + $0x1800] sm:$0xff]  ;;  %6074 = vmatprep.subr.bf16.mxu0 %v9450_v53  ;;  %v9577_v0 = vcombine.low %v1215_v23, %v1219_v49  ;;  %v8851_v49 = vcombine.low %v488_v35, %v492_v36  ;;  %v8860_v52 = vcombine.high %v496_v46, %v500_v47 }
 0x188   : > { %v1227_v58 = vld [vmem:[%s10765_s22 + $0x1820] sm:$0xff]  ;;  %6075 = vmatpush1.bf16.msra.mxu0 %v9449_v63  ;;  %v8859_v62 = vcombine.low %v496_v46, %v500_v47 }
 0x189   : > { %v9586_v1 = vcombine.high %v1223_v57, %v1227_v58  ;;  %6115 = vmatprep.subr.bf16.mxu1 %v9578_v56  ;;  %v1231_v3 = vld [vmem:[%s10765_s22 + $0x1840] sm:$0xff]  ;;  %v9585_v10 = vcombine.low %v1223_v57, %v1227_v58  ;;  %v504_v57 = vld [vmem:[%s10765_s22 + $0x188] sm:$0xff] }
 0x18a   : > { %v1235_v4 = vld [vmem:[%s10765_s22 + $0x1860] sm:$0xff]  ;;  %6116 = vmatpush1.bf16.msra.mxu1 %v9577_v0  ;;  %v508_v58 = vld [vmem:[%s10765_s22 + $0x1a8] sm:$0xff] }
 0x18b   : > { %6126 = vmatprep.subr.bf16.mxu0 %v9586_v1  ;;  %v9594_v12 = vcombine.high %v1231_v3, %v1235_v4  ;;  %6167 = vmatprep.subr.bf16.mxu1 %v8820_v2  ;;  %v1239_v40 = vld [vmem:[%s10765_s22 + $0x1880] sm:$0xff]  ;;  %v9593_v18 = vcombine.low %v1231_v3, %v1235_v4  ;;  %v8868_v0 = vcombine.high %v504_v57, %v508_v58  ;;  %v512_v3 = vld [vmem:[%s10765_s22 + $0x1c8] sm:$0xff] }
 0x18c   : > { %v1243_v14 = vld [vmem:[%s10765_s22 + $0x18a0] sm:$0xff]  ;;  %6077 = vmatmul.mubr.bf16.vlgmr.msra.gmra.mrb[8].mxu0 %v11059_v5  ;;  %v516_v4 = vld [vmem:[%s10765_s22 + $0x1e8] sm:$0xff]  ;;  %v8867_v7 = vcombine.low %v504_v57, %v508_v58 }
 0x18d   : > { %6118 = vmatmul.mubr.bf16.vlgmr.msra.gmra.mrb[8].mxu1 %v11068_v9  ;;  %6127 = vmatpush1.bf16.msra.mxu0 %v9585_v10  ;;  %v9602_v22 = vcombine.high %v1239_v40, %v1243_v14  ;;  %v1247_v25 = vld [vmem:[%s10765_s22 + $0x18c0] sm:$0xff]  ;;  %v9601_v55 = vcombine.low %v1239_v40, %v1243_v14  ;;  %v520_v40 = vld [vmem:[%s10765_s22 + $0x208] sm:$0xff]  ;;  %v8875_v16 = vcombine.low %v512_v3, %v516_v4 }
 0x18e   : > { %6168 = vmatpush1.bf16.msra.mxu1 %v8819_v11  ;;  %6128 = vmatprep.subr.bf16.mxu0 %v9594_v12  ;;  %v1251_v54 = vld [vmem:[%s10765_s22 + $0x18e0] sm:$0xff]  ;;  %v8876_v11 = vcombine.high %v512_v3, %v516_v4  ;;  %v524_v14 = vld [vmem:[%s10765_s22 + $0x228] sm:$0xff] }
 0x18f   : > { %6169 = vmatprep.subr.bf16.mxu1 %v8828_v13  ;;  %6158 = vmatprep.mubr.bf16.mxu0 %v11074_v15  ;;  %v9610_v31 = vcombine.high %v1247_v25, %v1251_v54  ;;  %v1255_v33 = vld [vmem:[%s10765_s22 + $0x1900] sm:$0xff]  ;;  %v9609_v38 = vcombine.low %v1247_v25, %v1251_v54  ;;  %v528_v25 = vld [vmem:[%s10765_s22 + $0x248] sm:$0xff]  ;;  %v8883_v27 = vcombine.low %v520_v40, %v524_v14 }
 0x190   : > { %6199 = vmatprep.mubr.bf16.mxu1 %v10829_v59  ;;  %v1259_v34 = vld [vmem:[%s10765_s22 + $0x1920] sm:$0xff]  ;;  %v532_v54 = vld [vmem:[%s10765_s22 + $0x268] sm:$0xff] }
 0x191   : > { %6129 = vmatpush1.bf16.msra.mxu0 %v9593_v18  ;;  %v9618_v42 = vcombine.high %v1255_v33, %v1259_v34  ;;  %v1263_v45 = vld [vmem:[%s10765_s22 + $0x1940] sm:$0xff]  ;;  %v9617_v23 = vcombine.low %v1255_v33, %v1259_v34  ;;  %v536_v33 = vld [vmem:[%s10765_s22 + $0x288] sm:$0xff]  ;;  %v8891_v36 = vcombine.low %v528_v25, %v532_v54 }
 0x192   : > { %6170 = vmatpush1.bf16.msra.mxu1 %v8827_v19  ;;  %6130 = vmatprep.subr.bf16.mxu0 %v9602_v22  ;;  %v1267_v20 = vld [vmem:[%s10765_s22 + $0x1960] sm:$0xff]  ;;  %v8884_v19 = vcombine.high %v520_v40, %v524_v14  ;;  %v540_v34 = vld [vmem:[%s10765_s22 + $0x2a8] sm:$0xff] }
 0x193   : > { %6171 = vmatprep.subr.bf16.mxu1 %v8836_v24  ;;  %v9626_v51 = vcombine.high %v1263_v45, %v1267_v20  ;;  %v1271_v53 = vld [vmem:[%s10765_s22 + $0x1980] sm:$0xff]  ;;  %v9625_v61 = vcombine.low %v1263_v45, %v1267_v20  ;;  %v544_v45 = vld [vmem:[%s10765_s22 + $0x2c8] sm:$0xff]  ;;  %v8899_v47 = vcombine.low %v536_v33, %v540_v34 }
 0x194   : > { %v1275_v56 = vld [vmem:[%s10765_s22 + $0x19a0] sm:$0xff]  ;;  %v548_v20 = vld [vmem:[%s10765_s22 + $0x2e8] sm:$0xff] }
 0x195   : > { %6131 = vmatpush1.bf16.msra.mxu0 %v9601_v55  ;;  %v9634_v63 = vcombine.high %v1271_v53, %v1275_v56  ;;  %v1279_v1 = vld [vmem:[%s10765_s22 + $0x19c0] sm:$0xff]  ;;  %v9633_v6 = vcombine.low %v1271_v53, %v1275_v56  ;;  %v552_v53 = vld [vmem:[%s10765_s22 + $0x308] sm:$0xff]  ;;  %v8907_v58 = vcombine.low %v544_v45, %v548_v20 }
 0x196   : > { %6172 = vmatpush1.bf16.msra.mxu1 %v8835_v29  ;;  %6132 = vmatprep.subr.bf16.mxu0 %v9610_v31  ;;  %v1283_v2 = vld [vmem:[%s10765_s22 + $0x19e0] sm:$0xff]  ;;  %v8892_v29 = vcombine.high %v528_v25, %v532_v54  ;;  %v556_v56 = vld [vmem:[%s10765_s22 + $0x328] sm:$0xff] }
 0x197   : > { %6173 = vmatprep.subr.bf16.mxu1 %v8844_v32  ;;  %v9642_v10 = vcombine.high %v1279_v1, %v1283_v2  ;;  %v1287_v12 = vld [vmem:[%s10765_s22 + $0x1a00] sm:$0xff]  ;;  %v9641_v43 = vcombine.low %v1279_v1, %v1283_v2  ;;  %v560_v1 = vld [vmem:[%s10765_s22 + $0x348] sm:$0xff]  ;;  %v8915_v4 = vcombine.low %v552_v53, %v556_v56 }
 0x198   : > { %v1291_v13 = vld [vmem:[%s10765_s22 + $0x1a20] sm:$0xff]  ;;  %v564_v2 = vld [vmem:[%s10765_s22 + $0x368] sm:$0xff] }
 0x199   : > { %6133 = vmatpush1.bf16.msra.mxu0 %v9609_v38  ;;  %v9650_v18 = vcombine.high %v1287_v12, %v1291_v13  ;;  %v1295_v22 = vld [vmem:[%s10765_s22 + $0x1a40] sm:$0xff]  ;;  %v9649_v26 = vcombine.low %v1287_v12, %v1291_v13  ;;  %v568_v12 = vld [vmem:[%s10765_s22 + $0x388] sm:$0xff]  ;;  %v8923_v14 = vcombine.low %v560_v1, %v564_v2 }
 0x19a   : > { %6174 = vmatpush1.bf16.msra.mxu1 %v8843_v39  ;;  %6134 = vmatprep.subr.bf16.mxu0 %v9618_v42  ;;  %v1299_v24 = vld [vmem:[%s10765_s22 + $0x1a60] sm:$0xff]  ;;  %v8900_v39 = vcombine.high %v536_v33, %v540_v34  ;;  %v572_v13 = vld [vmem:[%s10765_s22 + $0x3a8] sm:$0xff] }
 0x19b   : > { %6175 = vmatprep.subr.bf16.mxu1 %v8852_v44  ;;  %v9658_v55 = vcombine.high %v1295_v22, %v1299_v24  ;;  %v1303_v31 = vld [vmem:[%s10765_s22 + $0x1a80] sm:$0xff]  ;;  %v9657_v35 = vcombine.low %v1295_v22, %v1299_v24  ;;  %v576_v22 = vld [vmem:[%s10765_s22 + $0x3c8] sm:$0xff]  ;;  %v8931_v54 = vcombine.low %v568_v12, %v572_v13 }
 0x19c   : > { %v1307_v32 = vld [vmem:[%s10765_s22 + $0x1aa0] sm:$0xff]  ;;  %v580_v24 = vld [vmem:[%s10765_s22 + $0x3e8] sm:$0xff] }
 0x19d   : > { %6135 = vmatpush1.bf16.msra.mxu0 %v9617_v23  ;;  %v9666_v38 = vcombine.high %v1303_v31, %v1307_v32  ;;  %v1311_v42 = vld [vmem:[%s10765_s22 + $0x1ac0] sm:$0xff]  ;;  %v9665_v46 = vcombine.low %v1303_v31, %v1307_v32  ;;  %v712_v31 = vld [vmem:[%s10765_s22 + $0x808] sm:$0xff]  ;;  %v8939_v34 = vcombine.low %v576_v22, %v580_v24 }
 0x19e   : > { %6176 = vmatpush1.bf16.msra.mxu1 %v8851_v49  ;;  %6136 = vmatprep.subr.bf16.mxu0 %v9626_v51  ;;  %v1315_v44 = vld [vmem:[%s10765_s22 + $0x1ae0] sm:$0xff]  ;;  %v8908_v49 = vcombine.high %v544_v45, %v548_v20  ;;  %v716_v32 = vld [vmem:[%s10765_s22 + $0x828] sm:$0xff] }
 0x19f   : > { %6177 = vmatprep.subr.bf16.mxu1 %v8860_v52  ;;  %v9674_v23 = vcombine.high %v1311_v42, %v1315_v44  ;;  %v1319_v51 = vld [vmem:[%s10765_s22 + $0x1b00] sm:$0xff]  ;;  %v9673_v57 = vcombine.low %v1311_v42, %v1315_v44  ;;  %v11142_v42 = vcombine.low %v11064_v8, %v11064_v8  ;;  %v720_v44 = vld [vmem:[%s10765_s22 + $0x848] sm:$0xff] }
 0x1a0   : > { %v1323_v52 = vld [vmem:[%s10765_s22 + $0x1b20] sm:$0xff]  ;;  %v724_v45 = vld [vmem:[%s10765_s22 + $0x868] sm:$0xff] }
 0x1a1   : > { %6137 = vmatpush1.bf16.msra.mxu0 %v9625_v61  ;;  %v9682_v61 = vcombine.high %v1319_v51, %v1323_v52  ;;  %v9681_v3 = vcombine.low %v1319_v51, %v1323_v52  ;;  %v604_v51 = vld [vmem:[%s10765_s22 + $0x4a8] sm:$0xff] }
 0x1a2   : > { %6178 = vmatpush1.bf16.msra.mxu1 %v8859_v62  ;;  %6138 = vmatprep.subr.bf16.mxu0 %v9634_v63  ;;  %v8916_v62 = vcombine.high %v552_v53, %v556_v56  ;;  %v1327_v63 = vld [vmem:[%s10765_s22 + $0x1b40] sm:$0xff]  ;;  %v728_v8 = vld [vmem:[%s10765_s22 + $0x888] sm:$0xff]  ;;  %v9083_v56 = vcombine.low %v720_v44, %v724_v45 }
 0x1a3   : > { %6179 = vmatprep.subr.bf16.mxu1 %v8868_v0  ;;  %v1331_v0 = vld [vmem:[%s10765_s22 + $0x1b60] sm:$0xff]  ;;  %v732_v52 = vld [vmem:[%s10765_s22 + $0x8a8] sm:$0xff] }
 0x1a4   : > { %v9689_v40 = vcombine.low %v1327_v63, %v1331_v0 }
 0x1a5   : > { %6139 = vmatpush1.bf16.msra.mxu0 %v9633_v6  ;;  %v9690_v6 = vcombine.high %v1327_v63, %v1331_v0  ;;  %v736_v63 = vld [vmem:[%s10765_s22 + $0x8c8] sm:$0xff] }
 0x1a6   : > { %6180 = vmatpush1.bf16.msra.mxu1 %v8867_v7  ;;  %6140 = vmatprep.subr.bf16.mxu0 %v9642_v10  ;;  %v8924_v7 = vcombine.high %v560_v1, %v564_v2  ;;  %v1335_v10 = vld [vmem:[%s10765_s22 + $0x1b80] sm:$0xff]  ;;  %v740_v0 = vld [vmem:[%s10765_s22 + $0x8e8] sm:$0xff]  ;;  %v9091_v2 = vcombine.low %v728_v8, %v732_v52 }
 0x1a7   : > { %6181 = vmatprep.subr.bf16.mxu1 %v8876_v11  ;;  %v1339_v11 = vld [vmem:[%s10765_s22 + $0x1ba0] sm:$0xff] }
 0x1a8   : > { %v9697_v25 = vcombine.low %v1335_v10, %v1339_v11 }
 0x1a9   : > { %6141 = vmatpush1.bf16.msra.mxu0 %v9641_v43  ;;  %v9698_v43 = vcombine.high %v1335_v10, %v1339_v11  ;;  %v744_v10 = vld [vmem:[%s10765_s22 + $0x908] sm:$0xff] }
 0x1aa   : > { %6182 = vmatpush1.bf16.msra.mxu1 %v8875_v16  ;;  %6142 = vmatprep.subr.bf16.mxu0 %v9650_v18  ;;  %v8932_v16 = vcombine.high %v568_v12, %v572_v13  ;;  %v1343_v18 = vld [vmem:[%s10765_s22 + $0x1bc0] sm:$0xff]  ;;  %v748_v11 = vld [vmem:[%s10765_s22 + $0x928] sm:$0xff]  ;;  %v9099_v13 = vcombine.low %v736_v63, %v740_v0 }
 0x1ab   : > { %6183 = vmatprep.subr.bf16.mxu1 %v8884_v19  ;;  %v1347_v19 = vld [vmem:[%s10765_s22 + $0x1be0] sm:$0xff] }
 0x1ac   : > { %v9705_v33 = vcombine.low %v1343_v18, %v1347_v19 }
 0x1ad   : > { %6143 = vmatpush1.bf16.msra.mxu0 %v9649_v26  ;;  %v9706_v26 = vcombine.high %v1343_v18, %v1347_v19  ;;  %v752_v18 = vld [vmem:[%s10765_s22 + $0x948] sm:$0xff] }
 0x1ae   : > { %6184 = vmatpush1.bf16.msra.mxu1 %v8883_v27  ;;  %6144 = vmatprep.subr.bf16.mxu0 %v9658_v55  ;;  %v8940_v27 = vcombine.high %v576_v22, %v580_v24  ;;  %v584_v55 = vld [vmem:[%s10765_s22 + $0x408] sm:$0xff]  ;;  %v9107_v24 = vcombine.low %v744_v10, %v748_v11 }
 0x1af   : > { %6185 = vmatprep.subr.bf16.mxu1 %v8892_v29  ;;  %v588_v29 = vld [vmem:[%s10765_s22 + $0x428] sm:$0xff] }
 0x1b0   : > { %v8947_v20 = vcombine.low %v584_v55, %v588_v29  ;;  %v756_v19 = vld [vmem:[%s10765_s22 + $0x968] sm:$0xff] }
 0x1b1   : > { %6145 = vmatpush1.bf16.msra.mxu0 %v9657_v35  ;;  %v8948_v35 = vcombine.high %v584_v55, %v588_v29  ;;  %v760_v55 = vld [vmem:[%s10765_s22 + $0x988] sm:$0xff] }
 0x1b2   : > { %6186 = vmatpush1.bf16.msra.mxu1 %v8891_v36  ;;  %6146 = vmatprep.subr.bf16.mxu0 %v9666_v38  ;;  %v9076_v36 = vcombine.high %v712_v31, %v716_v32  ;;  %v592_v38 = vld [vmem:[%s10765_s22 + $0x448] sm:$0xff] }
 0x1b3   : > { %6187 = vmatprep.subr.bf16.mxu1 %v8900_v39  ;;  %v596_v39 = vld [vmem:[%s10765_s22 + $0x468] sm:$0xff] }
 0x1b4   : > { %v8955_v53 = vcombine.low %v592_v38, %v596_v39  ;;  %v764_v29 = vld [vmem:[%s10765_s22 + $0x9a8] sm:$0xff] }
 0x1b5   : > { %6147 = vmatpush1.bf16.msra.mxu0 %v9665_v46  ;;  %v9075_v46 = vcombine.low %v712_v31, %v716_v32  ;;  %v9115_v32 = vcombine.low %v752_v18, %v756_v19 }
 0x1b6   : > { %6188 = vmatpush1.bf16.msra.mxu1 %v8899_v47  ;;  %6148 = vmatprep.subr.bf16.mxu0 %v9674_v23  ;;  %v8956_v47 = vcombine.high %v592_v38, %v596_v39  ;;  %v9084_v23 = vcombine.high %v720_v44, %v724_v45  ;;  %v644_v38 = vld [vmem:[%s10765_s22 + $0x5e8] sm:$0xff] }
 0x1b7   : > { %6189 = vmatprep.subr.bf16.mxu1 %v8908_v49  ;;  %v600_v49 = vld [vmem:[%s10765_s22 + $0x488] sm:$0xff] }
 0x1b8   : > { %v8963_v1 = vcombine.low %v600_v49, %v604_v51  ;;  %v768_v45 = vld [vmem:[%s10765_s22 + $0x9c8] sm:$0xff] }
 0x1b9   : > { %6149 = vmatpush1.bf16.msra.mxu0 %v9673_v57  ;;  %v8964_v57 = vcombine.high %v600_v49, %v604_v51 }
 0x1ba   : > { %6190 = vmatpush1.bf16.msra.mxu1 %v8907_v58  ;;  %6150 = vmatprep.subr.bf16.mxu0 %v9682_v61  ;;  %v9092_v58 = vcombine.high %v728_v8, %v732_v52  ;;  %v608_v61 = vld [vmem:[%s10765_s22 + $0x4c8] sm:$0xff] }
 0x1bb   : > { %6191 = vmatprep.subr.bf16.mxu1 %v8916_v62  ;;  %v612_v62 = vld [vmem:[%s10765_s22 + $0x4e8] sm:$0xff] }
 0x1bc   : > { %v8971_v12 = vcombine.low %v608_v61, %v612_v62 }
 0x1bd   : > { %6151 = vmatpush1.bf16.msra.mxu0 %v9681_v3  ;;  %v8972_v3 = vcombine.high %v608_v61, %v612_v62  ;;  %v648_v61 = vld [vmem:[%s10765_s22 + $0x608] sm:$0xff] }
 0x1be   : > { %6192 = vmatpush1.bf16.msra.mxu1 %v8915_v4  ;;  %6152 = vmatprep.subr.bf16.mxu0 %v9690_v6  ;;  %v9100_v4 = vcombine.high %v736_v63, %v740_v0  ;;  %v616_v6 = vld [vmem:[%s10765_s22 + $0x508] sm:$0xff] }
 0x1bf   : > { %6193 = vmatprep.subr.bf16.mxu1 %v8924_v7  ;;  %v620_v7 = vld [vmem:[%s10765_s22 + $0x528] sm:$0xff] }
 0x1c0   : > { %v8979_v22 = vcombine.low %v616_v6, %v620_v7  ;;  %v652_v62 = vld [vmem:[%s10765_s22 + $0x628] sm:$0xff] }
 0x1c1   : > { %6153 = vmatpush1.bf16.msra.mxu0 %v9689_v40  ;;  %v8980_v40 = vcombine.high %v616_v6, %v620_v7  ;;  %v776_v63 = vld [vmem:[%s10765_s22 + $0xa08] sm:$0xff] }
 0x1c2   : > { %6194 = vmatpush1.bf16.msra.mxu1 %v8923_v14  ;;  %6154 = vmatprep.subr.bf16.mxu0 %v9698_v43  ;;  %v9108_v14 = vcombine.high %v744_v10, %v748_v11  ;;  %v624_v43 = vld [vmem:[%s10765_s22 + $0x548] sm:$0xff] }
 0x1c3   : > { %6195 = vmatprep.subr.bf16.mxu1 %v8932_v16  ;;  %v628_v16 = vld [vmem:[%s10765_s22 + $0x568] sm:$0xff] }
 0x1c4   : > { %v8987_v31 = vcombine.low %v624_v43, %v628_v16  ;;  %v780_v0 = vld [vmem:[%s10765_s22 + $0xa28] sm:$0xff] }
 0x1c5   : > { %6155 = vmatpush1.bf16.msra.mxu0 %v9697_v25  ;;  %v8988_v25 = vcombine.high %v624_v43, %v628_v16  ;;  %v656_v6 = vld [vmem:[%s10765_s22 + $0x648] sm:$0xff] }
 0x1c6   : > { %6196 = vmatpush1.bf16.msra.mxu1 %v8931_v54  ;;  %6156 = vmatprep.subr.bf16.mxu0 %v9706_v26  ;;  %v9116_v54 = vcombine.high %v752_v18, %v756_v19  ;;  %v632_v26 = vld [vmem:[%s10765_s22 + $0x588] sm:$0xff] }
 0x1c7   : > { %6197 = vmatprep.subr.bf16.mxu1 %v8940_v27  ;;  %v636_v27 = vld [vmem:[%s10765_s22 + $0x5a8] sm:$0xff] }
 0x1c8   : > { %v8995_v49 = vcombine.low %v632_v26, %v636_v27  ;;  %v660_v7 = vld [vmem:[%s10765_s22 + $0x668] sm:$0xff] }
 0x1c9   : > { %6157 = vmatpush1.bf16.msra.mxu0 %v9705_v33  ;;  %v8996_v33 = vcombine.high %v632_v26, %v636_v27  ;;  %v784_v10 = vld [vmem:[%s10765_s22 + $0xa48] sm:$0xff] }
 0x1ca   : > { %6198 = vmatpush1.bf16.msra.mxu1 %v8939_v34  ;;  %6208 = vmatprep.subr.bf16.mxu0 %v8948_v35  ;;  %v9124_v35 = vcombine.high %v760_v55, %v764_v29  ;;  %v788_v11 = vld [vmem:[%s10765_s22 + $0xa68] sm:$0xff] }
 0x1cb   : > { %6249 = vmatprep.subr.bf16.mxu1 %v9076_v36  ;;  %v640_v36 = vld [vmem:[%s10765_s22 + $0x5c8] sm:$0xff] }
 0x1cc   : > { %6159 = vmatmul.mubr.bf16.vlgmr.msra.gmra.mrb[12].mxu0 %v11142_v42  ;;  %v664_v43 = vld [vmem:[%s10765_s22 + $0x688] sm:$0xff] }
 0x1cd   : > { %6200 = vmatmul.mubr.bf16.vlgmr.msra.gmra.mrb[12].mxu1 %v10879_v17  ;;  %6209 = vmatpush1.bf16.msra.mxu0 %v8947_v20  ;;  %v772_v20 = vld [vmem:[%s10765_s22 + $0x9e8] sm:$0xff] }
 0x1ce   : > { %6250 = vmatpush1.bf16.msra.mxu1 %v9075_v46  ;;  %6210 = vmatprep.subr.bf16.mxu0 %v8956_v47  ;;  %v668_v16 = vld [vmem:[%s10765_s22 + $0x6a8] sm:$0xff] }
 0x1cf   : > { %6251 = vmatprep.subr.bf16.mxu1 %v9084_v23  ;;  %6240 = vmatprep.mubr.bf16.mxu0 %v10833_v60  ;;  %v792_v18 = vld [vmem:[%s10765_s22 + $0xa88] sm:$0xff] }
 0x1d0   : > { %6281 = vmatprep.mubr.bf16.mxu1 %v10897_v28  ;;  %v796_v19 = vld [vmem:[%s10765_s22 + $0xaa8] sm:$0xff] }
 0x1d1   : > { %6211 = vmatpush1.bf16.msra.mxu0 %v8955_v53  ;;  %v9123_v53 = vcombine.low %v760_v55, %v764_v29  ;;  %v672_v26 = vld [vmem:[%s10765_s22 + $0x6c8] sm:$0xff] }
 0x1d2   : > { %6252 = vmatpush1.bf16.msra.mxu1 %v9083_v56  ;;  %6212 = vmatprep.subr.bf16.mxu0 %v8964_v57  ;;  %v9004_v56 = vcombine.high %v640_v36, %v644_v38  ;;  %v676_v27 = vld [vmem:[%s10765_s22 + $0x6e8] sm:$0xff] }
 0x1d3   : > { %6253 = vmatprep.subr.bf16.mxu1 %v9092_v58  ;;  %v9132_v58 = vcombine.high %v768_v45, %v772_v20  ;;  %v800_v55 = vld [vmem:[%s10765_s22 + $0xac8] sm:$0xff] }
 0x1d4   : > { %v804_v29 = vld [vmem:[%s10765_s22 + $0xae8] sm:$0xff] }
 0x1d5   : > { %6213 = vmatpush1.bf16.msra.mxu0 %v8963_v1  ;;  %v9003_v1 = vcombine.low %v640_v36, %v644_v38  ;;  %v684_v36 = vld [vmem:[%s10765_s22 + $0x728] sm:$0xff] }
 0x1d6   : > { %6254 = vmatpush1.bf16.msra.mxu1 %v9091_v2  ;;  %6214 = vmatprep.subr.bf16.mxu0 %v8972_v3  ;;  %v9131_v2 = vcombine.low %v768_v45, %v772_v20  ;;  %v9012_v3 = vcombine.high %v648_v61, %v652_v62  ;;  %v808_v38 = vld [vmem:[%s10765_s22 + $0xb08] sm:$0xff]  ;;  %v9163_v45 = vcombine.low %v800_v55, %v804_v29 }
 0x1d7   : > { %6255 = vmatprep.subr.bf16.mxu1 %v9100_v4  ;;  %v9140_v4 = vcombine.high %v776_v63, %v780_v0 }
 0x1d9   : > { %6215 = vmatpush1.bf16.msra.mxu0 %v8971_v12  ;;  %v9011_v12 = vcombine.low %v648_v61, %v652_v62  ;;  %v696_v61 = vld [vmem:[%s10765_s22 + $0x788] sm:$0xff] }
 0x1da   : > { %6256 = vmatpush1.bf16.msra.mxu1 %v9099_v13  ;;  %6216 = vmatprep.subr.bf16.mxu0 %v8980_v40  ;;  %v9139_v13 = vcombine.low %v776_v63, %v780_v0  ;;  %v9020_v40 = vcombine.high %v656_v6, %v660_v7  ;;  %v700_v62 = vld [vmem:[%s10765_s22 + $0x7a8] sm:$0xff] }
 0x1db   : > { %6257 = vmatprep.subr.bf16.mxu1 %v9108_v14  ;;  %v9148_v14 = vcombine.high %v784_v10, %v788_v11  ;;  %v824_v63 = vld [vmem:[%s10765_s22 + $0xb88] sm:$0xff] }
 0x1dc   : > { %v828_v0 = vld [vmem:[%s10765_s22 + $0xba8] sm:$0xff] }
 0x1dd   : > { %6217 = vmatpush1.bf16.msra.mxu0 %v8979_v22  ;;  %v5914_v34 = vpop.f32.mrb[0].mxu0  ;;  %v9019_v22 = vcombine.low %v656_v6, %v660_v7  ;;  %v704_v6 = vld [vmem:[%s10765_s22 + $0x7c8] sm:$0xff] }
 0x1de   : > { %6258 = vmatpush1.bf16.msra.mxu1 %v9107_v24  ;;  %6218 = vmatprep.subr.bf16.mxu0 %v8988_v25  ;;  %v5916_v44 = vpop.f32.mrb[1].mxu0  ;;  %v9147_v24 = vcombine.low %v784_v10, %v788_v11  ;;  %v9028_v25 = vcombine.high %v664_v43, %v668_v16  ;;  %v708_v7 = vld [vmem:[%s10765_s22 + $0x7e8] sm:$0xff] }
 0x1df   : > { %6259 = vmatprep.subr.bf16.mxu1 %v9116_v54  ;;  %v5955_v39 = vpop.f32.mrb[0].mxu1  ;;  %v5918_v23 = vpop.f32.mrb[2].mxu0  ;;  %v9156_v54 = vcombine.high %v792_v18, %v796_v19  ;;  %v832_v10 = vld [vmem:[%s10765_s22 + $0xbc8] sm:$0xff] }
 0x1e0   : > { %v11174_v46 = vadd.f32 %v5955_v39, %v5914_v34  ;;  %v5957_v47 = vpop.f32.mrb[1].mxu1  ;;  %v5919_v52 = vpop.f32.mrb[3].mxu0  ;;  %v9164_v34 = vcombine.high %v800_v55, %v804_v29  ;;  %v812_v39 = vld [vmem:[%s10765_s22 + $0xb28] sm:$0xff] }
 0x1e1   : > { %6219 = vmatpush1.bf16.msra.mxu0 %v8987_v31  ;;  %v11176_v51 = vadd.f32 %v5957_v47, %v5916_v44  ;;  %v5959_v8 = vpop.f32.mrb[2].mxu1  ;;  %v9027_v31 = vcombine.low %v664_v43, %v668_v16  ;;  %v9035_v44 = vcombine.low %v672_v26, %v676_v27  ;;  %v9172_v47 = vcombine.high %v808_v38, %v812_v39  ;;  %v688_v23 = vld [vmem:[%s10765_s22 + $0x748] sm:$0xff] }
 0x1e2   : > { %6260 = vmatpush1.bf16.msra.mxu1 %v9115_v32  ;;  %6220 = vmatprep.subr.bf16.mxu0 %v8996_v33  ;;  %v5960_v57 = vpop.f32.mrb[3].mxu1  ;;  %v9155_v32 = vcombine.low %v792_v18, %v796_v19  ;;  %v9036_v33 = vcombine.high %v672_v26, %v676_v27  ;;  %v816_v8 = vld [vmem:[%s10765_s22 + $0xb48] sm:$0xff] }
 0x1e3   : > { %6261 = vmatprep.subr.bf16.mxu1 %v9124_v35  ;;  %v680_v35 = vld [vmem:[%s10765_s22 + $0x708] sm:$0xff] }
 0x1e4   : > { %v9044_v20 = vcombine.high %v680_v35, %v684_v36  ;;  %v820_v52 = vld [vmem:[%s10765_s22 + $0xb68] sm:$0xff] }
 0x1e5   : > { %6221 = vmatpush1.bf16.msra.mxu0 %v8995_v49  ;;  %v692_v49 = vld [vmem:[%s10765_s22 + $0x768] sm:$0xff] }
 0x1e6   : > { %6262 = vmatpush1.bf16.msra.mxu1 %v9123_v53  ;;  %6222 = vmatprep.subr.bf16.mxu0 %v9004_v56  ;;  %v9043_v53 = vcombine.low %v680_v35, %v684_v36  ;;  %v9171_v56 = vcombine.low %v808_v38, %v812_v39  ;;  %v9052_v57 = vcombine.high %v688_v23, %v692_v49  ;;  %v836_v11 = vld [vmem:[%s10765_s22 + $0xbe8] sm:$0xff] }
 0x1e7   : > { %6263 = vmatprep.subr.bf16.mxu1 %v9132_v58  ;;  %v9180_v58 = vcombine.high %v816_v8, %v820_v52  ;;  %v840_v43 = vld [vmem:[%s10765_s22 + $0xc08] sm:$0xff] }
 0x1e8   : > { %v844_v16 = vld [vmem:[%s10765_s22 + $0xc28] sm:$0xff] }
 0x1e9   : > { %6223 = vmatpush1.bf16.msra.mxu0 %v9003_v1  ;;  %v9051_v1 = vcombine.low %v688_v23, %v692_v49  ;;  %v968_v18 = vld [vmem:[%s10765_s22 + $0x1008] sm:$0xff] }
 0x1ea   : > { %6264 = vmatpush1.bf16.msra.mxu1 %v9131_v2  ;;  %6224 = vmatprep.subr.bf16.mxu0 %v9012_v3  ;;  %v9179_v2 = vcombine.low %v816_v8, %v820_v52  ;;  %v9060_v3 = vcombine.high %v696_v61, %v700_v62  ;;  %v972_v19 = vld [vmem:[%s10765_s22 + $0x1028] sm:$0xff] }
 0x1eb   : > { %6265 = vmatprep.subr.bf16.mxu1 %v9140_v4  ;;  %v9188_v4 = vcombine.high %v824_v63, %v828_v0  ;;  %v848_v26 = vld [vmem:[%s10765_s22 + $0xc48] sm:$0xff] }
 0x1ec   : > { %v852_v27 = vld [vmem:[%s10765_s22 + $0xc68] sm:$0xff] }
 0x1ed   : > { %6225 = vmatpush1.bf16.msra.mxu0 %v9011_v12  ;;  %v9059_v12 = vcombine.low %v696_v61, %v700_v62  ;;  %v976_v55 = vld [vmem:[%s10765_s22 + $0x1048] sm:$0xff] }
 0x1ee   : > { %6266 = vmatpush1.bf16.msra.mxu1 %v9139_v13  ;;  %6226 = vmatprep.subr.bf16.mxu0 %v9020_v40  ;;  %v9187_v13 = vcombine.low %v824_v63, %v828_v0  ;;  %v9068_v40 = vcombine.high %v704_v6, %v708_v7  ;;  %v980_v29 = vld [vmem:[%s10765_s22 + $0x1068] sm:$0xff] }
 0x1ef   : > { %6267 = vmatprep.subr.bf16.mxu1 %v9148_v14  ;;  %v9196_v14 = vcombine.high %v832_v10, %v836_v11  ;;  %v856_v35 = vld [vmem:[%s10765_s22 + $0xc88] sm:$0xff] }
 0x1f0   : > { %v860_v36 = vld [vmem:[%s10765_s22 + $0xca8] sm:$0xff] }
 0x1f1   : > { %6227 = vmatpush1.bf16.msra.mxu0 %v9019_v22  ;;  %v9067_v22 = vcombine.low %v704_v6, %v708_v7  ;;  %v984_v38 = vld [vmem:[%s10765_s22 + $0x1088] sm:$0xff] }
 0x1f2   : > { %6268 = vmatpush1.bf16.msra.mxu1 %v9147_v24  ;;  %6228 = vmatprep.subr.bf16.mxu0 %v9028_v25  ;;  %v9195_v24 = vcombine.low %v832_v10, %v836_v11  ;;  %v9204_v25 = vcombine.high %v840_v43, %v844_v16  ;;  %v988_v39 = vld [vmem:[%s10765_s22 + $0x10a8] sm:$0xff] }
 0x1f3   : > { %6269 = vmatprep.subr.bf16.mxu1 %v9156_v54  ;;  %v9332_v54 = vcombine.high %v968_v18, %v972_v19  ;;  %v864_v23 = vld [vmem:[%s10765_s22 + $0xcc8] sm:$0xff] }
 0x1f4   : > { %v868_v49 = vld [vmem:[%s10765_s22 + $0xce8] sm:$0xff] }
 0x1f5   : > { %6229 = vmatpush1.bf16.msra.mxu0 %v9027_v31  ;;  %v9203_v31 = vcombine.low %v840_v43, %v844_v16  ;;  %v992_v8 = vld [vmem:[%s10765_s22 + $0x10c8] sm:$0xff] }
 0x1f6   : > { %6270 = vmatpush1.bf16.msra.mxu1 %v9155_v32  ;;  %6230 = vmatprep.subr.bf16.mxu0 %v9036_v33  ;;  %v9331_v32 = vcombine.low %v968_v18, %v972_v19  ;;  %v9212_v33 = vcombine.high %v848_v26, %v852_v27  ;;  %v996_v52 = vld [vmem:[%s10765_s22 + $0x10e8] sm:$0xff] }
 0x1f7   : > { %6271 = vmatprep.subr.bf16.mxu1 %v9164_v34  ;;  %v9340_v34 = vcombine.high %v976_v55, %v980_v29  ;;  %v872_v61 = vld [vmem:[%s10765_s22 + $0xd08] sm:$0xff] }
 0x1f8   : > { %v876_v62 = vld [vmem:[%s10765_s22 + $0xd28] sm:$0xff] }
 0x1f9   : > { %6231 = vmatpush1.bf16.msra.mxu0 %v9035_v44  ;;  %v9211_v44 = vcombine.low %v848_v26, %v852_v27  ;;  %v1000_v63 = vld [vmem:[%s10765_s22 + $0x1108] sm:$0xff] }
 0x1fa   : > { %6272 = vmatpush1.bf16.msra.mxu1 %v9163_v45  ;;  %6232 = vmatprep.subr.bf16.mxu0 %v9044_v20  ;;  %v9339_v45 = vcombine.low %v976_v55, %v980_v29  ;;  %v9220_v20 = vcombine.high %v856_v35, %v860_v36  ;;  %v1004_v0 = vld [vmem:[%s10765_s22 + $0x1128] sm:$0xff] }
 0x1fb   : > { %6273 = vmatprep.subr.bf16.mxu1 %v9172_v47  ;;  %v9348_v47 = vcombine.high %v984_v38, %v988_v39  ;;  %v880_v6 = vld [vmem:[%s10765_s22 + $0xd48] sm:$0xff] }
 0x1fc   : > { %v884_v7 = vld [vmem:[%s10765_s22 + $0xd68] sm:$0xff] }
 0x1fd   : > { %6233 = vmatpush1.bf16.msra.mxu0 %v9043_v53  ;;  %v9219_v53 = vcombine.low %v856_v35, %v860_v36  ;;  %v1008_v10 = vld [vmem:[%s10765_s22 + $0x1148] sm:$0xff] }
 0x1fe   : > { %6274 = vmatpush1.bf16.msra.mxu1 %v9171_v56  ;;  %6234 = vmatprep.subr.bf16.mxu0 %v9052_v57  ;;  %v9347_v56 = vcombine.low %v984_v38, %v988_v39  ;;  %v9228_v57 = vcombine.high %v864_v23, %v868_v49  ;;  %v1012_v11 = vld [vmem:[%s10765_s22 + $0x1168] sm:$0xff] }
 0x1ff   : > { %6275 = vmatprep.subr.bf16.mxu1 %v9180_v58  ;;  %v9356_v58 = vcombine.high %v992_v8, %v996_v52  ;;  %v888_v43 = vld [vmem:[%s10765_s22 + $0xd88] sm:$0xff] }
 0x200   : > { %v892_v16 = vld [vmem:[%s10765_s22 + $0xda8] sm:$0xff] }
 0x201   : > { %6235 = vmatpush1.bf16.msra.mxu0 %v9051_v1  ;;  %v9227_v1 = vcombine.low %v864_v23, %v868_v49  ;;  %v1016_v18 = vld [vmem:[%s10765_s22 + $0x1188] sm:$0xff]  ;;  %v9251_v39 = vcombine.low %v888_v43, %v892_v16 }
 0x202   : > { %6276 = vmatpush1.bf16.msra.mxu1 %v9179_v2  ;;  %6236 = vmatprep.subr.bf16.mxu0 %v9060_v3  ;;  %v9355_v2 = vcombine.low %v992_v8, %v996_v52  ;;  %v9236_v3 = vcombine.high %v872_v61, %v876_v62  ;;  %v1020_v19 = vld [vmem:[%s10765_s22 + $0x11a8] sm:$0xff] }
 0x203   : > { %6277 = vmatprep.subr.bf16.mxu1 %v9188_v4  ;;  %v9364_v4 = vcombine.high %v1000_v63, %v1004_v0  ;;  %v9380_v26 = vcombine.high %v1016_v18, %v1020_v19  ;;  %v896_v27 = vld [vmem:[%s10765_s22 + $0xdc8] sm:$0xff] }
 0x204   : > { %v900_v55 = vld [vmem:[%s10765_s22 + $0xde8] sm:$0xff] }
 0x205   : > { %6237 = vmatpush1.bf16.msra.mxu0 %v9059_v12  ;;  %v9235_v12 = vcombine.low %v872_v61, %v876_v62  ;;  %v904_v8 = vld [vmem:[%s10765_s22 + $0xe08] sm:$0xff] }
 0x206   : > { %6278 = vmatpush1.bf16.msra.mxu1 %v9187_v13  ;;  %6238 = vmatprep.subr.bf16.mxu0 %v9068_v40  ;;  %v9363_v13 = vcombine.low %v1000_v63, %v1004_v0  ;;  %v9244_v40 = vcombine.high %v880_v6, %v884_v7  ;;  %v908_v52 = vld [vmem:[%s10765_s22 + $0xe28] sm:$0xff] }
 0x207   : > { %6279 = vmatprep.subr.bf16.mxu1 %v9196_v14  ;;  %v9372_v14 = vcombine.high %v1008_v10, %v1012_v11  ;;  %v9268_v61 = vcombine.high %v904_v8, %v908_v52  ;;  %v912_v63 = vld [vmem:[%s10765_s22 + $0xe48] sm:$0xff] }
 0x208   : > { %v916_v0 = vld [vmem:[%s10765_s22 + $0xe68] sm:$0xff] }
 0x209   : > { %6239 = vmatpush1.bf16.msra.mxu0 %v9067_v22  ;;  %v9243_v22 = vcombine.low %v880_v6, %v884_v7  ;;  %v9276_v6 = vcombine.high %v912_v63, %v916_v0 }
 0x20a   : > { %6280 = vmatpush1.bf16.msra.mxu1 %v9195_v24  ;;  %6290 = vmatprep.subr.bf16.mxu0 %v9204_v25  ;;  %v9371_v24 = vcombine.low %v1008_v10, %v1012_v11  ;;  %v9252_v25 = vcombine.high %v888_v43, %v892_v16  ;;  %v920_v10 = vld [vmem:[%s10765_s22 + $0xe88] sm:$0xff] }
 0x20b   : > { %6331 = vmatprep.subr.bf16.mxu1 %v9332_v54  ;;  %v924_v11 = vld [vmem:[%s10765_s22 + $0xea8] sm:$0xff] }
 0x20c   : > { %6241 = vmatmul.mubr.bf16.vlgmr.msra.gmra.mrb[16].mxu0 %v10888_v21  ;;  %v9284_v43 = vcombine.high %v920_v10, %v924_v11 }
 0x20d   : > { %6282 = vmatmul.mubr.bf16.vlgmr.msra.gmra.mrb[16].mxu1 %v10969_v37  ;;  %6291 = vmatpush1.bf16.msra.mxu0 %v9203_v31 }
 0x20e   : > { %6332 = vmatpush1.bf16.msra.mxu1 %v9331_v32  ;;  %6292 = vmatprep.subr.bf16.mxu0 %v9212_v33  ;;  %v1024_v33 = vld [vmem:[%s10765_s22 + $0x11c8] sm:$0xff] }
 0x20f   : > { %6333 = vmatprep.subr.bf16.mxu1 %v9340_v34  ;;  %6322 = vmatprep.mubr.bf16.mxu0 %v10904_v30  ;;  %v1028_v34 = vld [vmem:[%s10765_s22 + $0x11e8] sm:$0xff] }
 0x210   : > { %6363 = vmatprep.mubr.bf16.mxu1 %v10987_v48  ;;  %v9388_v49 = vcombine.high %v1024_v33, %v1028_v34 }
 0x211   : > { %6293 = vmatpush1.bf16.msra.mxu0 %v9211_v44 }
 0x212   : > { %6334 = vmatpush1.bf16.msra.mxu1 %v9339_v45  ;;  %6294 = vmatprep.subr.bf16.mxu0 %v9220_v20 }
 0x213   : > { %6335 = vmatprep.subr.bf16.mxu1 %v9348_v47  ;;  %v9260_v47 = vcombine.high %v896_v27, %v900_v55 }
 0x215   : > { %6295 = vmatpush1.bf16.msra.mxu0 %v9219_v53  ;;  %v1032_v53 = vld [vmem:[%s10765_s22 + $0x1208] sm:$0xff] }
 0x216   : > { %6336 = vmatpush1.bf16.msra.mxu1 %v9347_v56  ;;  %6296 = vmatprep.subr.bf16.mxu0 %v9228_v57  ;;  %v1036_v56 = vld [vmem:[%s10765_s22 + $0x1228] sm:$0xff]  ;;  %v9259_v57 = vcombine.low %v896_v27, %v900_v55 }
 0x217   : > { %6337 = vmatprep.subr.bf16.mxu1 %v9356_v58  ;;  %v9387_v58 = vcombine.low %v1024_v33, %v1028_v34  ;;  %v9396_v62 = vcombine.high %v1032_v53, %v1036_v56  ;;  %v936_v55 = vld [vmem:[%s10765_s22 + $0xf08] sm:$0xff] }
 0x219   : > { %6297 = vmatpush1.bf16.msra.mxu0 %v9227_v1  ;;  %v1040_v1 = vld [vmem:[%s10765_s22 + $0x1248] sm:$0xff] }
 0x21a   : > { %6338 = vmatpush1.bf16.msra.mxu1 %v9355_v2  ;;  %6298 = vmatprep.subr.bf16.mxu0 %v9236_v3  ;;  %v1044_v2 = vld [vmem:[%s10765_s22 + $0x1268] sm:$0xff]  ;;  %v9267_v3 = vcombine.low %v904_v8, %v908_v52 }
 0x21b   : > { %6339 = vmatprep.subr.bf16.mxu1 %v9364_v4  ;;  %v9395_v4 = vcombine.low %v1032_v53, %v1036_v56  ;;  %v9404_v7 = vcombine.high %v1040_v1, %v1044_v2  ;;  %v952_v8 = vld [vmem:[%s10765_s22 + $0xf88] sm:$0xff] }
 0x21c   : > { %v956_v52 = vld [vmem:[%s10765_s22 + $0xfa8] sm:$0xff] }
 0x21d   : > { %6299 = vmatpush1.bf16.msra.mxu0 %v9235_v12  ;;  %v5996_v54 = vpop.f32.mrb[4].mxu0  ;;  %v1048_v12 = vld [vmem:[%s10765_s22 + $0x1288] sm:$0xff] }
 0x21e   : > { %6340 = vmatpush1.bf16.msra.mxu1 %v9363_v13  ;;  %6300 = vmatprep.subr.bf16.mxu0 %v9244_v40  ;;  %v5997_v29 = vadd.f32 %v5996_v54, %v11174_v46  ;;  %v5998_v32 = vpop.f32.mrb[5].mxu0  ;;  %v9379_v46 = vcombine.low %v1016_v18, %v1020_v19  ;;  %v1052_v13 = vld [vmem:[%s10765_s22 + $0x12a8] sm:$0xff]  ;;  %v9275_v40 = vcombine.low %v912_v63, %v916_v0 }
 0x21f   : > { %6341 = vmatprep.subr.bf16.mxu1 %v9372_v14  ;;  %v6037_v31 = vpop.f32.mrb[4].mxu1  ;;  %v5999_v35 = vadd.f32 %v5998_v32, %v11176_v51  ;;  %v6000_v38 = vpop.f32.mrb[6].mxu0  ;;  %v9403_v14 = vcombine.low %v1040_v1, %v1044_v2  ;;  %v9412_v16 = vcombine.high %v1048_v12, %v1052_v13  ;;  %v928_v18 = vld [vmem:[%s10765_s22 + $0xec8] sm:$0xff]  ;;  %v9411_v54 = vcombine.low %v1048_v12, %v1052_v13 }
 0x220   : > { %v6039_v36 = vpop.f32.mrb[5].mxu1  ;;  %v11248_v44 = vadd.f32 %v6037_v31, %v5997_v29  ;;  %v6001_v20 = vpop.f32.mrb[7].mxu0  ;;  %v932_v19 = vld [vmem:[%s10765_s22 + $0xee8] sm:$0xff] }
 0x221   : > { %6301 = vmatpush1.bf16.msra.mxu0 %v9243_v22  ;;  %v6041_v45 = vpop.f32.mrb[6].mxu1  ;;  %v11250_v23 = vadd.f32 %v6039_v36, %v5999_v35  ;;  %v1056_v22 = vld [vmem:[%s10765_s22 + $0x12c8] sm:$0xff]  ;;  %v9291_v33 = vcombine.low %v928_v18, %v932_v19 }
 0x222   : > { %6342 = vmatpush1.bf16.msra.mxu1 %v9371_v24  ;;  %6302 = vmatprep.subr.bf16.mxu0 %v9252_v25  ;;  %v6042_v51 = vpop.f32.mrb[7].mxu1  ;;  %v1060_v24 = vld [vmem:[%s10765_s22 + $0x12e8] sm:$0xff]  ;;  %v9283_v25 = vcombine.low %v920_v10, %v924_v11 }
 0x223   : > { %6343 = vmatprep.subr.bf16.mxu1 %v9380_v26  ;;  %v9292_v26 = vcombine.high %v928_v18, %v932_v19  ;;  %v9420_v27 = vcombine.high %v1056_v22, %v1060_v24  ;;  %v940_v29 = vld [vmem:[%s10765_s22 + $0xf28] sm:$0xff]  ;;  %v9419_v34 = vcombine.low %v1056_v22, %v1060_v24 }
 0x224   : > { %v1064_v31 = vld [vmem:[%s10765_s22 + $0x1308] sm:$0xff]  ;;  %v9300_v35 = vcombine.high %v936_v55, %v940_v29 }
 0x225   : > { %6303 = vmatpush1.bf16.msra.mxu0 %v9251_v39  ;;  %v1068_v32 = vld [vmem:[%s10765_s22 + $0x1328] sm:$0xff] }
 0x226   : > { %6344 = vmatpush1.bf16.msra.mxu1 %v9379_v46  ;;  %6304 = vmatprep.subr.bf16.mxu0 %v9260_v47  ;;  %v9428_v36 = vcombine.high %v1064_v31, %v1068_v32  ;;  %v944_v38 = vld [vmem:[%s10765_s22 + $0xf48] sm:$0xff]  ;;  %v9299_v46 = vcombine.low %v936_v55, %v940_v29  ;;  %v9427_v47 = vcombine.low %v1064_v31, %v1068_v32 }
 0x227   : > { %6345 = vmatprep.subr.bf16.mxu1 %v9388_v49  ;;  %v948_v39 = vld [vmem:[%s10765_s22 + $0xf68] sm:$0xff] }
 0x228   : > { %v1072_v45 = vld [vmem:[%s10765_s22 + $0x1348] sm:$0xff]  ;;  %v9308_v51 = vcombine.high %v944_v38, %v948_v39 }
 0x229   : > { %6305 = vmatpush1.bf16.msra.mxu0 %v9259_v57  ;;  %v1076_v20 = vld [vmem:[%s10765_s22 + $0x1368] sm:$0xff]  ;;  %v9307_v57 = vcombine.low %v944_v38, %v948_v39 }
 0x22a   : > { %6346 = vmatpush1.bf16.msra.mxu1 %v9387_v58  ;;  %6306 = vmatprep.subr.bf16.mxu0 %v9268_v61  ;;  %v9436_v49 = vcombine.high %v1072_v45, %v1076_v20  ;;  %v1080_v53 = vld [vmem:[%s10765_s22 + $0x1388] sm:$0xff]  ;;  %v9435_v58 = vcombine.low %v1072_v45, %v1076_v20  ;;  %v9316_v61 = vcombine.high %v952_v8, %v956_v52 }
 0x22b   : > { %6347 = vmatprep.subr.bf16.mxu1 %v9396_v62  ;;  %v1084_v56 = vld [vmem:[%s10765_s22 + $0x13a8] sm:$0xff] }
 0x22c   : > { %v9444_v62 = vcombine.high %v1080_v53, %v1084_v56  ;;  %v960_v63 = vld [vmem:[%s10765_s22 + $0xfc8] sm:$0xff] }
 0x22d   : > { %6307 = vmatpush1.bf16.msra.mxu0 %v9267_v3  ;;  %v964_v0 = vld [vmem:[%s10765_s22 + $0xfe8] sm:$0xff]  ;;  %v9315_v3 = vcombine.low %v952_v8, %v956_v52 }
 0x22e   : > { %6348 = vmatpush1.bf16.msra.mxu1 %v9395_v4  ;;  %6308 = vmatprep.subr.bf16.mxu0 %v9276_v6  ;;  %v1088_v1 = vld [vmem:[%s10765_s22 + $0x13c8] sm:$0xff]  ;;  %v9443_v4 = vcombine.low %v1080_v53, %v1084_v56  ;;  %v9324_v6 = vcombine.high %v960_v63, %v964_v0 }
 0x22f   : > { %6349 = vmatprep.subr.bf16.mxu1 %v9404_v7  ;;  %v1092_v2 = vld [vmem:[%s10765_s22 + $0x13e8] sm:$0xff] }
 0x230   : > { %v9452_v7 = vcombine.high %v1088_v1, %v1092_v2  ;;  %v1096_v10 = vld [vmem:[%s10765_s22 + $0x1408] sm:$0xff] }
 0x231   : > { %6309 = vmatpush1.bf16.msra.mxu0 %v9275_v40  ;;  %v1100_v11 = vld [vmem:[%s10765_s22 + $0x1428] sm:$0xff]  ;;  %v9323_v40 = vcombine.low %v960_v63, %v964_v0 }
 0x232   : > { %6350 = vmatpush1.bf16.msra.mxu1 %v9403_v14  ;;  %6310 = vmatprep.subr.bf16.mxu0 %v9284_v43  ;;  %v1224_v12 = vld [vmem:[%s10765_s22 + $0x1808] sm:$0xff]  ;;  %v9451_v14 = vcombine.low %v1088_v1, %v1092_v2  ;;  %v9460_v43 = vcombine.high %v1096_v10, %v1100_v11 }
 0x233   : > { %6351 = vmatprep.subr.bf16.mxu1 %v9412_v16  ;;  %v1228_v13 = vld [vmem:[%s10765_s22 + $0x1828] sm:$0xff] }
 0x234   : > { %v9588_v16 = vcombine.high %v1224_v12, %v1228_v13  ;;  %v1104_v18 = vld [vmem:[%s10765_s22 + $0x1448] sm:$0xff] }
 0x235   : > { %6311 = vmatpush1.bf16.msra.mxu0 %v9283_v25  ;;  %v1108_v19 = vld [vmem:[%s10765_s22 + $0x1468] sm:$0xff]  ;;  %v9459_v25 = vcombine.low %v1096_v10, %v1100_v11 }
 0x236   : > { %6352 = vmatpush1.bf16.msra.mxu1 %v9411_v54  ;;  %6312 = vmatprep.subr.bf16.mxu0 %v9292_v26  ;;  %v1232_v22 = vld [vmem:[%s10765_s22 + $0x1848] sm:$0xff]  ;;  %v9587_v54 = vcombine.low %v1224_v12, %v1228_v13  ;;  %v9468_v26 = vcombine.high %v1104_v18, %v1108_v19 }
 0x237   : > { %6353 = vmatprep.subr.bf16.mxu1 %v9420_v27  ;;  %v1236_v24 = vld [vmem:[%s10765_s22 + $0x1868] sm:$0xff] }
 0x238   : > { %v9596_v27 = vcombine.high %v1232_v22, %v1236_v24  ;;  %v1112_v55 = vld [vmem:[%s10765_s22 + $0x1488] sm:$0xff] }
 0x239   : > { %6313 = vmatpush1.bf16.msra.mxu0 %v9291_v33  ;;  %v1116_v29 = vld [vmem:[%s10765_s22 + $0x14a8] sm:$0xff]  ;;  %v9467_v33 = vcombine.low %v1104_v18, %v1108_v19 }
 0x23a   : > { %6354 = vmatpush1.bf16.msra.mxu1 %v9419_v34  ;;  %6314 = vmatprep.subr.bf16.mxu0 %v9300_v35  ;;  %v1240_v31 = vld [vmem:[%s10765_s22 + $0x1888] sm:$0xff]  ;;  %v9595_v34 = vcombine.low %v1232_v22, %v1236_v24  ;;  %v9476_v35 = vcombine.high %v1112_v55, %v1116_v29 }
 0x23b   : > { %6355 = vmatprep.subr.bf16.mxu1 %v9428_v36  ;;  %v1244_v32 = vld [vmem:[%s10765_s22 + $0x18a8] sm:$0xff] }
 0x23c   : > { %v9604_v36 = vcombine.high %v1240_v31, %v1244_v32  ;;  %v1120_v38 = vld [vmem:[%s10765_s22 + $0x14c8] sm:$0xff] }
 0x23d   : > { %6315 = vmatpush1.bf16.msra.mxu0 %v9299_v46  ;;  %v1124_v39 = vld [vmem:[%s10765_s22 + $0x14e8] sm:$0xff]  ;;  %v9475_v46 = vcombine.low %v1112_v55, %v1116_v29 }
 0x23e   : > { %6356 = vmatpush1.bf16.msra.mxu1 %v9427_v47  ;;  %6316 = vmatprep.subr.bf16.mxu0 %v9308_v51  ;;  %v1248_v45 = vld [vmem:[%s10765_s22 + $0x18c8] sm:$0xff]  ;;  %v9603_v47 = vcombine.low %v1240_v31, %v1244_v32  ;;  %v9484_v51 = vcombine.high %v1120_v38, %v1124_v39 }
 0x23f   : > { %6357 = vmatprep.subr.bf16.mxu1 %v9436_v49  ;;  %v1252_v20 = vld [vmem:[%s10765_s22 + $0x18e8] sm:$0xff] }
 0x240   : > { %v9612_v49 = vcombine.high %v1248_v45, %v1252_v20  ;;  %v1128_v8 = vld [vmem:[%s10765_s22 + $0x1508] sm:$0xff] }
 0x241   : > { %6317 = vmatpush1.bf16.msra.mxu0 %v9307_v57  ;;  %v1132_v52 = vld [vmem:[%s10765_s22 + $0x1528] sm:$0xff]  ;;  %v9483_v57 = vcombine.low %v1120_v38, %v1124_v39 }
 0x242   : > { %6358 = vmatpush1.bf16.msra.mxu1 %v9435_v58  ;;  %6318 = vmatprep.subr.bf16.mxu0 %v9316_v61  ;;  %v1256_v53 = vld [vmem:[%s10765_s22 + $0x1908] sm:$0xff]  ;;  %v9611_v58 = vcombine.low %v1248_v45, %v1252_v20  ;;  %v9492_v61 = vcombine.high %v1128_v8, %v1132_v52 }
 0x243   : > { %6359 = vmatprep.subr.bf16.mxu1 %v9444_v62  ;;  %v1260_v56 = vld [vmem:[%s10765_s22 + $0x1928] sm:$0xff] }
 0x244   : > { %v9620_v62 = vcombine.high %v1256_v53, %v1260_v56  ;;  %v1136_v63 = vld [vmem:[%s10765_s22 + $0x1548] sm:$0xff] }
 0x245   : > { %6319 = vmatpush1.bf16.msra.mxu0 %v9315_v3  ;;  %v1140_v0 = vld [vmem:[%s10765_s22 + $0x1568] sm:$0xff]  ;;  %v9491_v3 = vcombine.low %v1128_v8, %v1132_v52 }
 0x246   : > { %6360 = vmatpush1.bf16.msra.mxu1 %v9443_v4  ;;  %6320 = vmatprep.subr.bf16.mxu0 %v9324_v6  ;;  %v1264_v1 = vld [vmem:[%s10765_s22 + $0x1948] sm:$0xff]  ;;  %v9619_v4 = vcombine.low %v1256_v53, %v1260_v56  ;;  %v9500_v6 = vcombine.high %v1136_v63, %v1140_v0 }
 0x247   : > { %6361 = vmatprep.subr.bf16.mxu1 %v9452_v7  ;;  %v1268_v2 = vld [vmem:[%s10765_s22 + $0x1968] sm:$0xff] }
 0x248   : > { %v9628_v7 = vcombine.high %v1264_v1, %v1268_v2  ;;  %v1144_v10 = vld [vmem:[%s10765_s22 + $0x1588] sm:$0xff] }
 0x249   : > { %6321 = vmatpush1.bf16.msra.mxu0 %v9323_v40  ;;  %v1148_v11 = vld [vmem:[%s10765_s22 + $0x15a8] sm:$0xff]  ;;  %v9499_v40 = vcombine.low %v1136_v63, %v1140_v0 }
 0x24a   : > { %6362 = vmatpush1.bf16.msra.mxu1 %v9451_v14  ;;  %6372 = vmatprep.subr.bf16.mxu0 %v9460_v43  ;;  %v1272_v12 = vld [vmem:[%s10765_s22 + $0x1988] sm:$0xff]  ;;  %v9627_v14 = vcombine.low %v1264_v1, %v1268_v2  ;;  %v9508_v43 = vcombine.high %v1144_v10, %v1148_v11  ;;  %v9507_v32 = vcombine.low %v1144_v10, %v1148_v11 }
 0x24b   : > { %6413 = vmatprep.subr.bf16.mxu1 %v9588_v16  ;;  %v1276_v13 = vld [vmem:[%s10765_s22 + $0x19a8] sm:$0xff] }
 0x24c   : > { %6323 = vmatmul.mubr.bf16.vlgmr.msra.gmra.mrb[20].mxu0 %v10978_v41  ;;  %v9636_v18 = vcombine.high %v1272_v12, %v1276_v13  ;;  %v1152_v19 = vld [vmem:[%s10765_s22 + $0x15c8] sm:$0xff] }
 0x24d   : > { %6364 = vmatmul.mubr.bf16.vlgmr.msra.gmra.mrb[20].mxu1 %v11059_v5  ;;  %6373 = vmatpush1.bf16.msra.mxu0 %v9459_v25  ;;  %v1156_v22 = vld [vmem:[%s10765_s22 + $0x15e8] sm:$0xff] }
 0x24e   : > { %6414 = vmatpush1.bf16.msra.mxu1 %v9587_v54  ;;  %6374 = vmatprep.subr.bf16.mxu0 %v9468_v26  ;;  %v1280_v26 = vld [vmem:[%s10765_s22 + $0x19c8] sm:$0xff] }
 0x24f   : > { %6415 = vmatprep.subr.bf16.mxu1 %v9596_v27  ;;  %6404 = vmatprep.mubr.bf16.mxu0 %v10994_v50  ;;  %v1284_v27 = vld [vmem:[%s10765_s22 + $0x19e8] sm:$0xff] }
 0x250   : > { %6445 = vmatprep.mubr.bf16.mxu1 %v11074_v15  ;;  %v9644_v39 = vcombine.high %v1280_v26, %v1284_v27  ;;  %v1160_v45 = vld [vmem:[%s10765_s22 + $0x1608] sm:$0xff] }
 0x251   : > { %6375 = vmatpush1.bf16.msra.mxu0 %v9467_v33  ;;  %v1164_v20 = vld [vmem:[%s10765_s22 + $0x1628] sm:$0xff] }
 0x252   : > { %6416 = vmatpush1.bf16.msra.mxu1 %v9595_v34  ;;  %6376 = vmatprep.subr.bf16.mxu0 %v9476_v35  ;;  %v9524_v8 = vcombine.high %v1160_v45, %v1164_v20  ;;  %v1168_v53 = vld [vmem:[%s10765_s22 + $0x1648] sm:$0xff] }
 0x253   : > { %6417 = vmatprep.subr.bf16.mxu1 %v9604_v36  ;;  %v9516_v36 = vcombine.high %v1152_v19, %v1156_v22  ;;  %v1172_v56 = vld [vmem:[%s10765_s22 + $0x1668] sm:$0xff] }
 0x254   : > { %v9532_v63 = vcombine.high %v1168_v53, %v1172_v56  ;;  %v1176_v1 = vld [vmem:[%s10765_s22 + $0x1688] sm:$0xff] }
 0x255   : > { %6377 = vmatpush1.bf16.msra.mxu0 %v9475_v46  ;;  %v1288_v46 = vld [vmem:[%s10765_s22 + $0x1a08] sm:$0xff] }
 0x256   : > { %6418 = vmatpush1.bf16.msra.mxu1 %v9603_v47  ;;  %6378 = vmatprep.subr.bf16.mxu0 %v9484_v51  ;;  %v1292_v47 = vld [vmem:[%s10765_s22 + $0x1a28] sm:$0xff]  ;;  %v9515_v51 = vcombine.low %v1152_v19, %v1156_v22 }
 0x257   : > { %6419 = vmatprep.subr.bf16.mxu1 %v9612_v49  ;;  %v9643_v49 = vcombine.low %v1280_v26, %v1284_v27  ;;  %v9652_v52 = vcombine.high %v1288_v46, %v1292_v47  ;;  %v1180_v2 = vld [vmem:[%s10765_s22 + $0x16a8] sm:$0xff] }
 0x258   : > { %v9540_v10 = vcombine.high %v1176_v1, %v1180_v2  ;;  %v1192_v22 = vld [vmem:[%s10765_s22 + $0x1708] sm:$0xff] }
 0x259   : > { %6379 = vmatpush1.bf16.msra.mxu0 %v9483_v57  ;;  %v1296_v57 = vld [vmem:[%s10765_s22 + $0x1a48] sm:$0xff] }
 0x25a   : > { %6420 = vmatpush1.bf16.msra.mxu1 %v9611_v58  ;;  %6380 = vmatprep.subr.bf16.mxu0 %v9492_v61  ;;  %v1300_v58 = vld [vmem:[%s10765_s22 + $0x1a68] sm:$0xff]  ;;  %v9523_v61 = vcombine.low %v1160_v45, %v1164_v20 }
 0x25b   : > { %6421 = vmatprep.subr.bf16.mxu1 %v9620_v62  ;;  %v9651_v62 = vcombine.low %v1288_v46, %v1292_v47  ;;  %v9660_v0 = vcombine.high %v1296_v57, %v1300_v58  ;;  %v1208_v45 = vld [vmem:[%s10765_s22 + $0x1788] sm:$0xff] }
 0x25c   : > { %v1212_v20 = vld [vmem:[%s10765_s22 + $0x17a8] sm:$0xff] }
 0x25d   : > { %6381 = vmatpush1.bf16.msra.mxu0 %v9491_v3  ;;  %v1304_v3 = vld [vmem:[%s10765_s22 + $0x1a88] sm:$0xff] }
 0x25e   : > { %6422 = vmatpush1.bf16.msra.mxu1 %v9619_v4  ;;  %6382 = vmatprep.subr.bf16.mxu0 %v9500_v6  ;;  %v1308_v4 = vld [vmem:[%s10765_s22 + $0x1aa8] sm:$0xff]  ;;  %v9531_v6 = vcombine.low %v1168_v53, %v1172_v56 }
 0x25f   : > { %v6078_v16 = vpop.f32.mrb[8].mxu0  ;;  %6423 = vmatprep.subr.bf16.mxu1 %v9628_v7  ;;  %v9659_v7 = vcombine.low %v1296_v57, %v1300_v58  ;;  %v9668_v11 = vcombine.high %v1304_v3, %v1308_v4  ;;  %v1336_v46 = vld [vmem:[%s10765_s22 + $0x1b88] sm:$0xff] }
 0x260   : > { %v6079_v24 = vadd.f32 %v6078_v16, %v11248_v44  ;;  %v6119_v25 = vpop.f32.mrb[8].mxu1  ;;  %v6080_v54 = vpop.f32.mrb[9].mxu0  ;;  %v9635_v44 = vcombine.low %v1272_v12, %v1276_v13  ;;  %v1184_v12 = vld [vmem:[%s10765_s22 + $0x16c8] sm:$0xff]  ;;  %v9667_v16 = vcombine.low %v1304_v3, %v1308_v4  ;;  %v585_v3 = vld [vmem:[%s10765_s22 + $0x410] sm:$0xff] }
 0x261   : > { %v6081_v55 = vadd.f32 %v6080_v54, %v11250_v23  ;;  %v6121_v29 = vpop.f32.mrb[9].mxu1  ;;  %v6082_v31 = vpop.f32.mrb[10].mxu0  ;;  %6383 = vmatpush1.bf16.msra.mxu0 %v9499_v40  ;;  %v1188_v13 = vld [vmem:[%s10765_s22 + $0x16e8] sm:$0xff]  ;;  %v589_v4 = vld [vmem:[%s10765_s22 + $0x430] sm:$0xff] }
 0x262   : > { %v11322_v33 = vadd.f32 %v6119_v25, %v6079_v24  ;;  %v6123_v34 = vpop.f32.mrb[10].mxu1  ;;  %6424 = vmatpush1.bf16.msra.mxu1 %v9627_v14  ;;  %v6083_v35 = vpop.f32.mrb[11].mxu0  ;;  %6384 = vmatprep.subr.bf16.mxu0 %v9508_v43  ;;  %v1312_v40 = vld [vmem:[%s10765_s22 + $0x1ac8] sm:$0xff]  ;;  %v9539_v43 = vcombine.low %v1176_v1, %v1180_v2  ;;  %v9547_v26 = vcombine.low %v1184_v12, %v1188_v13  ;;  %v457_v1 = vld [vmem:[%s10765_s22 + $0x10] sm:$0xff] }
 0x263   : > { %v11324_v38 = vadd.f32 %v6121_v29, %v6081_v55  ;;  %v6124_v23 = vpop.f32.mrb[11].mxu1  ;;  %6425 = vmatprep.subr.bf16.mxu1 %v9636_v18  ;;  %v1316_v14 = vld [vmem:[%s10765_s22 + $0x1ae8] sm:$0xff]  ;;  %v9548_v18 = vcombine.high %v1184_v12, %v1188_v13  ;;  %v461_v2 = vld [vmem:[%s10765_s22 + $0x30] sm:$0xff] }
 0x264   : > { %v9676_v19 = vcombine.high %v1312_v40, %v1316_v14  ;;  %v1196_v24 = vld [vmem:[%s10765_s22 + $0x1728] sm:$0xff]  ;;  %v9675_v27 = vcombine.low %v1312_v40, %v1316_v14  ;;  %v465_v12 = vld [vmem:[%s10765_s22 + $0x50] sm:$0xff] }
 0x265   : > { %6385 = vmatpush1.bf16.msra.mxu0 %v9507_v32  ;;  %v1320_v25 = vld [vmem:[%s10765_s22 + $0x1b08] sm:$0xff]  ;;  %v9556_v55 = vcombine.high %v1192_v22, %v1196_v24  ;;  %v469_v13 = vld [vmem:[%s10765_s22 + $0x70] sm:$0xff] }
 0x266   : > { %6426 = vmatpush1.bf16.msra.mxu1 %v9635_v44  ;;  %6386 = vmatprep.subr.bf16.mxu0 %v9516_v36  ;;  %v1324_v54 = vld [vmem:[%s10765_s22 + $0x1b28] sm:$0xff]  ;;  %v9555_v44 = vcombine.low %v1192_v22, %v1196_v24  ;;  %v593_v40 = vld [vmem:[%s10765_s22 + $0x450] sm:$0xff] }
 0x267   : > { %6427 = vmatprep.subr.bf16.mxu1 %v9644_v39  ;;  %v9684_v29 = vcombine.high %v1320_v25, %v1324_v54  ;;  %v1200_v31 = vld [vmem:[%s10765_s22 + $0x1748] sm:$0xff]  ;;  %v9683_v36 = vcombine.low %v1320_v25, %v1324_v54  ;;  %v597_v14 = vld [vmem:[%s10765_s22 + $0x470] sm:$0xff] }
 0x268   : > { %v1204_v32 = vld [vmem:[%s10765_s22 + $0x1768] sm:$0xff]  ;;  %v473_v22 = vld [vmem:[%s10765_s22 + $0x90] sm:$0xff] }
 0x269   : > { %6387 = vmatpush1.bf16.msra.mxu0 %v9515_v51  ;;  %v1328_v34 = vld [vmem:[%s10765_s22 + $0x1b48] sm:$0xff]  ;;  %v9564_v23 = vcombine.high %v1200_v31, %v1204_v32  ;;  %v9563_v51 = vcombine.low %v1200_v31, %v1204_v32  ;;  %v477_v24 = vld [vmem:[%s10765_s22 + $0xb0] sm:$0xff] }
 0x26a   : > { %6428 = vmatpush1.bf16.msra.mxu1 %v9643_v49  ;;  %6388 = vmatprep.subr.bf16.mxu0 %v9524_v8  ;;  %v1332_v35 = vld [vmem:[%s10765_s22 + $0x1b68] sm:$0xff]  ;;  %v9572_v8 = vcombine.high %v1208_v45, %v1212_v20  ;;  %v601_v25 = vld [vmem:[%s10765_s22 + $0x490] sm:$0xff] }
 0x26b   : > { %6429 = vmatprep.subr.bf16.mxu1 %v9652_v52  ;;  %v9692_v39 = vcombine.high %v1328_v34, %v1332_v35  ;;  %v1340_v47 = vld [vmem:[%s10765_s22 + $0x1ba8] sm:$0xff]  ;;  %v9691_v49 = vcombine.low %v1328_v34, %v1332_v35  ;;  %v605_v54 = vld [vmem:[%s10765_s22 + $0x4b0] sm:$0xff] }
 0x26c   : > { %v9700_v52 = vcombine.high %v1336_v46, %v1340_v47  ;;  %v1216_v53 = vld [vmem:[%s10765_s22 + $0x17c8] sm:$0xff]  ;;  %v481_v31 = vld [vmem:[%s10765_s22 + $0xd0] sm:$0xff] }
 0x26d   : > { %6389 = vmatpush1.bf16.msra.mxu0 %v9523_v61  ;;  %v1220_v56 = vld [vmem:[%s10765_s22 + $0x17e8] sm:$0xff]  ;;  %v9571_v61 = vcombine.low %v1208_v45, %v1212_v20  ;;  %v485_v32 = vld [vmem:[%s10765_s22 + $0xf0] sm:$0xff] }
 0x26e   : > { %6430 = vmatpush1.bf16.msra.mxu1 %v9651_v62  ;;  %6390 = vmatprep.subr.bf16.mxu0 %v9532_v63  ;;  %v1344_v57 = vld [vmem:[%s10765_s22 + $0x1bc8] sm:$0xff]  ;;  %v9699_v62 = vcombine.low %v1336_v46, %v1340_v47  ;;  %v9580_v63 = vcombine.high %v1216_v53, %v1220_v56  ;;  %v609_v34 = vld [vmem:[%s10765_s22 + $0x4d0] sm:$0xff] }
 0x26f   : > { %6431 = vmatprep.subr.bf16.mxu1 %v9660_v0  ;;  %v1348_v58 = vld [vmem:[%s10765_s22 + $0x1be8] sm:$0xff]  ;;  %v613_v35 = vld [vmem:[%s10765_s22 + $0x4f0] sm:$0xff] }
 0x270   : > { %v9708_v0 = vcombine.high %v1344_v57, %v1348_v58  ;;  %v489_v45 = vld [vmem:[%s10765_s22 + $0x110] sm:$0xff] }
 0x271   : > { %6391 = vmatpush1.bf16.msra.mxu0 %v9531_v6  ;;  %v9579_v6 = vcombine.low %v1216_v53, %v1220_v56  ;;  %v493_v20 = vld [vmem:[%s10765_s22 + $0x130] sm:$0xff] }
 0x272   : > { %6432 = vmatpush1.bf16.msra.mxu1 %v9659_v7  ;;  %6392 = vmatprep.subr.bf16.mxu0 %v9540_v10  ;;  %v9707_v7 = vcombine.low %v1344_v57, %v1348_v58  ;;  %v8822_v10 = vcombine.high %v457_v1, %v461_v2  ;;  %v617_v46 = vld [vmem:[%s10765_s22 + $0x510] sm:$0xff] }
 0x273   : > { %6433 = vmatprep.subr.bf16.mxu1 %v9668_v11  ;;  %v8950_v11 = vcombine.high %v585_v3, %v589_v4  ;;  %v621_v47 = vld [vmem:[%s10765_s22 + $0x530] sm:$0xff] }
 0x274   : > { %v497_v53 = vld [vmem:[%s10765_s22 + $0x150] sm:$0xff] }
 0x275   : > { %6393 = vmatpush1.bf16.msra.mxu0 %v9539_v43  ;;  %v8821_v43 = vcombine.low %v457_v1, %v461_v2  ;;  %v501_v56 = vld [vmem:[%s10765_s22 + $0x170] sm:$0xff] }
 0x276   : > { %6434 = vmatpush1.bf16.msra.mxu1 %v9667_v16  ;;  %6394 = vmatprep.subr.bf16.mxu0 %v9548_v18  ;;  %v8949_v16 = vcombine.low %v585_v3, %v589_v4  ;;  %v8830_v18 = vcombine.high %v465_v12, %v469_v13  ;;  %v625_v57 = vld [vmem:[%s10765_s22 + $0x550] sm:$0xff] }
 0x277   : > { %6435 = vmatprep.subr.bf16.mxu1 %v9676_v19  ;;  %v8958_v19 = vcombine.high %v593_v40, %v597_v14  ;;  %v629_v58 = vld [vmem:[%s10765_s22 + $0x570] sm:$0xff] }
 0x278   : > { %v505_v1 = vld [vmem:[%s10765_s22 + $0x190] sm:$0xff] }
 0x279   : > { %6395 = vmatpush1.bf16.msra.mxu0 %v9547_v26  ;;  %v8829_v26 = vcombine.low %v465_v12, %v469_v13  ;;  %v509_v2 = vld [vmem:[%s10765_s22 + $0x1b0] sm:$0xff] }
 0x27a   : > { %6436 = vmatpush1.bf16.msra.mxu1 %v9675_v27  ;;  %6396 = vmatprep.subr.bf16.mxu0 %v9556_v55  ;;  %v8957_v27 = vcombine.low %v593_v40, %v597_v14  ;;  %v8838_v55 = vcombine.high %v473_v22, %v477_v24  ;;  %v633_v3 = vld [vmem:[%s10765_s22 + $0x590] sm:$0xff] }
 0x27b   : > { %6437 = vmatprep.subr.bf16.mxu1 %v9684_v29  ;;  %v8966_v29 = vcombine.high %v601_v25, %v605_v54  ;;  %v637_v4 = vld [vmem:[%s10765_s22 + $0x5b0] sm:$0xff] }
 0x27c   : > { %v8998_v13 = vcombine.high %v633_v3, %v637_v4  ;;  %v513_v40 = vld [vmem:[%s10765_s22 + $0x1d0] sm:$0xff] }
 0x27d   : > { %6397 = vmatpush1.bf16.msra.mxu0 %v9555_v44  ;;  %v8837_v44 = vcombine.low %v473_v22, %v477_v24  ;;  %v517_v14 = vld [vmem:[%s10765_s22 + $0x1f0] sm:$0xff] }
 0x27e   : > { %6438 = vmatpush1.bf16.msra.mxu1 %v9683_v36  ;;  %6398 = vmatprep.subr.bf16.mxu0 %v9564_v23  ;;  %v8965_v36 = vcombine.low %v601_v25, %v605_v54  ;;  %v8846_v23 = vcombine.high %v481_v31, %v485_v32  ;;  %v641_v22 = vld [vmem:[%s10765_s22 + $0x5d0] sm:$0xff] }
 0x27f   : > { %6439 = vmatprep.subr.bf16.mxu1 %v9692_v39  ;;  %v8974_v39 = vcombine.high %v609_v34, %v613_v35  ;;  %v645_v24 = vld [vmem:[%s10765_s22 + $0x5f0] sm:$0xff] }
 0x281   : > { %6399 = vmatpush1.bf16.msra.mxu0 %v9563_v51  ;;  %v8845_v51 = vcombine.low %v481_v31, %v485_v32  ;;  %v8997_v31 = vcombine.low %v633_v3, %v637_v4  ;;  %v8878_v32 = vcombine.high %v513_v40, %v517_v14 }
 0x282   : > { %6440 = vmatpush1.bf16.msra.mxu1 %v9691_v49  ;;  %6400 = vmatprep.subr.bf16.mxu0 %v9572_v8  ;;  %v8973_v49 = vcombine.low %v609_v34, %v613_v35  ;;  %v8854_v8 = vcombine.high %v489_v45, %v493_v20 }
 0x283   : > { %6441 = vmatprep.subr.bf16.mxu1 %v9700_v52  ;;  %v8982_v52 = vcombine.high %v617_v46, %v621_v47 }
 0x285   : > { %6401 = vmatpush1.bf16.msra.mxu0 %v9571_v61  ;;  %v8853_v61 = vcombine.low %v489_v45, %v493_v20  ;;  %v8877_v45 = vcombine.low %v513_v40, %v517_v14  ;;  %v9005_v20 = vcombine.low %v641_v22, %v645_v24 }
 0x286   : > { %6442 = vmatpush1.bf16.msra.mxu1 %v9699_v62  ;;  %6402 = vmatprep.subr.bf16.mxu0 %v9580_v63  ;;  %v8981_v62 = vcombine.low %v617_v46, %v621_v47  ;;  %v8862_v63 = vcombine.high %v497_v53, %v501_v56 }
 0x287   : > { %6443 = vmatprep.subr.bf16.mxu1 %v9708_v0  ;;  %v8990_v0 = vcombine.high %v625_v57, %v629_v58 }
 0x289   : > { %6403 = vmatpush1.bf16.msra.mxu0 %v9579_v6  ;;  %v8861_v6 = vcombine.low %v497_v53, %v501_v56 }
 0x28a   : > { %6444 = vmatpush1.bf16.msra.mxu1 %v9707_v7  ;;  %6454 = vmatprep.subr.bf16.mxu0 %v8822_v10  ;;  %v8989_v7 = vcombine.low %v625_v57, %v629_v58  ;;  %v8870_v10 = vcombine.high %v505_v1, %v509_v2 }
 0x28b   : > { %6495 = vmatprep.subr.bf16.mxu1 %v8950_v11  ;;  %v440_v11 = vld [vmem:[#allocation2] sm:$0xff] }
 0x28c   : > { %6405 = vmatmul.mubr.bf16.vlgmr.msra.gmra.mrb[24].mxu0 %v11068_v9 }
 0x28d   : > { %6446 = vmatmul.mubr.bf16.vlgmr.msra.gmra.mrb[24].mxu1 %v11142_v42  ;;  %6455 = vmatpush1.bf16.msra.mxu0 %v8821_v43 }
 0x28e   : > { %6496 = vmatpush1.bf16.msra.mxu1 %v8949_v16  ;;  %6456 = vmatprep.subr.bf16.mxu0 %v8830_v18  ;;  %v441_v18 = vld [vmem:[#allocation2 + $0x8] sm:$0xff] }
 0x28f   : > { %6497 = vmatprep.subr.bf16.mxu1 %v8958_v19  ;;  %6486 = vmatprep.mubr.bf16.mxu0 %v10829_v59 }
 0x290   : > { %6527 = vmatprep.mubr.bf16.mxu1 %v10833_v60 }
 0x291   : > { %6457 = vmatpush1.bf16.msra.mxu0 %v8829_v26 }
 0x292   : > { %6498 = vmatpush1.bf16.msra.mxu1 %v8957_v27  ;;  %6458 = vmatprep.subr.bf16.mxu0 %v8838_v55  ;;  %v8869_v27 = vcombine.low %v505_v1, %v509_v2 }
 0x293   : > { %6499 = vmatprep.subr.bf16.mxu1 %v8966_v29 }
 0x295   : > { %6459 = vmatpush1.bf16.msra.mxu0 %v8837_v44  ;;  %v521_v44 = vld [vmem:[%s10765_s22 + $0x210] sm:$0xff] }
 0x296   : > { %6500 = vmatpush1.bf16.msra.mxu1 %v8965_v36  ;;  %6460 = vmatprep.subr.bf16.mxu0 %v8846_v23  ;;  %v525_v36 = vld [vmem:[%s10765_s22 + $0x230] sm:$0xff] }
 0x297   : > { %6501 = vmatprep.subr.bf16.mxu1 %v8974_v39  ;;  %v649_v23 = vld [vmem:[%s10765_s22 + $0x610] sm:$0xff]  ;;  %v8886_v46 = vcombine.high %v521_v44, %v525_v36  ;;  %v8885_v53 = vcombine.low %v521_v44, %v525_v36 }
 0x298   : > { %v653_v39 = vld [vmem:[%s10765_s22 + $0x630] sm:$0xff] }
 0x299   : > { %6461 = vmatpush1.bf16.msra.mxu0 %v8845_v51  ;;  %v9014_v47 = vcombine.high %v649_v23, %v653_v39  ;;  %v529_v51 = vld [vmem:[%s10765_s22 + $0x250] sm:$0xff]  ;;  %v9013_v56 = vcombine.low %v649_v23, %v653_v39 }
 0x29a   : > { %6502 = vmatpush1.bf16.msra.mxu1 %v8973_v49  ;;  %6462 = vmatprep.subr.bf16.mxu0 %v8854_v8  ;;  %v533_v49 = vld [vmem:[%s10765_s22 + $0x270] sm:$0xff] }
 0x29b   : > { %6503 = vmatprep.subr.bf16.mxu1 %v8982_v52  ;;  %v657_v8 = vld [vmem:[%s10765_s22 + $0x650] sm:$0xff]  ;;  %v8894_v57 = vcombine.high %v529_v51, %v533_v49  ;;  %v8893_v1 = vcombine.low %v529_v51, %v533_v49 }
 0x29c   : > { %v661_v52 = vld [vmem:[%s10765_s22 + $0x670] sm:$0xff] }
 0x29d   : > { %6463 = vmatpush1.bf16.msra.mxu0 %v8853_v61  ;;  %v9022_v58 = vcombine.high %v657_v8, %v661_v52  ;;  %v537_v61 = vld [vmem:[%s10765_s22 + $0x290] sm:$0xff]  ;;  %v9021_v2 = vcombine.low %v657_v8, %v661_v52 }
 0x29e   : > { %6504 = vmatpush1.bf16.msra.mxu1 %v8981_v62  ;;  %6464 = vmatprep.subr.bf16.mxu0 %v8862_v63  ;;  %v541_v62 = vld [vmem:[%s10765_s22 + $0x2b0] sm:$0xff] }
 0x29f   : > { %v6160_v12 = vpop.f32.mrb[12].mxu0  ;;  %6505 = vmatprep.subr.bf16.mxu1 %v8990_v0  ;;  %v665_v63 = vld [vmem:[%s10765_s22 + $0x690] sm:$0xff]  ;;  %v8902_v3 = vcombine.high %v537_v61, %v541_v62 }
 0x2a0   : > { %v6161_v43 = vadd.f32 %v6160_v12, %v11322_v33  ;;  %v11393_v16 = vpop.f32.mrb[12].mxu1  ;;  %v6162_v19 = vpop.f32.mrb[13].mxu0  ;;  %v669_v0 = vld [vmem:[%s10765_s22 + $0x6b0] sm:$0xff]  ;;  %v8901_v12 = vcombine.low %v537_v61, %v541_v62 }
 0x2a1   : > { %v6163_v25 = vadd.f32 %v6162_v19, %v11324_v38  ;;  %v11398_v54 = vpop.f32.mrb[13].mxu1  ;;  %v6164_v26 = vpop.f32.mrb[14].mxu0  ;;  %6465 = vmatpush1.bf16.msra.mxu0 %v8861_v6  ;;  %v9006_v38 = vcombine.high %v641_v22, %v645_v24  ;;  %v9030_v4 = vcombine.high %v665_v63, %v669_v0  ;;  %v545_v6 = vld [vmem:[%s10765_s22 + $0x2d0] sm:$0xff] }
 0x2a2   : > { %v7028_v55 = vadd.f32 %v6161_v43, %v440_v11  ;;  %v6205_v29 = vpop.f32.mrb[14].mxu1  ;;  %6506 = vmatpush1.bf16.msra.mxu1 %v8989_v7  ;;  %v6165_v33 = vpop.f32.mrb[15].mxu0  ;;  %6466 = vmatprep.subr.bf16.mxu0 %v8870_v10  ;;  %v549_v7 = vld [vmem:[%s10765_s22 + $0x2f0] sm:$0xff] }
 0x2a3   : > { %v7029_v34 = vadd.f32 %v6163_v25, %v441_v18  ;;  %v6206_v35 = vpop.f32.mrb[15].mxu1  ;;  %6507 = vmatprep.subr.bf16.mxu1 %v8998_v13  ;;  %v673_v10 = vld [vmem:[%s10765_s22 + $0x6d0] sm:$0xff]  ;;  %v9029_v13 = vcombine.low %v665_v63, %v669_v0  ;;  %v8910_v40 = vcombine.high %v545_v6, %v549_v7  ;;  %v8909_v24 = vcombine.low %v545_v6, %v549_v7 }
 0x2a4   : > { %7036 = vst [vmem:[#allocation2] sm:$0xff] %v7028_v55  ;;  %v677_v11 = vld [vmem:[%s10765_s22 + $0x6f0] sm:$0xff] }
 0x2a5   : > { %7037 = vst [vmem:[#allocation2 + $0x8] sm:$0xff] %v7029_v34  ;;  %6467 = vmatpush1.bf16.msra.mxu0 %v8869_v27  ;;  %v9038_v14 = vcombine.high %v673_v10, %v677_v11  ;;  %v553_v43 = vld [vmem:[%s10765_s22 + $0x310] sm:$0xff]  ;;  %v9037_v25 = vcombine.low %v673_v10, %v677_v11 }
 0x2a6   : > { %6508 = vmatpush1.bf16.msra.mxu1 %v8997_v31  ;;  %6468 = vmatprep.subr.bf16.mxu0 %v8878_v32  ;;  %v557_v18 = vld [vmem:[%s10765_s22 + $0x330] sm:$0xff] }
 0x2a7   : > { %6509 = vmatprep.subr.bf16.mxu1 %v9006_v38  ;;  %v681_v19 = vld [vmem:[%s10765_s22 + $0x710] sm:$0xff]  ;;  %v8918_v26 = vcombine.high %v553_v43, %v557_v18  ;;  %v8917_v32 = vcombine.low %v553_v43, %v557_v18 }
 0x2a8   : > { %v685_v22 = vld [vmem:[%s10765_s22 + $0x730] sm:$0xff] }
 0x2a9   : > { %6469 = vmatpush1.bf16.msra.mxu0 %v8877_v45  ;;  %v9046_v27 = vcombine.high %v681_v19, %v685_v22  ;;  %v561_v55 = vld [vmem:[%s10765_s22 + $0x350] sm:$0xff]  ;;  %v9045_v34 = vcombine.low %v681_v19, %v685_v22 }
 0x2aa   : > { %6510 = vmatpush1.bf16.msra.mxu1 %v9005_v20  ;;  %6470 = vmatprep.subr.bf16.mxu0 %v8886_v46  ;;  %v565_v29 = vld [vmem:[%s10765_s22 + $0x370] sm:$0xff] }
 0x2ab   : > { %6511 = vmatprep.subr.bf16.mxu1 %v9014_v47  ;;  %v689_v33 = vld [vmem:[%s10765_s22 + $0x750] sm:$0xff]  ;;  %v8926_v35 = vcombine.high %v561_v55, %v565_v29  ;;  %v8925_v45 = vcombine.low %v561_v55, %v565_v29 }
 0x2ac   : > { %v693_v31 = vld [vmem:[%s10765_s22 + $0x770] sm:$0xff] }
 0x2ad   : > { %6471 = vmatpush1.bf16.msra.mxu0 %v8885_v53  ;;  %v9054_v38 = vcombine.high %v689_v33, %v693_v31  ;;  %v569_v44 = vld [vmem:[%s10765_s22 + $0x390] sm:$0xff]  ;;  %v9053_v20 = vcombine.low %v689_v33, %v693_v31 }
 0x2ae   : > { %6512 = vmatpush1.bf16.msra.mxu1 %v9013_v56  ;;  %6472 = vmatprep.subr.bf16.mxu0 %v8894_v57  ;;  %v573_v36 = vld [vmem:[%s10765_s22 + $0x3b0] sm:$0xff] }
 0x2af   : > { %6513 = vmatprep.subr.bf16.mxu1 %v9022_v58  ;;  %v697_v23 = vld [vmem:[%s10765_s22 + $0x790] sm:$0xff]  ;;  %v8934_v46 = vcombine.high %v569_v44, %v573_v36  ;;  %v8933_v53 = vcombine.low %v569_v44, %v573_v36 }
 0x2b0   : > { %v701_v39 = vld [vmem:[%s10765_s22 + $0x7b0] sm:$0xff] }
 0x2b1   : > { %6473 = vmatpush1.bf16.msra.mxu0 %v8893_v1  ;;  %v9062_v47 = vcombine.high %v697_v23, %v701_v39  ;;  %v577_v51 = vld [vmem:[%s10765_s22 + $0x3d0] sm:$0xff]  ;;  %v9061_v56 = vcombine.low %v697_v23, %v701_v39 }
 0x2b2   : > { %6514 = vmatpush1.bf16.msra.mxu1 %v9021_v2  ;;  %6474 = vmatprep.subr.bf16.mxu0 %v8902_v3  ;;  %v581_v49 = vld [vmem:[%s10765_s22 + $0x3f0] sm:$0xff] }
 0x2b3   : > { %6515 = vmatprep.subr.bf16.mxu1 %v9030_v4  ;;  %v705_v8 = vld [vmem:[%s10765_s22 + $0x7d0] sm:$0xff]  ;;  %v8942_v57 = vcombine.high %v577_v51, %v581_v49  ;;  %v8941_v1 = vcombine.low %v577_v51, %v581_v49 }
 0x2b4   : > { %v709_v52 = vld [vmem:[%s10765_s22 + $0x7f0] sm:$0xff] }
 0x2b5   : > { %6475 = vmatpush1.bf16.msra.mxu0 %v8901_v12  ;;  %v9070_v58 = vcombine.high %v705_v8, %v709_v52  ;;  %v713_v61 = vld [vmem:[%s10765_s22 + $0x810] sm:$0xff]  ;;  %v9069_v2 = vcombine.low %v705_v8, %v709_v52 }
 0x2b6   : > { %6516 = vmatpush1.bf16.msra.mxu1 %v9029_v13  ;;  %6476 = vmatprep.subr.bf16.mxu0 %v8910_v40  ;;  %v717_v62 = vld [vmem:[%s10765_s22 + $0x830] sm:$0xff] }
 0x2b7   : > { %6517 = vmatprep.subr.bf16.mxu1 %v9038_v14  ;;  %v841_v63 = vld [vmem:[%s10765_s22 + $0xc10] sm:$0xff]  ;;  %v9078_v3 = vcombine.high %v713_v61, %v717_v62  ;;  %v9077_v12 = vcombine.low %v713_v61, %v717_v62 }
 0x2b8   : > { %v845_v0 = vld [vmem:[%s10765_s22 + $0xc30] sm:$0xff] }
 0x2b9   : > { %6477 = vmatpush1.bf16.msra.mxu0 %v8909_v24  ;;  %v9206_v4 = vcombine.high %v841_v63, %v845_v0  ;;  %v721_v6 = vld [vmem:[%s10765_s22 + $0x850] sm:$0xff]  ;;  %v9205_v13 = vcombine.low %v841_v63, %v845_v0 }
 0x2ba   : > { %6518 = vmatpush1.bf16.msra.mxu1 %v9037_v25  ;;  %6478 = vmatprep.subr.bf16.mxu0 %v8918_v26  ;;  %v725_v7 = vld [vmem:[%s10765_s22 + $0x870] sm:$0xff] }
 0x2bb   : > { %6519 = vmatprep.subr.bf16.mxu1 %v9046_v27  ;;  %v849_v10 = vld [vmem:[%s10765_s22 + $0xc50] sm:$0xff]  ;;  %v9086_v40 = vcombine.high %v721_v6, %v725_v7  ;;  %v9085_v24 = vcombine.low %v721_v6, %v725_v7 }
 0x2bc   : > { %v853_v11 = vld [vmem:[%s10765_s22 + $0xc70] sm:$0xff] }
 0x2bd   : > { %6479 = vmatpush1.bf16.msra.mxu0 %v8917_v32  ;;  %v9214_v14 = vcombine.high %v849_v10, %v853_v11  ;;  %v729_v43 = vld [vmem:[%s10765_s22 + $0x890] sm:$0xff]  ;;  %v9213_v25 = vcombine.low %v849_v10, %v853_v11 }
 0x2be   : > { %6520 = vmatpush1.bf16.msra.mxu1 %v9045_v34  ;;  %6480 = vmatprep.subr.bf16.mxu0 %v8926_v35  ;;  %v733_v18 = vld [vmem:[%s10765_s22 + $0x8b0] sm:$0xff] }
 0x2bf   : > { %6521 = vmatprep.subr.bf16.mxu1 %v9054_v38  ;;  %v857_v19 = vld [vmem:[%s10765_s22 + $0xc90] sm:$0xff]  ;;  %v9094_v26 = vcombine.high %v729_v43, %v733_v18  ;;  %v9093_v32 = vcombine.low %v729_v43, %v733_v18 }
 0x2c0   : > { %v861_v22 = vld [vmem:[%s10765_s22 + $0xcb0] sm:$0xff] }
 0x2c1   : > { %6481 = vmatpush1.bf16.msra.mxu0 %v8925_v45  ;;  %v9222_v27 = vcombine.high %v857_v19, %v861_v22  ;;  %v737_v55 = vld [vmem:[%s10765_s22 + $0x8d0] sm:$0xff]  ;;  %v9221_v34 = vcombine.low %v857_v19, %v861_v22 }
 0x2c2   : > { %6522 = vmatpush1.bf16.msra.mxu1 %v9053_v20  ;;  %6482 = vmatprep.subr.bf16.mxu0 %v8934_v46  ;;  %v741_v29 = vld [vmem:[%s10765_s22 + $0x8f0] sm:$0xff] }
 0x2c3   : > { %6523 = vmatprep.subr.bf16.mxu1 %v9062_v47  ;;  %v865_v33 = vld [vmem:[%s10765_s22 + $0xcd0] sm:$0xff]  ;;  %v9102_v35 = vcombine.high %v737_v55, %v741_v29  ;;  %v9101_v45 = vcombine.low %v737_v55, %v741_v29 }
 0x2c4   : > { %v869_v31 = vld [vmem:[%s10765_s22 + $0xcf0] sm:$0xff] }
 0x2c5   : > { %6483 = vmatpush1.bf16.msra.mxu0 %v8933_v53  ;;  %v9230_v38 = vcombine.high %v865_v33, %v869_v31  ;;  %v745_v44 = vld [vmem:[%s10765_s22 + $0x910] sm:$0xff]  ;;  %v9229_v20 = vcombine.low %v865_v33, %v869_v31 }
 0x2c6   : > { %6524 = vmatpush1.bf16.msra.mxu1 %v9061_v56  ;;  %6484 = vmatprep.subr.bf16.mxu0 %v8942_v57  ;;  %v749_v36 = vld [vmem:[%s10765_s22 + $0x930] sm:$0xff] }
 0x2c7   : > { %6525 = vmatprep.subr.bf16.mxu1 %v9070_v58  ;;  %v873_v23 = vld [vmem:[%s10765_s22 + $0xd10] sm:$0xff]  ;;  %v9110_v46 = vcombine.high %v745_v44, %v749_v36  ;;  %v9109_v53 = vcombine.low %v745_v44, %v749_v36 }
 0x2c8   : > { %v877_v39 = vld [vmem:[%s10765_s22 + $0xd30] sm:$0xff] }
 0x2c9   : > { %6485 = vmatpush1.bf16.msra.mxu0 %v8941_v1  ;;  %v9238_v47 = vcombine.high %v873_v23, %v877_v39  ;;  %v753_v51 = vld [vmem:[%s10765_s22 + $0x950] sm:$0xff]  ;;  %v9237_v56 = vcombine.low %v873_v23, %v877_v39 }
 0x2ca   : > { %6526 = vmatpush1.bf16.msra.mxu1 %v9069_v2  ;;  %6536 = vmatprep.subr.bf16.mxu0 %v9078_v3  ;;  %v757_v49 = vld [vmem:[%s10765_s22 + $0x970] sm:$0xff] }
 0x2cb   : > { %6577 = vmatprep.subr.bf16.mxu1 %v9206_v4  ;;  %v881_v8 = vld [vmem:[%s10765_s22 + $0xd50] sm:$0xff]  ;;  %v9118_v57 = vcombine.high %v753_v51, %v757_v49  ;;  %v9117_v1 = vcombine.low %v753_v51, %v757_v49 }
 0x2cc   : > { %6487 = vmatmul.mubr.bf16.vlgmr.msra.gmra.mrb[28].mxu0 %v10879_v17  ;;  %v885_v52 = vld [vmem:[%s10765_s22 + $0xd70] sm:$0xff] }
 0x2cd   : > { %6528 = vmatmul.mubr.bf16.vlgmr.msra.gmra.mrb[28].mxu1 %v10888_v21  ;;  %6537 = vmatpush1.bf16.msra.mxu0 %v9077_v12  ;;  %v9246_v58 = vcombine.high %v881_v8, %v885_v52  ;;  %v761_v61 = vld [vmem:[%s10765_s22 + $0x990] sm:$0xff]  ;;  %v9245_v2 = vcombine.low %v881_v8, %v885_v52 }
 0x2ce   : > { %6578 = vmatpush1.bf16.msra.mxu1 %v9205_v13  ;;  %6538 = vmatprep.subr.bf16.mxu0 %v9086_v40  ;;  %v765_v62 = vld [vmem:[%s10765_s22 + $0x9b0] sm:$0xff] }
 0x2cf   : > { %6579 = vmatprep.subr.bf16.mxu1 %v9214_v14  ;;  %6568 = vmatprep.mubr.bf16.mxu0 %v10897_v28  ;;  %v889_v63 = vld [vmem:[%s10765_s22 + $0xd90] sm:$0xff]  ;;  %v9126_v3 = vcombine.high %v761_v61, %v765_v62  ;;  %v9125_v22 = vcombine.low %v761_v61, %v765_v62 }
 0x2d0   : > { %6609 = vmatprep.mubr.bf16.mxu1 %v10904_v30  ;;  %v893_v0 = vld [vmem:[%s10765_s22 + $0xdb0] sm:$0xff] }
 0x2d1   : > { %6539 = vmatpush1.bf16.msra.mxu0 %v9085_v24  ;;  %v9254_v6 = vcombine.high %v889_v63, %v893_v0  ;;  %v769_v7 = vld [vmem:[%s10765_s22 + $0x9d0] sm:$0xff] }
 0x2d2   : > { %6580 = vmatpush1.bf16.msra.mxu1 %v9213_v25  ;;  %6540 = vmatprep.subr.bf16.mxu0 %v9094_v26  ;;  %v773_v10 = vld [vmem:[%s10765_s22 + $0x9f0] sm:$0xff] }
 0x2d3   : > { %6581 = vmatprep.subr.bf16.mxu1 %v9222_v27  ;;  %v897_v40 = vld [vmem:[%s10765_s22 + $0xdd0] sm:$0xff]  ;;  %v9134_v27 = vcombine.high %v769_v7, %v773_v10 }
 0x2d4   : > { %v901_v14 = vld [vmem:[%s10765_s22 + $0xdf0] sm:$0xff] }
 0x2d5   : > { %6541 = vmatpush1.bf16.msra.mxu0 %v9093_v32  ;;  %v9262_v29 = vcombine.high %v897_v40, %v901_v14  ;;  %v777_v33 = vld [vmem:[%s10765_s22 + $0xa10] sm:$0xff] }
 0x2d6   : > { %6582 = vmatpush1.bf16.msra.mxu1 %v9221_v34  ;;  %6542 = vmatprep.subr.bf16.mxu0 %v9102_v35  ;;  %v781_v31 = vld [vmem:[%s10765_s22 + $0xa30] sm:$0xff]  ;;  %v9133_v35 = vcombine.low %v769_v7, %v773_v10 }
 0x2d7   : > { %6583 = vmatprep.subr.bf16.mxu1 %v9230_v38  ;;  %v905_v32 = vld [vmem:[%s10765_s22 + $0xe10] sm:$0xff]  ;;  %v9261_v38 = vcombine.low %v897_v40, %v901_v14  ;;  %v9142_v44 = vcombine.high %v777_v33, %v781_v31 }
 0x2d8   : > { %v909_v34 = vld [vmem:[%s10765_s22 + $0xe30] sm:$0xff] }
 0x2d9   : > { %6543 = vmatpush1.bf16.msra.mxu0 %v9101_v45  ;;  %v9270_v36 = vcombine.high %v905_v32, %v909_v34  ;;  %v785_v23 = vld [vmem:[%s10765_s22 + $0xa50] sm:$0xff] }
 0x2da   : > { %6584 = vmatpush1.bf16.msra.mxu1 %v9229_v20  ;;  %6544 = vmatprep.subr.bf16.mxu0 %v9110_v46  ;;  %v789_v39 = vld [vmem:[%s10765_s22 + $0xa70] sm:$0xff]  ;;  %v9141_v46 = vcombine.low %v777_v33, %v781_v31 }
 0x2db   : > { %6585 = vmatprep.subr.bf16.mxu1 %v9238_v47  ;;  %v913_v45 = vld [vmem:[%s10765_s22 + $0xe50] sm:$0xff]  ;;  %v9269_v47 = vcombine.low %v905_v32, %v909_v34  ;;  %v9150_v51 = vcombine.high %v785_v23, %v789_v39 }
 0x2dc   : > { %v917_v20 = vld [vmem:[%s10765_s22 + $0xe70] sm:$0xff] }
 0x2dd   : > { %6545 = vmatpush1.bf16.msra.mxu0 %v9109_v53  ;;  %v9278_v49 = vcombine.high %v913_v45, %v917_v20  ;;  %v793_v8 = vld [vmem:[%s10765_s22 + $0xa90] sm:$0xff] }
 0x2de   : > { %6586 = vmatpush1.bf16.msra.mxu1 %v9237_v56  ;;  %6546 = vmatprep.subr.bf16.mxu0 %v9118_v57  ;;  %v797_v52 = vld [vmem:[%s10765_s22 + $0xab0] sm:$0xff]  ;;  %v9149_v57 = vcombine.low %v785_v23, %v789_v39 }
 0x2df   : > { %v6242_v4 = vpop.f32.mrb[16].mxu0  ;;  %6587 = vmatprep.subr.bf16.mxu1 %v9246_v58  ;;  %v921_v53 = vld [vmem:[%s10765_s22 + $0xe90] sm:$0xff]  ;;  %v9277_v58 = vcombine.low %v913_v45, %v917_v20  ;;  %v9158_v61 = vcombine.high %v793_v8, %v797_v52 }
 0x2e0   : > { %v6243_v11 = vadd.f32 %v6242_v4, %v11393_v16  ;;  %v6283_v12 = vpop.f32.mrb[16].mxu1  ;;  %v6244_v13 = vpop.f32.mrb[17].mxu0  ;;  %v9253_v16 = vcombine.low %v889_v63, %v893_v0  ;;  %v925_v56 = vld [vmem:[%s10765_s22 + $0xeb0] sm:$0xff] }
 0x2e1   : > { %v6245_v43 = vadd.f32 %v6244_v13, %v11398_v54  ;;  %v6285_v18 = vpop.f32.mrb[17].mxu1  ;;  %v6246_v19 = vpop.f32.mrb[18].mxu0  ;;  %6547 = vmatpush1.bf16.msra.mxu0 %v9117_v1  ;;  %v9286_v62 = vcombine.high %v921_v53, %v925_v56  ;;  %v801_v63 = vld [vmem:[%s10765_s22 + $0xad0] sm:$0xff]  ;;  %v9285_v4 = vcombine.low %v921_v53, %v925_v56 }
 0x2e2   : > { %v11470_v24 = vadd.f32 %v6283_v12, %v6243_v11  ;;  %v6287_v25 = vpop.f32.mrb[18].mxu1  ;;  %6588 = vmatpush1.bf16.msra.mxu1 %v9245_v2  ;;  %v6247_v26 = vpop.f32.mrb[19].mxu0  ;;  %6548 = vmatprep.subr.bf16.mxu0 %v9126_v3  ;;  %v805_v0 = vld [vmem:[%s10765_s22 + $0xaf0] sm:$0xff]  ;;  %v9157_v3 = vcombine.low %v793_v8, %v797_v52 }
 0x2e3   : > { %v11472_v55 = vadd.f32 %v6285_v18, %v6245_v43  ;;  %v6288_v54 = vpop.f32.mrb[19].mxu1  ;;  %6589 = vmatprep.subr.bf16.mxu1 %v9254_v6  ;;  %v929_v1 = vld [vmem:[%s10765_s22 + $0xed0] sm:$0xff]  ;;  %v9166_v6 = vcombine.high %v801_v63, %v805_v0  ;;  %v9165_v40 = vcombine.low %v801_v63, %v805_v0 }
 0x2e4   : > { %v933_v2 = vld [vmem:[%s10765_s22 + $0xef0] sm:$0xff] }
 0x2e5   : > { %6549 = vmatpush1.bf16.msra.mxu0 %v9125_v22  ;;  %v9294_v7 = vcombine.high %v929_v1, %v933_v2  ;;  %v809_v10 = vld [vmem:[%s10765_s22 + $0xb10] sm:$0xff]  ;;  %v9293_v14 = vcombine.low %v929_v1, %v933_v2 }
 0x2e6   : > { %6590 = vmatpush1.bf16.msra.mxu1 %v9253_v16  ;;  %6550 = vmatprep.subr.bf16.mxu0 %v9134_v27  ;;  %v813_v11 = vld [vmem:[%s10765_s22 + $0xb30] sm:$0xff] }
 0x2e7   : > { %6591 = vmatprep.subr.bf16.mxu1 %v9262_v29  ;;  %v937_v12 = vld [vmem:[%s10765_s22 + $0xf10] sm:$0xff]  ;;  %v9174_v43 = vcombine.high %v809_v10, %v813_v11  ;;  %v9173_v16 = vcombine.low %v809_v10, %v813_v11 }
 0x2e8   : > { %v941_v13 = vld [vmem:[%s10765_s22 + $0xf30] sm:$0xff] }
 0x2e9   : > { %6551 = vmatpush1.bf16.msra.mxu0 %v9133_v35  ;;  %v9302_v18 = vcombine.high %v937_v12, %v941_v13  ;;  %v817_v19 = vld [vmem:[%s10765_s22 + $0xb50] sm:$0xff]  ;;  %v9301_v27 = vcombine.low %v937_v12, %v941_v13 }
 0x2ea   : > { %6592 = vmatpush1.bf16.msra.mxu1 %v9261_v38  ;;  %6552 = vmatprep.subr.bf16.mxu0 %v9142_v44  ;;  %v821_v22 = vld [vmem:[%s10765_s22 + $0xb70] sm:$0xff] }
 0x2eb   : > { %6593 = vmatprep.subr.bf16.mxu1 %v9270_v36  ;;  %v945_v25 = vld [vmem:[%s10765_s22 + $0xf50] sm:$0xff]  ;;  %v9182_v54 = vcombine.high %v817_v19, %v821_v22  ;;  %v9181_v35 = vcombine.low %v817_v19, %v821_v22 }
 0x2ec   : > { %v949_v26 = vld [vmem:[%s10765_s22 + $0xf70] sm:$0xff] }
 0x2ed   : > { %6553 = vmatpush1.bf16.msra.mxu0 %v9141_v46  ;;  %v9310_v29 = vcombine.high %v945_v25, %v949_v26  ;;  %v825_v33 = vld [vmem:[%s10765_s22 + $0xb90] sm:$0xff]  ;;  %v9309_v38 = vcombine.low %v945_v25, %v949_v26 }
 0x2ee   : > { %6594 = vmatpush1.bf16.msra.mxu1 %v9269_v47  ;;  %6554 = vmatprep.subr.bf16.mxu0 %v9150_v51  ;;  %v829_v31 = vld [vmem:[%s10765_s22 + $0xbb0] sm:$0xff] }
 0x2ef   : > { %6595 = vmatprep.subr.bf16.mxu1 %v9278_v49  ;;  %v953_v32 = vld [vmem:[%s10765_s22 + $0xf90] sm:$0xff]  ;;  %v9190_v44 = vcombine.high %v825_v33, %v829_v31  ;;  %v9189_v46 = vcombine.low %v825_v33, %v829_v31 }
 0x2f0   : > { %v957_v34 = vld [vmem:[%s10765_s22 + $0xfb0] sm:$0xff] }
 0x2f1   : > { %6555 = vmatpush1.bf16.msra.mxu0 %v9149_v57  ;;  %v9318_v36 = vcombine.high %v953_v32, %v957_v34  ;;  %v833_v23 = vld [vmem:[%s10765_s22 + $0xbd0] sm:$0xff]  ;;  %v9317_v47 = vcombine.low %v953_v32, %v957_v34 }
 0x2f2   : > { %6596 = vmatpush1.bf16.msra.mxu1 %v9277_v58  ;;  %6556 = vmatprep.subr.bf16.mxu0 %v9158_v61  ;;  %v837_v39 = vld [vmem:[%s10765_s22 + $0xbf0] sm:$0xff] }
 0x2f3   : > { %6597 = vmatprep.subr.bf16.mxu1 %v9286_v62  ;;  %v961_v45 = vld [vmem:[%s10765_s22 + $0xfd0] sm:$0xff]  ;;  %v9198_v51 = vcombine.high %v833_v23, %v837_v39  ;;  %v9197_v57 = vcombine.low %v833_v23, %v837_v39 }
 0x2f4   : > { %v965_v20 = vld [vmem:[%s10765_s22 + $0xff0] sm:$0xff] }
 0x2f5   : > { %6557 = vmatpush1.bf16.msra.mxu0 %v9157_v3  ;;  %v9326_v49 = vcombine.high %v961_v45, %v965_v20  ;;  %v969_v8 = vld [vmem:[%s10765_s22 + $0x1010] sm:$0xff]  ;;  %v9325_v58 = vcombine.low %v961_v45, %v965_v20 }
 0x2f6   : > { %6598 = vmatpush1.bf16.msra.mxu1 %v9285_v4  ;;  %6558 = vmatprep.subr.bf16.mxu0 %v9166_v6  ;;  %v973_v52 = vld [vmem:[%s10765_s22 + $0x1030] sm:$0xff] }
 0x2f7   : > { %6599 = vmatprep.subr.bf16.mxu1 %v9294_v7  ;;  %v1097_v53 = vld [vmem:[%s10765_s22 + $0x1410] sm:$0xff]  ;;  %v9334_v61 = vcombine.high %v969_v8, %v973_v52  ;;  %v9333_v3 = vcombine.low %v969_v8, %v973_v52 }
 0x2f8   : > { %v1101_v56 = vld [vmem:[%s10765_s22 + $0x1430] sm:$0xff] }
 0x2f9   : > { %6559 = vmatpush1.bf16.msra.mxu0 %v9165_v40  ;;  %v9462_v62 = vcombine.high %v1097_v53, %v1101_v56  ;;  %v977_v63 = vld [vmem:[%s10765_s22 + $0x1050] sm:$0xff]  ;;  %v9461_v4 = vcombine.low %v1097_v53, %v1101_v56 }
 0x2fa   : > { %6600 = vmatpush1.bf16.msra.mxu1 %v9293_v14  ;;  %6560 = vmatprep.subr.bf16.mxu0 %v9174_v43  ;;  %v981_v0 = vld [vmem:[%s10765_s22 + $0x1070] sm:$0xff] }
 0x2fb   : > { %6601 = vmatprep.subr.bf16.mxu1 %v9302_v18  ;;  %v1105_v1 = vld [vmem:[%s10765_s22 + $0x1450] sm:$0xff]  ;;  %v9342_v6 = vcombine.high %v977_v63, %v981_v0  ;;  %v9341_v40 = vcombine.low %v977_v63, %v981_v0 }
 0x2fc   : > { %v1109_v2 = vld [vmem:[%s10765_s22 + $0x1470] sm:$0xff] }
 0x2fd   : > { %6561 = vmatpush1.bf16.msra.mxu0 %v9173_v16  ;;  %v9470_v7 = vcombine.high %v1105_v1, %v1109_v2  ;;  %v985_v10 = vld [vmem:[%s10765_s22 + $0x1090] sm:$0xff]  ;;  %v9469_v14 = vcombine.low %v1105_v1, %v1109_v2 }
 0x2fe   : > { %6602 = vmatpush1.bf16.msra.mxu1 %v9301_v27  ;;  %6562 = vmatprep.subr.bf16.mxu0 %v9182_v54  ;;  %v989_v11 = vld [vmem:[%s10765_s22 + $0x10b0] sm:$0xff] }
 0x2ff   : > { %6603 = vmatprep.subr.bf16.mxu1 %v9310_v29  ;;  %v1113_v12 = vld [vmem:[%s10765_s22 + $0x1490] sm:$0xff]  ;;  %v9350_v43 = vcombine.high %v985_v10, %v989_v11  ;;  %v9349_v16 = vcombine.low %v985_v10, %v989_v11 }
 0x300   : > { %v1117_v13 = vld [vmem:[%s10765_s22 + $0x14b0] sm:$0xff] }
 0x301   : > { %6563 = vmatpush1.bf16.msra.mxu0 %v9181_v35  ;;  %v9478_v18 = vcombine.high %v1113_v12, %v1117_v13  ;;  %v993_v19 = vld [vmem:[%s10765_s22 + $0x10d0] sm:$0xff]  ;;  %v9477_v27 = vcombine.low %v1113_v12, %v1117_v13 }
 0x302   : > { %6604 = vmatpush1.bf16.msra.mxu1 %v9309_v38  ;;  %6564 = vmatprep.subr.bf16.mxu0 %v9190_v44  ;;  %v997_v22 = vld [vmem:[%s10765_s22 + $0x10f0] sm:$0xff] }
 0x303   : > { %6605 = vmatprep.subr.bf16.mxu1 %v9318_v36  ;;  %v1121_v25 = vld [vmem:[%s10765_s22 + $0x14d0] sm:$0xff]  ;;  %v9358_v54 = vcombine.high %v993_v19, %v997_v22  ;;  %v9357_v35 = vcombine.low %v993_v19, %v997_v22 }
 0x304   : > { %v1125_v26 = vld [vmem:[%s10765_s22 + $0x14f0] sm:$0xff] }
 0x305   : > { %6565 = vmatpush1.bf16.msra.mxu0 %v9189_v46  ;;  %v9486_v29 = vcombine.high %v1121_v25, %v1125_v26  ;;  %v1001_v33 = vld [vmem:[%s10765_s22 + $0x1110] sm:$0xff]  ;;  %v9485_v38 = vcombine.low %v1121_v25, %v1125_v26 }
 0x306   : > { %6606 = vmatpush1.bf16.msra.mxu1 %v9317_v47  ;;  %6566 = vmatprep.subr.bf16.mxu0 %v9198_v51  ;;  %v1005_v31 = vld [vmem:[%s10765_s22 + $0x1130] sm:$0xff] }
 0x307   : > { %6607 = vmatprep.subr.bf16.mxu1 %v9326_v49  ;;  %v1129_v32 = vld [vmem:[%s10765_s22 + $0x1510] sm:$0xff]  ;;  %v9366_v44 = vcombine.high %v1001_v33, %v1005_v31  ;;  %v9365_v46 = vcombine.low %v1001_v33, %v1005_v31 }
 0x308   : > { %v1133_v34 = vld [vmem:[%s10765_s22 + $0x1530] sm:$0xff] }
 0x309   : > { %6567 = vmatpush1.bf16.msra.mxu0 %v9197_v57  ;;  %v9494_v36 = vcombine.high %v1129_v32, %v1133_v34  ;;  %v1009_v23 = vld [vmem:[%s10765_s22 + $0x1150] sm:$0xff]  ;;  %v9493_v47 = vcombine.low %v1129_v32, %v1133_v34 }
 0x30a   : > { %6608 = vmatpush1.bf16.msra.mxu1 %v9325_v58  ;;  %6618 = vmatprep.subr.bf16.mxu0 %v9334_v61  ;;  %v1013_v39 = vld [vmem:[%s10765_s22 + $0x1170] sm:$0xff] }
 0x30b   : > { %6659 = vmatprep.subr.bf16.mxu1 %v9462_v62  ;;  %v1137_v45 = vld [vmem:[%s10765_s22 + $0x1550] sm:$0xff]  ;;  %v9374_v51 = vcombine.high %v1009_v23, %v1013_v39  ;;  %v9373_v57 = vcombine.low %v1009_v23, %v1013_v39 }
 0x30c   : > { %6569 = vmatmul.mubr.bf16.vlgmr.msra.gmra.mrb[32].mxu0 %v10969_v37  ;;  %v1141_v20 = vld [vmem:[%s10765_s22 + $0x1570] sm:$0xff] }
 0x30d   : > { %6610 = vmatmul.mubr.bf16.vlgmr.msra.gmra.mrb[32].mxu1 %v10978_v41  ;;  %6619 = vmatpush1.bf16.msra.mxu0 %v9333_v3  ;;  %v9502_v49 = vcombine.high %v1137_v45, %v1141_v20  ;;  %v1017_v8 = vld [vmem:[%s10765_s22 + $0x1190] sm:$0xff]  ;;  %v9501_v58 = vcombine.low %v1137_v45, %v1141_v20 }
 0x30e   : > { %6660 = vmatpush1.bf16.msra.mxu1 %v9461_v4  ;;  %6620 = vmatprep.subr.bf16.mxu0 %v9342_v6  ;;  %v1021_v52 = vld [vmem:[%s10765_s22 + $0x11b0] sm:$0xff] }
 0x30f   : > { %6661 = vmatprep.subr.bf16.mxu1 %v9470_v7  ;;  %6650 = vmatprep.mubr.bf16.mxu0 %v10987_v48  ;;  %v1145_v53 = vld [vmem:[%s10765_s22 + $0x1590] sm:$0xff]  ;;  %v9382_v61 = vcombine.high %v1017_v8, %v1021_v52  ;;  %v9381_v13 = vcombine.low %v1017_v8, %v1021_v52 }
 0x310   : > { %6691 = vmatprep.mubr.bf16.mxu1 %v10994_v50  ;;  %v1149_v56 = vld [vmem:[%s10765_s22 + $0x15b0] sm:$0xff] }
 0x311   : > { %6621 = vmatpush1.bf16.msra.mxu0 %v9341_v40  ;;  %v9510_v63 = vcombine.high %v1145_v53, %v1149_v56  ;;  %v1025_v0 = vld [vmem:[%s10765_s22 + $0x11d0] sm:$0xff] }
 0x312   : > { %6662 = vmatpush1.bf16.msra.mxu1 %v9469_v14  ;;  %6622 = vmatprep.subr.bf16.mxu0 %v9350_v43  ;;  %v1029_v1 = vld [vmem:[%s10765_s22 + $0x11f0] sm:$0xff] }
 0x313   : > { %6663 = vmatprep.subr.bf16.mxu1 %v9478_v18  ;;  %v1153_v6 = vld [vmem:[%s10765_s22 + $0x15d0] sm:$0xff]  ;;  %v9390_v18 = vcombine.high %v1025_v0, %v1029_v1 }
 0x314   : > { %v1157_v7 = vld [vmem:[%s10765_s22 + $0x15f0] sm:$0xff] }
 0x315   : > { %6623 = vmatpush1.bf16.msra.mxu0 %v9349_v16  ;;  %v9518_v22 = vcombine.high %v1153_v6, %v1157_v7  ;;  %v1033_v25 = vld [vmem:[%s10765_s22 + $0x1210] sm:$0xff] }
 0x316   : > { %6664 = vmatpush1.bf16.msra.mxu1 %v9477_v27  ;;  %6624 = vmatprep.subr.bf16.mxu0 %v9358_v54  ;;  %v1037_v26 = vld [vmem:[%s10765_s22 + $0x1230] sm:$0xff]  ;;  %v9389_v54 = vcombine.low %v1025_v0, %v1029_v1 }
 0x317   : > { %6665 = vmatprep.subr.bf16.mxu1 %v9486_v29  ;;  %v1161_v16 = vld [vmem:[%s10765_s22 + $0x1610] sm:$0xff]  ;;  %v9517_v29 = vcombine.low %v1153_v6, %v1157_v7  ;;  %v9398_v33 = vcombine.high %v1033_v25, %v1037_v26 }
 0x318   : > { %v1165_v27 = vld [vmem:[%s10765_s22 + $0x1630] sm:$0xff] }
 0x319   : > { %6625 = vmatpush1.bf16.msra.mxu0 %v9357_v35  ;;  %v9526_v31 = vcombine.high %v1161_v16, %v1165_v27  ;;  %v1041_v32 = vld [vmem:[%s10765_s22 + $0x1250] sm:$0xff] }
 0x31a   : > { %6666 = vmatpush1.bf16.msra.mxu1 %v9485_v38  ;;  %6626 = vmatprep.subr.bf16.mxu0 %v9366_v44  ;;  %v1045_v34 = vld [vmem:[%s10765_s22 + $0x1270] sm:$0xff]  ;;  %v9397_v44 = vcombine.low %v1033_v25, %v1037_v26 }
 0x31b   : > { %6667 = vmatprep.subr.bf16.mxu1 %v9494_v36  ;;  %v1169_v35 = vld [vmem:[%s10765_s22 + $0x1650] sm:$0xff]  ;;  %v9525_v36 = vcombine.low %v1161_v16, %v1165_v27  ;;  %v9406_v23 = vcombine.high %v1041_v32, %v1045_v34 }
 0x31c   : > { %v1173_v38 = vld [vmem:[%s10765_s22 + $0x1670] sm:$0xff] }
 0x31d   : > { %6627 = vmatpush1.bf16.msra.mxu0 %v9365_v46  ;;  %v9534_v39 = vcombine.high %v1169_v35, %v1173_v38  ;;  %v1049_v45 = vld [vmem:[%s10765_s22 + $0x1290] sm:$0xff] }
 0x31e   : > { %6668 = vmatpush1.bf16.msra.mxu1 %v9493_v47  ;;  %6628 = vmatprep.subr.bf16.mxu0 %v9374_v51  ;;  %v1053_v20 = vld [vmem:[%s10765_s22 + $0x12b0] sm:$0xff]  ;;  %v9405_v51 = vcombine.low %v1041_v32, %v1045_v34 }
 0x31f   : > { %v6324_v62 = vpop.f32.mrb[20].mxu0  ;;  %6669 = vmatprep.subr.bf16.mxu1 %v9502_v49  ;;  %v1177_v46 = vld [vmem:[%s10765_s22 + $0x1690] sm:$0xff]  ;;  %v9533_v49 = vcombine.low %v1169_v35, %v1173_v38  ;;  %v9414_v8 = vcombine.high %v1049_v45, %v1053_v20 }
 0x320   : > { %v6325_v2 = vadd.f32 %v6324_v62, %v11470_v24  ;;  %v6365_v3 = vpop.f32.mrb[20].mxu1  ;;  %v6326_v4 = vpop.f32.mrb[21].mxu0  ;;  %v9509_v24 = vcombine.low %v1145_v53, %v1149_v56  ;;  %v1181_v47 = vld [vmem:[%s10765_s22 + $0x16b0] sm:$0xff] }
 0x321   : > { %v6327_v10 = vadd.f32 %v6326_v4, %v11472_v55  ;;  %v6367_v11 = vpop.f32.mrb[21].mxu1  ;;  %v6328_v12 = vpop.f32.mrb[22].mxu0  ;;  %6629 = vmatpush1.bf16.msra.mxu0 %v9373_v57  ;;  %v9542_v52 = vcombine.high %v1177_v46, %v1181_v47  ;;  %v1057_v53 = vld [vmem:[%s10765_s22 + $0x12d0] sm:$0xff]  ;;  %v9541_v62 = vcombine.low %v1177_v46, %v1181_v47  ;;  %v458_v46 = vld [vmem:[%s10765_s22 + $0x18] sm:$0xff] }
 0x322   : > { %v11544_v40 = vadd.f32 %v6365_v3, %v6325_v2  ;;  %v6369_v14 = vpop.f32.mrb[22].mxu1  ;;  %6670 = vmatpush1.bf16.msra.mxu1 %v9501_v58  ;;  %v6329_v43 = vpop.f32.mrb[23].mxu0  ;;  %6630 = vmatprep.subr.bf16.mxu0 %v9382_v61  ;;  %v1061_v56 = vld [vmem:[%s10765_s22 + $0x12f0] sm:$0xff]  ;;  %v9413_v61 = vcombine.low %v1049_v45, %v1053_v20  ;;  %v462_v47 = vld [vmem:[%s10765_s22 + $0x38] sm:$0xff] }
 0x323   : > { %v11546_v19 = vadd.f32 %v6367_v11, %v6327_v10  ;;  %v6370_v55 = vpop.f32.mrb[23].mxu1  ;;  %6671 = vmatprep.subr.bf16.mxu1 %v9510_v63  ;;  %v1185_v57 = vld [vmem:[%s10765_s22 + $0x16d0] sm:$0xff]  ;;  %v9422_v63 = vcombine.high %v1057_v53, %v1061_v56  ;;  %v9421_v6 = vcombine.low %v1057_v53, %v1061_v56 }
 0x324   : > { %v1189_v58 = vld [vmem:[%s10765_s22 + $0x16f0] sm:$0xff] }
 0x325   : > { %6631 = vmatpush1.bf16.msra.mxu0 %v9381_v13  ;;  %v9550_v0 = vcombine.high %v1185_v57, %v1189_v58  ;;  %v1065_v1 = vld [vmem:[%s10765_s22 + $0x1310] sm:$0xff]  ;;  %v9549_v7 = vcombine.low %v1185_v57, %v1189_v58  ;;  %v466_v57 = vld [vmem:[%s10765_s22 + $0x58] sm:$0xff] }
 0x326   : > { %6672 = vmatpush1.bf16.msra.mxu1 %v9509_v24  ;;  %6632 = vmatprep.subr.bf16.mxu0 %v9390_v18  ;;  %v1069_v2 = vld [vmem:[%s10765_s22 + $0x1330] sm:$0xff]  ;;  %v470_v58 = vld [vmem:[%s10765_s22 + $0x78] sm:$0xff] }
 0x327   : > { %6673 = vmatprep.subr.bf16.mxu1 %v9518_v22  ;;  %v1193_v3 = vld [vmem:[%s10765_s22 + $0x1710] sm:$0xff]  ;;  %v9430_v10 = vcombine.high %v1065_v1, %v1069_v2  ;;  %v9429_v24 = vcombine.low %v1065_v1, %v1069_v2 }
 0x328   : > { %v1197_v4 = vld [vmem:[%s10765_s22 + $0x1730] sm:$0xff] }
 0x329   : > { %6633 = vmatpush1.bf16.msra.mxu0 %v9389_v54  ;;  %v9558_v11 = vcombine.high %v1193_v3, %v1197_v4  ;;  %v1073_v12 = vld [vmem:[%s10765_s22 + $0x1350] sm:$0xff]  ;;  %v9557_v18 = vcombine.low %v1193_v3, %v1197_v4  ;;  %v474_v3 = vld [vmem:[%s10765_s22 + $0x98] sm:$0xff] }
 0x32a   : > { %6674 = vmatpush1.bf16.msra.mxu1 %v9517_v29  ;;  %6634 = vmatprep.subr.bf16.mxu0 %v9398_v33  ;;  %v1077_v13 = vld [vmem:[%s10765_s22 + $0x1370] sm:$0xff]  ;;  %v478_v4 = vld [vmem:[%s10765_s22 + $0xb8] sm:$0xff] }
 0x32b   : > { %6675 = vmatprep.subr.bf16.mxu1 %v9526_v31  ;;  %v1201_v14 = vld [vmem:[%s10765_s22 + $0x1750] sm:$0xff]  ;;  %v9438_v55 = vcombine.high %v1073_v12, %v1077_v13  ;;  %v9437_v54 = vcombine.low %v1073_v12, %v1077_v13 }
 0x32c   : > { %v1205_v43 = vld [vmem:[%s10765_s22 + $0x1770] sm:$0xff] }
 0x32d   : > { %6635 = vmatpush1.bf16.msra.mxu0 %v9397_v44  ;;  %v9566_v22 = vcombine.high %v1201_v14, %v1205_v43  ;;  %v1081_v25 = vld [vmem:[%s10765_s22 + $0x1390] sm:$0xff]  ;;  %v9565_v29 = vcombine.low %v1201_v14, %v1205_v43  ;;  %v482_v14 = vld [vmem:[%s10765_s22 + $0xd8] sm:$0xff] }
 0x32e   : > { %6676 = vmatpush1.bf16.msra.mxu1 %v9525_v36  ;;  %6636 = vmatprep.subr.bf16.mxu0 %v9406_v23  ;;  %v1085_v26 = vld [vmem:[%s10765_s22 + $0x13b0] sm:$0xff]  ;;  %v486_v43 = vld [vmem:[%s10765_s22 + $0xf8] sm:$0xff] }
 0x32f   : > { %6677 = vmatprep.subr.bf16.mxu1 %v9534_v39  ;;  %v1209_v16 = vld [vmem:[%s10765_s22 + $0x1790] sm:$0xff]  ;;  %v9446_v33 = vcombine.high %v1081_v25, %v1085_v26  ;;  %v9445_v44 = vcombine.low %v1081_v25, %v1085_v26 }
 0x330   : > { %v1213_v27 = vld [vmem:[%s10765_s22 + $0x17b0] sm:$0xff] }
 0x331   : > { %6637 = vmatpush1.bf16.msra.mxu0 %v9405_v51  ;;  %v9574_v31 = vcombine.high %v1209_v16, %v1213_v27  ;;  %v1089_v32 = vld [vmem:[%s10765_s22 + $0x13d0] sm:$0xff]  ;;  %v9573_v36 = vcombine.low %v1209_v16, %v1213_v27  ;;  %v490_v16 = vld [vmem:[%s10765_s22 + $0x118] sm:$0xff] }
 0x332   : > { %6678 = vmatpush1.bf16.msra.mxu1 %v9533_v49  ;;  %6638 = vmatprep.subr.bf16.mxu0 %v9414_v8  ;;  %v1093_v34 = vld [vmem:[%s10765_s22 + $0x13f0] sm:$0xff]  ;;  %v494_v27 = vld [vmem:[%s10765_s22 + $0x138] sm:$0xff] }
 0x333   : > { %6679 = vmatprep.subr.bf16.mxu1 %v9542_v52  ;;  %v1217_v35 = vld [vmem:[%s10765_s22 + $0x17d0] sm:$0xff]  ;;  %v9454_v23 = vcombine.high %v1089_v32, %v1093_v34  ;;  %v9453_v51 = vcombine.low %v1089_v32, %v1093_v34  ;;  %v8824_v52 = vcombine.high %v458_v46, %v462_v47  ;;  %v498_v34 = vld [vmem:[%s10765_s22 + $0x158] sm:$0xff] }
 0x334   : > { %v1221_v38 = vld [vmem:[%s10765_s22 + $0x17f0] sm:$0xff] }
 0x335   : > { %6639 = vmatpush1.bf16.msra.mxu0 %v9413_v61  ;;  %v9582_v39 = vcombine.high %v1217_v35, %v1221_v38  ;;  %v1225_v45 = vld [vmem:[%s10765_s22 + $0x1810] sm:$0xff]  ;;  %v9581_v49 = vcombine.low %v1217_v35, %v1221_v38  ;;  %v502_v35 = vld [vmem:[%s10765_s22 + $0x178] sm:$0xff] }
 0x336   : > { %6680 = vmatpush1.bf16.msra.mxu1 %v9541_v62  ;;  %6640 = vmatprep.subr.bf16.mxu0 %v9422_v63  ;;  %v1229_v20 = vld [vmem:[%s10765_s22 + $0x1830] sm:$0xff]  ;;  %v8823_v62 = vcombine.low %v458_v46, %v462_v47  ;;  %v510_v46 = vld [vmem:[%s10765_s22 + $0x1b8] sm:$0xff] }
 0x337   : > { %6681 = vmatprep.subr.bf16.mxu1 %v9550_v0  ;;  %v9590_v8 = vcombine.high %v1225_v45, %v1229_v20  ;;  %v1233_v53 = vld [vmem:[%s10765_s22 + $0x1850] sm:$0xff]  ;;  %v9589_v61 = vcombine.low %v1225_v45, %v1229_v20  ;;  %v8832_v0 = vcombine.high %v466_v57, %v470_v58  ;;  %v506_v20 = vld [vmem:[%s10765_s22 + $0x198] sm:$0xff] }
 0x338   : > { %v1237_v56 = vld [vmem:[%s10765_s22 + $0x1870] sm:$0xff] }
 0x339   : > { %6641 = vmatpush1.bf16.msra.mxu0 %v9421_v6  ;;  %v9598_v63 = vcombine.high %v1233_v53, %v1237_v56  ;;  %v1241_v1 = vld [vmem:[%s10765_s22 + $0x1890] sm:$0xff]  ;;  %v9597_v6 = vcombine.low %v1233_v53, %v1237_v56 }
 0x33a   : > { %6682 = vmatpush1.bf16.msra.mxu1 %v9549_v7  ;;  %6642 = vmatprep.subr.bf16.mxu0 %v9430_v10  ;;  %v1245_v2 = vld [vmem:[%s10765_s22 + $0x18b0] sm:$0xff]  ;;  %v8831_v7 = vcombine.low %v466_v57, %v470_v58 }
 0x33b   : > { %6683 = vmatprep.subr.bf16.mxu1 %v9558_v11  ;;  %v9606_v10 = vcombine.high %v1241_v1, %v1245_v2  ;;  %v8840_v11 = vcombine.high %v474_v3, %v478_v4  ;;  %v1249_v12 = vld [vmem:[%s10765_s22 + $0x18d0] sm:$0xff] }
 0x33c   : > { %v1253_v13 = vld [vmem:[%s10765_s22 + $0x18f0] sm:$0xff] }
 0x33d   : > { %6643 = vmatpush1.bf16.msra.mxu0 %v9429_v24  ;;  %v9605_v24 = vcombine.low %v1241_v1, %v1245_v2  ;;  %v1257_v25 = vld [vmem:[%s10765_s22 + $0x1910] sm:$0xff] }
 0x33e   : > { %6684 = vmatpush1.bf16.msra.mxu1 %v9557_v18  ;;  %6644 = vmatprep.subr.bf16.mxu0 %v9438_v55  ;;  %v8839_v18 = vcombine.low %v474_v3, %v478_v4  ;;  %v9614_v55 = vcombine.high %v1249_v12, %v1253_v13  ;;  %v1261_v26 = vld [vmem:[%s10765_s22 + $0x1930] sm:$0xff] }
 0x33f   : > { %6685 = vmatprep.subr.bf16.mxu1 %v9566_v22  ;;  %v8848_v22 = vcombine.high %v482_v14, %v486_v43  ;;  %v1269_v32 = vld [vmem:[%s10765_s22 + $0x1970] sm:$0xff]  ;;  %v9621_v38 = vcombine.low %v1257_v25, %v1261_v26 }
 0x340   : > { %v1277_v45 = vld [vmem:[%s10765_s22 + $0x19b0] sm:$0xff] }
 0x341   : > { %6645 = vmatpush1.bf16.msra.mxu0 %v9437_v54  ;;  %v9613_v54 = vcombine.low %v1249_v12, %v1253_v13  ;;  %v1281_v53 = vld [vmem:[%s10765_s22 + $0x19d0] sm:$0xff] }
 0x342   : > { %6686 = vmatpush1.bf16.msra.mxu1 %v9565_v29  ;;  %6646 = vmatprep.subr.bf16.mxu0 %v9446_v33  ;;  %v9622_v29 = vcombine.high %v1257_v25, %v1261_v26  ;;  %v8856_v33 = vcombine.high %v490_v16, %v494_v27  ;;  %v1285_v56 = vld [vmem:[%s10765_s22 + $0x19f0] sm:$0xff] }
 0x343   : > { %6687 = vmatprep.subr.bf16.mxu1 %v9574_v31  ;;  %v1265_v31 = vld [vmem:[%s10765_s22 + $0x1950] sm:$0xff]  ;;  %v9646_v12 = vcombine.high %v1281_v53, %v1285_v56  ;;  %v9645_v26 = vcombine.low %v1281_v53, %v1285_v56 }
 0x344   : > { %v9629_v47 = vcombine.low %v1265_v31, %v1269_v32 }
 0x345   : > { %6647 = vmatpush1.bf16.msra.mxu0 %v9445_v44  ;;  %v8855_v44 = vcombine.low %v490_v16, %v494_v27 }
 0x346   : > { %6688 = vmatpush1.bf16.msra.mxu1 %v9573_v36  ;;  %6648 = vmatprep.subr.bf16.mxu0 %v9454_v23  ;;  %v9630_v36 = vcombine.high %v1265_v31, %v1269_v32  ;;  %v8864_v23 = vcombine.high %v498_v34, %v502_v35  ;;  %v534_v31 = vld [vmem:[%s10765_s22 + $0x278] sm:$0xff] }
 0x347   : > { %6689 = vmatprep.subr.bf16.mxu1 %v9582_v39  ;;  %v1273_v39 = vld [vmem:[%s10765_s22 + $0x1990] sm:$0xff] }
 0x348   : > { %v9637_v4 = vcombine.low %v1273_v39, %v1277_v45 }
 0x349   : > { %6649 = vmatpush1.bf16.msra.mxu0 %v9453_v51  ;;  %v8863_v51 = vcombine.low %v498_v34, %v502_v35 }
 0x34a   : > { %6690 = vmatpush1.bf16.msra.mxu1 %v9581_v49  ;;  %6700 = vmatprep.subr.bf16.mxu0 %v9590_v8  ;;  %v9638_v49 = vcombine.high %v1273_v39, %v1277_v45  ;;  %v542_v39 = vld [vmem:[%s10765_s22 + $0x2b8] sm:$0xff] }
 0x34b   : > { %6741 = vmatprep.subr.bf16.mxu1 %v8824_v52  ;;  %v8872_v52 = vcombine.high %v506_v20, %v510_v46 }
 0x34c   : > { %6651 = vmatmul.mubr.bf16.vlgmr.msra.gmra.mrb[36].mxu0 %v11059_v5 }
 0x34d   : > { %6692 = vmatmul.mubr.bf16.vlgmr.msra.gmra.mrb[36].mxu1 %v11068_v9  ;;  %6701 = vmatpush1.bf16.msra.mxu0 %v9589_v61 }
 0x34e   : > { %6742 = vmatpush1.bf16.msra.mxu1 %v8823_v62  ;;  %6702 = vmatprep.subr.bf16.mxu0 %v9598_v63  ;;  %v514_v62 = vld [vmem:[%s10765_s22 + $0x1d8] sm:$0xff] }
 0x34f   : > { %6743 = vmatprep.subr.bf16.mxu1 %v8832_v0  ;;  %6732 = vmatprep.mubr.bf16.mxu0 %v11074_v15  ;;  %v518_v63 = vld [vmem:[%s10765_s22 + $0x1f8] sm:$0xff]  ;;  %v442_v0 = vld [vmem:[#allocation2 + $0x10] sm:$0xff] }
 0x350   : > { %6773 = vmatprep.mubr.bf16.mxu1 %v10829_v59  ;;  %v8847_v59 = vcombine.low %v482_v14, %v486_v43  ;;  %v1289_v43 = vld [vmem:[%s10765_s22 + $0x1a10] sm:$0xff]  ;;  %v8879_v16 = vcombine.low %v514_v62, %v518_v63 }
 0x351   : > { %6703 = vmatpush1.bf16.msra.mxu0 %v9597_v6 }
 0x352   : > { %6744 = vmatpush1.bf16.msra.mxu1 %v8831_v7  ;;  %6704 = vmatprep.subr.bf16.mxu0 %v9606_v10  ;;  %v443_v7 = vld [vmem:[#allocation2 + $0x18] sm:$0xff] }
 0x353   : > { %6745 = vmatprep.subr.bf16.mxu1 %v8840_v11  ;;  %v8871_v11 = vcombine.low %v506_v20, %v510_v46 }
 0x355   : > { %6705 = vmatpush1.bf16.msra.mxu0 %v9605_v24  ;;  %v1293_v24 = vld [vmem:[%s10765_s22 + $0x1a30] sm:$0xff] }
 0x356   : > { %6746 = vmatpush1.bf16.msra.mxu1 %v8839_v18  ;;  %6706 = vmatprep.subr.bf16.mxu0 %v9614_v55  ;;  %v522_v55 = vld [vmem:[%s10765_s22 + $0x218] sm:$0xff]  ;;  %v9654_v27 = vcombine.high %v1289_v43, %v1293_v24  ;;  %v9653_v32 = vcombine.low %v1289_v43, %v1293_v24  ;;  %v1341_v43 = vld [vmem:[%s10765_s22 + $0x1bb0] sm:$0xff] }
 0x357   : > { %6747 = vmatprep.subr.bf16.mxu1 %v8848_v22  ;;  %v526_v22 = vld [vmem:[%s10765_s22 + $0x238] sm:$0xff] }
 0x358   : > { %v8887_v34 = vcombine.low %v522_v55, %v526_v22  ;;  %v570_v24 = vld [vmem:[%s10765_s22 + $0x398] sm:$0xff] }
 0x359   : > { %6707 = vmatpush1.bf16.msra.mxu0 %v9613_v54  ;;  %v8888_v54 = vcombine.high %v522_v55, %v526_v22 }
 0x35a   : > { %6748 = vmatpush1.bf16.msra.mxu1 %v8847_v59  ;;  %6708 = vmatprep.subr.bf16.mxu0 %v9622_v29  ;;  %v1297_v59 = vld [vmem:[%s10765_s22 + $0x1a50] sm:$0xff] }
 0x35b   : > { %6749 = vmatprep.subr.bf16.mxu1 %v8856_v33  ;;  %v1301_v29 = vld [vmem:[%s10765_s22 + $0x1a70] sm:$0xff]  ;;  %v530_v33 = vld [vmem:[%s10765_s22 + $0x258] sm:$0xff] }
 0x35c   : > { %v9662_v35 = vcombine.high %v1297_v59, %v1301_v29  ;;  %v9661_v45 = vcombine.low %v1297_v59, %v1301_v29  ;;  %v8895_v20 = vcombine.low %v530_v33, %v534_v31  ;;  %v582_v59 = vld [vmem:[%s10765_s22 + $0x3f8] sm:$0xff] }
 0x35d   : > { %6709 = vmatpush1.bf16.msra.mxu0 %v9621_v38  ;;  %v8896_v38 = vcombine.high %v530_v33, %v534_v31 }
 0x35e   : > { %6750 = vmatpush1.bf16.msra.mxu1 %v8855_v44  ;;  %6710 = vmatprep.subr.bf16.mxu0 %v9630_v36  ;;  %v1305_v44 = vld [vmem:[%s10765_s22 + $0x1a90] sm:$0xff] }
 0x35f   : > { %v6406_v8 = vpop.f32.mrb[24].mxu0  ;;  %6751 = vmatprep.subr.bf16.mxu1 %v8864_v23  ;;  %v1309_v36 = vld [vmem:[%s10765_s22 + $0x1ab0] sm:$0xff]  ;;  %v538_v23 = vld [vmem:[%s10765_s22 + $0x298] sm:$0xff] }
 0x360   : > { %v6407_v57 = vadd.f32 %v6406_v8, %v11544_v40  ;;  %v6447_v58 = vpop.f32.mrb[24].mxu1  ;;  %v6408_v61 = vpop.f32.mrb[25].mxu0  ;;  %v9670_v46 = vcombine.high %v1305_v44, %v1309_v36  ;;  %v546_v8 = vld [vmem:[%s10765_s22 + $0x2d8] sm:$0xff]  ;;  %v9669_v53 = vcombine.low %v1305_v44, %v1309_v36  ;;  %v8903_v56 = vcombine.low %v538_v23, %v542_v39 }
 0x361   : > { %v6409_v1 = vadd.f32 %v6408_v61, %v11546_v19  ;;  %v6449_v2 = vpop.f32.mrb[25].mxu1  ;;  %v6410_v3 = vpop.f32.mrb[26].mxu0  ;;  %6711 = vmatpush1.bf16.msra.mxu0 %v9629_v47  ;;  %v8880_v19 = vcombine.high %v514_v62, %v518_v63  ;;  %v8904_v47 = vcombine.high %v538_v23, %v542_v39  ;;  %v1321_v61 = vld [vmem:[%s10765_s22 + $0x1b10] sm:$0xff]  ;;  %v554_v63 = vld [vmem:[%s10765_s22 + $0x318] sm:$0xff] }
 0x362   : > { %v6448_v6 = vadd.f32 %v6447_v58, %v6407_v57  ;;  %v6451_v10 = vpop.f32.mrb[26].mxu1  ;;  %6752 = vmatpush1.bf16.msra.mxu1 %v8863_v51  ;;  %v6411_v40 = vpop.f32.mrb[27].mxu0  ;;  %6712 = vmatprep.subr.bf16.mxu0 %v9638_v49  ;;  %v1313_v51 = vld [vmem:[%s10765_s22 + $0x1ad0] sm:$0xff]  ;;  %v718_v44 = vld [vmem:[%s10765_s22 + $0x838] sm:$0xff] }
 0x363   : > { %v6450_v13 = vadd.f32 %v6449_v2, %v6409_v1  ;;  %v6452_v14 = vpop.f32.mrb[27].mxu1  ;;  %6753 = vmatprep.subr.bf16.mxu1 %v8872_v52  ;;  %v1317_v49 = vld [vmem:[%s10765_s22 + $0x1af0] sm:$0xff]  ;;  %v550_v52 = vld [vmem:[%s10765_s22 + $0x2f8] sm:$0xff] }
 0x364   : > { %v7030_v18 = vadd.f32 %v6448_v6, %v442_v0  ;;  %v9678_v57 = vcombine.high %v1313_v51, %v1317_v49  ;;  %v8912_v58 = vcombine.high %v546_v8, %v550_v52  ;;  %v1325_v62 = vld [vmem:[%s10765_s22 + $0x1b30] sm:$0xff]  ;;  %v558_v0 = vld [vmem:[%s10765_s22 + $0x338] sm:$0xff]  ;;  %v9677_v1 = vcombine.low %v1313_v51, %v1317_v49 }
 0x365   : > { %v7031_v25 = vadd.f32 %v6450_v13, %v443_v7  ;;  %6713 = vmatpush1.bf16.msra.mxu0 %v9637_v4  ;;  %v8911_v2 = vcombine.low %v546_v8, %v550_v52  ;;  %v9686_v3 = vcombine.high %v1321_v61, %v1325_v62  ;;  %v8920_v4 = vcombine.high %v554_v63, %v558_v0  ;;  %v1329_v6 = vld [vmem:[%s10765_s22 + $0x1b50] sm:$0xff]  ;;  %v562_v10 = vld [vmem:[%s10765_s22 + $0x358] sm:$0xff] }
 0x366   : > { %7038 = vst [vmem:[#allocation2 + $0x10] sm:$0xff] %v7030_v18  ;;  %6754 = vmatpush1.bf16.msra.mxu1 %v8871_v11  ;;  %6714 = vmatprep.subr.bf16.mxu0 %v9646_v12  ;;  %v1333_v7 = vld [vmem:[%s10765_s22 + $0x1b70] sm:$0xff]  ;;  %v566_v40 = vld [vmem:[%s10765_s22 + $0x378] sm:$0xff]  ;;  %v9685_v11 = vcombine.low %v1321_v61, %v1325_v62  ;;  %v8919_v12 = vcombine.low %v554_v63, %v558_v0 }
 0x367   : > { %7039 = vst [vmem:[#allocation2 + $0x18] sm:$0xff] %v7031_v25  ;;  %6755 = vmatprep.subr.bf16.mxu1 %v8880_v19  ;;  %v9694_v13 = vcombine.high %v1329_v6, %v1333_v7  ;;  %v8928_v14 = vcombine.high %v562_v10, %v566_v40  ;;  %v1337_v19 = vld [vmem:[%s10765_s22 + $0x1b90] sm:$0xff]  ;;  %v574_v18 = vld [vmem:[%s10765_s22 + $0x3b8] sm:$0xff]  ;;  %v9693_v55 = vcombine.low %v1329_v6, %v1333_v7 }
 0x368   : > { %v8927_v22 = vcombine.low %v562_v10, %v566_v40  ;;  %v9702_v25 = vcombine.high %v1337_v19, %v1341_v43  ;;  %v9701_v29 = vcombine.low %v1337_v19, %v1341_v43  ;;  %v8935_v33 = vcombine.low %v570_v24, %v574_v18  ;;  %v726_v51 = vld [vmem:[%s10765_s22 + $0x878] sm:$0xff] }
 0x369   : > { %6715 = vmatpush1.bf16.msra.mxu0 %v9645_v26  ;;  %v8936_v26 = vcombine.high %v570_v24, %v574_v18  ;;  %v734_v61 = vld [vmem:[%s10765_s22 + $0x8b8] sm:$0xff] }
 0x36a   : > { %6756 = vmatpush1.bf16.msra.mxu1 %v8879_v16  ;;  %6716 = vmatprep.subr.bf16.mxu0 %v9654_v27  ;;  %v1345_v16 = vld [vmem:[%s10765_s22 + $0x1bd0] sm:$0xff]  ;;  %v742_v6 = vld [vmem:[%s10765_s22 + $0x8f8] sm:$0xff] }
 0x36b   : > { %6757 = vmatprep.subr.bf16.mxu1 %v8888_v54  ;;  %v1349_v27 = vld [vmem:[%s10765_s22 + $0x1bf0] sm:$0xff]  ;;  %v578_v54 = vld [vmem:[%s10765_s22 + $0x3d8] sm:$0xff] }
 0x36c   : > { %v9710_v31 = vcombine.high %v1345_v16, %v1349_v27  ;;  %v9709_v36 = vcombine.low %v1345_v16, %v1349_v27  ;;  %v8943_v23 = vcombine.low %v578_v54, %v582_v59  ;;  %v626_v24 = vld [vmem:[%s10765_s22 + $0x558] sm:$0xff] }
 0x36d   : > { %6717 = vmatpush1.bf16.msra.mxu0 %v9653_v32  ;;  %v8944_v32 = vcombine.high %v578_v54, %v582_v59  ;;  %v630_v18 = vld [vmem:[%s10765_s22 + $0x578] sm:$0xff] }
 0x36e   : > { %6758 = vmatpush1.bf16.msra.mxu1 %v8887_v34  ;;  %6718 = vmatprep.subr.bf16.mxu0 %v9662_v35  ;;  %v586_v34 = vld [vmem:[%s10765_s22 + $0x418] sm:$0xff]  ;;  %v8992_v16 = vcombine.high %v626_v24, %v630_v18 }
 0x36f   : > { %6759 = vmatprep.subr.bf16.mxu1 %v8896_v38  ;;  %v590_v35 = vld [vmem:[%s10765_s22 + $0x438] sm:$0xff] }
 0x370   : > { %v714_v38 = vld [vmem:[%s10765_s22 + $0x818] sm:$0xff]  ;;  %v8952_v39 = vcombine.high %v586_v34, %v590_v35  ;;  %v8951_v49 = vcombine.low %v586_v34, %v590_v35 }
 0x371   : > { %6719 = vmatpush1.bf16.msra.mxu0 %v9661_v45  ;;  %v9080_v45 = vcombine.high %v714_v38, %v718_v44  ;;  %v9079_v8 = vcombine.low %v714_v38, %v718_v44  ;;  %v634_v54 = vld [vmem:[%s10765_s22 + $0x598] sm:$0xff] }
 0x372   : > { %6760 = vmatpush1.bf16.msra.mxu1 %v8895_v20  ;;  %6720 = vmatprep.subr.bf16.mxu0 %v9670_v46  ;;  %v594_v20 = vld [vmem:[%s10765_s22 + $0x458] sm:$0xff] }
 0x373   : > { %6761 = vmatprep.subr.bf16.mxu1 %v8904_v47  ;;  %v598_v46 = vld [vmem:[%s10765_s22 + $0x478] sm:$0xff] }
 0x374   : > { %v722_v47 = vld [vmem:[%s10765_s22 + $0x858] sm:$0xff]  ;;  %v8960_v52 = vcombine.high %v594_v20, %v598_v46  ;;  %v8959_v62 = vcombine.low %v594_v20, %v598_v46 }
 0x375   : > { %6721 = vmatpush1.bf16.msra.mxu0 %v9669_v53  ;;  %v9088_v53 = vcombine.high %v722_v47, %v726_v51  ;;  %v9087_v63 = vcombine.low %v722_v47, %v726_v51  ;;  %v638_v59 = vld [vmem:[%s10765_s22 + $0x5b8] sm:$0xff] }
 0x376   : > { %6762 = vmatpush1.bf16.msra.mxu1 %v8903_v56  ;;  %6722 = vmatprep.subr.bf16.mxu0 %v9678_v57  ;;  %v602_v56 = vld [vmem:[%s10765_s22 + $0x498] sm:$0xff]  ;;  %v9000_v34 = vcombine.high %v634_v54, %v638_v59 }
 0x377   : > { %6763 = vmatprep.subr.bf16.mxu1 %v8912_v58  ;;  %v606_v57 = vld [vmem:[%s10765_s22 + $0x4b8] sm:$0xff] }
 0x378   : > { %v730_v58 = vld [vmem:[%s10765_s22 + $0x898] sm:$0xff]  ;;  %v8968_v0 = vcombine.high %v602_v56, %v606_v57 }
 0x379   : > { %6723 = vmatpush1.bf16.msra.mxu0 %v9677_v1  ;;  %v9096_v1 = vcombine.high %v730_v58, %v734_v61  ;;  %v9095_v7 = vcombine.low %v730_v58, %v734_v61  ;;  %v642_v44 = vld [vmem:[%s10765_s22 + $0x5d8] sm:$0xff] }
 0x37a   : > { %6764 = vmatpush1.bf16.msra.mxu1 %v8911_v2  ;;  %6724 = vmatprep.subr.bf16.mxu0 %v9686_v3  ;;  %v610_v2 = vld [vmem:[%s10765_s22 + $0x4d8] sm:$0xff] }
 0x37b   : > { %6765 = vmatprep.subr.bf16.mxu1 %v8920_v4  ;;  %v614_v3 = vld [vmem:[%s10765_s22 + $0x4f8] sm:$0xff] }
 0x37c   : > { %v738_v4 = vld [vmem:[%s10765_s22 + $0x8d8] sm:$0xff]  ;;  %v8976_v10 = vcombine.high %v610_v2, %v614_v3 }
 0x37d   : > { %6725 = vmatpush1.bf16.msra.mxu0 %v9685_v11  ;;  %v9104_v40 = vcombine.high %v738_v4, %v742_v6  ;;  %v618_v11 = vld [vmem:[%s10765_s22 + $0x518] sm:$0xff] }
 0x37e   : > { %6766 = vmatpush1.bf16.msra.mxu1 %v8919_v12  ;;  %6726 = vmatprep.subr.bf16.mxu0 %v9694_v13  ;;  %v622_v12 = vld [vmem:[%s10765_s22 + $0x538] sm:$0xff] }
 0x37f   : > { %6767 = vmatprep.subr.bf16.mxu1 %v8928_v14  ;;  %v746_v13 = vld [vmem:[%s10765_s22 + $0x918] sm:$0xff]  ;;  %v8975_v14 = vcombine.low %v610_v2, %v614_v3  ;;  %v8984_v19 = vcombine.high %v618_v11, %v622_v12 }
 0x380   : > { %v774_v20 = vld [vmem:[%s10765_s22 + $0x9f8] sm:$0xff] }
 0x381   : > { %6727 = vmatpush1.bf16.msra.mxu0 %v9693_v55  ;;  %v754_v55 = vld [vmem:[%s10765_s22 + $0x958] sm:$0xff] }
 0x382   : > { %6768 = vmatpush1.bf16.msra.mxu1 %v8927_v22  ;;  %6728 = vmatprep.subr.bf16.mxu0 %v9702_v25  ;;  %v758_v22 = vld [vmem:[%s10765_s22 + $0x978] sm:$0xff]  ;;  %v8983_v25 = vcombine.low %v618_v11, %v622_v12 }
 0x383   : > { %6769 = vmatprep.subr.bf16.mxu1 %v8936_v26  ;;  %v9120_v27 = vcombine.high %v754_v55, %v758_v22 }
 0x385   : > { %6729 = vmatpush1.bf16.msra.mxu0 %v9701_v29  ;;  %v762_v29 = vld [vmem:[%s10765_s22 + $0x998] sm:$0xff] }
 0x386   : > { %6770 = vmatpush1.bf16.msra.mxu1 %v8935_v33  ;;  %6730 = vmatprep.subr.bf16.mxu0 %v9710_v31  ;;  %v766_v33 = vld [vmem:[%s10765_s22 + $0x9b8] sm:$0xff]  ;;  %v8991_v31 = vcombine.low %v626_v24, %v630_v18 }
 0x387   : > { %6771 = vmatprep.subr.bf16.mxu1 %v8944_v32  ;;  %v9119_v32 = vcombine.low %v754_v55, %v758_v22  ;;  %v9128_v38 = vcombine.high %v762_v29, %v766_v33 }
 0x389   : > { %6731 = vmatpush1.bf16.msra.mxu0 %v9709_v36  ;;  %v646_v36 = vld [vmem:[%s10765_s22 + $0x5f8] sm:$0xff] }
 0x38a   : > { %6772 = vmatpush1.bf16.msra.mxu1 %v8943_v23  ;;  %6782 = vmatprep.subr.bf16.mxu0 %v8952_v39  ;;  %v9007_v2 = vcombine.low %v642_v44, %v646_v36 }
 0x38b   : > { %6823 = vmatprep.subr.bf16.mxu1 %v9080_v45  ;;  %v770_v45 = vld [vmem:[%s10765_s22 + $0x9d8] sm:$0xff] }
 0x38c   : > { %6733 = vmatmul.mubr.bf16.vlgmr.msra.gmra.mrb[40].mxu0 %v11142_v42  ;;  %v9136_v61 = vcombine.high %v770_v45, %v774_v20  ;;  %v9135_v3 = vcombine.low %v770_v45, %v774_v20  ;;  %v694_v45 = vld [vmem:[%s10765_s22 + $0x778] sm:$0xff] }
 0x38d   : > { %6774 = vmatmul.mubr.bf16.vlgmr.msra.gmra.mrb[40].mxu1 %v10879_v17  ;;  %6783 = vmatpush1.bf16.msra.mxu0 %v8951_v49  ;;  %v8967_v17 = vcombine.low %v602_v56, %v606_v57  ;;  %v8999_v49 = vcombine.low %v634_v54, %v638_v59  ;;  %v9127_v56 = vcombine.low %v762_v29, %v766_v33  ;;  %v818_v20 = vld [vmem:[%s10765_s22 + $0xb58] sm:$0xff] }
 0x38e   : > { %6824 = vmatpush1.bf16.msra.mxu1 %v9079_v8  ;;  %6784 = vmatprep.subr.bf16.mxu0 %v8960_v52  ;;  %v9008_v57 = vcombine.high %v642_v44, %v646_v36 }
 0x38f   : > { %6825 = vmatprep.subr.bf16.mxu1 %v9088_v53  ;;  %6814 = vmatprep.mubr.bf16.mxu0 %v10833_v60  ;;  %v750_v60 = vld [vmem:[%s10765_s22 + $0x938] sm:$0xff] }
 0x390   : > { %6855 = vmatprep.mubr.bf16.mxu1 %v10897_v28  ;;  %v9103_v28 = vcombine.low %v738_v4, %v742_v6  ;;  %v9112_v43 = vcombine.high %v746_v13, %v750_v60  ;;  %v9111_v26 = vcombine.low %v746_v13, %v750_v60 }
 0x391   : > { %6785 = vmatpush1.bf16.msra.mxu0 %v8959_v62  ;;  %v650_v62 = vld [vmem:[%s10765_s22 + $0x618] sm:$0xff] }
 0x392   : > { %6826 = vmatpush1.bf16.msra.mxu1 %v9087_v63  ;;  %6786 = vmatprep.subr.bf16.mxu0 %v8968_v0  ;;  %v654_v63 = vld [vmem:[%s10765_s22 + $0x638] sm:$0xff] }
 0x393   : > { %6827 = vmatprep.subr.bf16.mxu1 %v9096_v1  ;;  %v778_v0 = vld [vmem:[%s10765_s22 + $0xa18] sm:$0xff]  ;;  %v9016_v4 = vcombine.high %v650_v62, %v654_v63  ;;  %v9015_v11 = vcombine.low %v650_v62, %v654_v63 }
 0x394   : > { %v782_v1 = vld [vmem:[%s10765_s22 + $0xa38] sm:$0xff] }
 0x395   : > { %6787 = vmatpush1.bf16.msra.mxu0 %v8967_v17  ;;  %v9144_v6 = vcombine.high %v778_v0, %v782_v1  ;;  %v658_v17 = vld [vmem:[%s10765_s22 + $0x658] sm:$0xff]  ;;  %v9143_v12 = vcombine.low %v778_v0, %v782_v1 }
 0x396   : > { %6828 = vmatpush1.bf16.msra.mxu1 %v9095_v7  ;;  %6788 = vmatprep.subr.bf16.mxu0 %v8976_v10  ;;  %v662_v7 = vld [vmem:[%s10765_s22 + $0x678] sm:$0xff] }
 0x397   : > { %6829 = vmatprep.subr.bf16.mxu1 %v9104_v40  ;;  %v786_v10 = vld [vmem:[%s10765_s22 + $0xa58] sm:$0xff]  ;;  %v9024_v13 = vcombine.high %v658_v17, %v662_v7  ;;  %v9023_v24 = vcombine.low %v658_v17, %v662_v7 }
 0x398   : > { %v790_v40 = vld [vmem:[%s10765_s22 + $0xa78] sm:$0xff] }
 0x399   : > { %6789 = vmatpush1.bf16.msra.mxu0 %v8975_v14  ;;  %v9152_v60 = vcombine.high %v786_v10, %v790_v40  ;;  %v666_v14 = vld [vmem:[%s10765_s22 + $0x698] sm:$0xff]  ;;  %v9151_v18 = vcombine.low %v786_v10, %v790_v40 }
 0x39a   : > { %6830 = vmatpush1.bf16.msra.mxu1 %v9103_v28  ;;  %6790 = vmatprep.subr.bf16.mxu0 %v8984_v19  ;;  %v670_v28 = vld [vmem:[%s10765_s22 + $0x6b8] sm:$0xff] }
 0x39b   : > { %6831 = vmatprep.subr.bf16.mxu1 %v9112_v43  ;;  %v794_v19 = vld [vmem:[%s10765_s22 + $0xa98] sm:$0xff]  ;;  %v9032_v55 = vcombine.high %v666_v14, %v670_v28  ;;  %v9031_v54 = vcombine.low %v666_v14, %v670_v28 }
 0x39c   : > { %v798_v43 = vld [vmem:[%s10765_s22 + $0xab8] sm:$0xff] }
 0x39d   : > { %6791 = vmatpush1.bf16.msra.mxu0 %v8983_v25  ;;  %v9160_v22 = vcombine.high %v794_v19, %v798_v43  ;;  %v674_v25 = vld [vmem:[%s10765_s22 + $0x6d8] sm:$0xff]  ;;  %v9159_v59 = vcombine.low %v794_v19, %v798_v43 }
 0x39e   : > { %6832 = vmatpush1.bf16.msra.mxu1 %v9111_v26  ;;  %6792 = vmatprep.subr.bf16.mxu0 %v8992_v16  ;;  %v678_v26 = vld [vmem:[%s10765_s22 + $0x6f8] sm:$0xff] }
 0x39f   : > { %v6488_v35 = vpop.f32.mrb[28].mxu0  ;;  %6833 = vmatprep.subr.bf16.mxu1 %v9120_v27  ;;  %v802_v16 = vld [vmem:[%s10765_s22 + $0xad8] sm:$0xff]  ;;  %v9040_v29 = vcombine.high %v674_v25, %v678_v26 }
 0x3a0   : > { %v6529_v23 = vpop.f32.mrb[28].mxu1  ;;  %v6490_v39 = vpop.f32.mrb[29].mxu0  ;;  %v806_v27 = vld [vmem:[%s10765_s22 + $0xaf8] sm:$0xff] }
 0x3a1   : > { %v11686_v46 = vadd.f32 %v6529_v23, %v6488_v35  ;;  %v6531_v47 = vpop.f32.mrb[29].mxu1  ;;  %v6492_v51 = vpop.f32.mrb[30].mxu0  ;;  %6793 = vmatpush1.bf16.msra.mxu0 %v8991_v31  ;;  %v9168_v33 = vcombine.high %v802_v16, %v806_v27  ;;  %v682_v31 = vld [vmem:[%s10765_s22 + $0x718] sm:$0xff]  ;;  %v9167_v44 = vcombine.low %v802_v16, %v806_v27 }
 0x3a2   : > { %v11688_v8 = vadd.f32 %v6531_v47, %v6490_v39  ;;  %v6533_v52 = vpop.f32.mrb[30].mxu1  ;;  %6834 = vmatpush1.bf16.msra.mxu1 %v9119_v32  ;;  %v6493_v53 = vpop.f32.mrb[31].mxu0  ;;  %6794 = vmatprep.subr.bf16.mxu0 %v9000_v34  ;;  %v686_v32 = vld [vmem:[%s10765_s22 + $0x738] sm:$0xff] }
 0x3a3   : > { %v6534_v58 = vpop.f32.mrb[31].mxu1  ;;  %6835 = vmatprep.subr.bf16.mxu1 %v9128_v38  ;;  %v810_v34 = vld [vmem:[%s10765_s22 + $0xb18] sm:$0xff]  ;;  %v9039_v38 = vcombine.low %v674_v25, %v678_v26  ;;  %v9048_v36 = vcombine.high %v682_v31, %v686_v32  ;;  %v9047_v51 = vcombine.low %v682_v31, %v686_v32 }
 0x3a4   : > { %v814_v35 = vld [vmem:[%s10765_s22 + $0xb38] sm:$0xff] }
 0x3a5   : > { %6795 = vmatpush1.bf16.msra.mxu0 %v8999_v49  ;;  %v9176_v23 = vcombine.high %v810_v34, %v814_v35  ;;  %v690_v39 = vld [vmem:[%s10765_s22 + $0x758] sm:$0xff]  ;;  %v9175_v49 = vcombine.low %v810_v34, %v814_v35 }
 0x3a6   : > { %6836 = vmatpush1.bf16.msra.mxu1 %v9127_v56  ;;  %6796 = vmatprep.subr.bf16.mxu0 %v9008_v57  ;;  %v822_v47 = vld [vmem:[%s10765_s22 + $0xb78] sm:$0xff]  ;;  %v9056_v52 = vcombine.high %v690_v39, %v694_v45  ;;  %v9055_v62 = vcombine.low %v690_v39, %v694_v45 }
 0x3a7   : > { %6837 = vmatprep.subr.bf16.mxu1 %v9136_v61  ;;  %v9184_v53 = vcombine.high %v818_v20, %v822_v47  ;;  %v698_v56 = vld [vmem:[%s10765_s22 + $0x798] sm:$0xff]  ;;  %v9183_v63 = vcombine.low %v818_v20, %v822_v47 }
 0x3a8   : > { %v702_v57 = vld [vmem:[%s10765_s22 + $0x7b8] sm:$0xff] }
 0x3a9   : > { %6797 = vmatpush1.bf16.msra.mxu0 %v9007_v2  ;;  %v826_v58 = vld [vmem:[%s10765_s22 + $0xb98] sm:$0xff]  ;;  %v9064_v0 = vcombine.high %v698_v56, %v702_v57  ;;  %v9063_v17 = vcombine.low %v698_v56, %v702_v57 }
 0x3aa   : > { %6838 = vmatpush1.bf16.msra.mxu1 %v9135_v3  ;;  %6798 = vmatprep.subr.bf16.mxu0 %v9016_v4  ;;  %v830_v61 = vld [vmem:[%s10765_s22 + $0xbb8] sm:$0xff] }
 0x3ab   : > { %6839 = vmatprep.subr.bf16.mxu1 %v9144_v6  ;;  %v9192_v1 = vcombine.high %v826_v58, %v830_v61  ;;  %v706_v2 = vld [vmem:[%s10765_s22 + $0x7d8] sm:$0xff]  ;;  %v9191_v7 = vcombine.low %v826_v58, %v830_v61 }
 0x3ac   : > { %v710_v3 = vld [vmem:[%s10765_s22 + $0x7f8] sm:$0xff] }
 0x3ad   : > { %6799 = vmatpush1.bf16.msra.mxu0 %v9015_v11  ;;  %v834_v4 = vld [vmem:[%s10765_s22 + $0xbd8] sm:$0xff]  ;;  %v9072_v10 = vcombine.high %v706_v2, %v710_v3  ;;  %v9071_v14 = vcombine.low %v706_v2, %v710_v3 }
 0x3ae   : > { %6840 = vmatpush1.bf16.msra.mxu1 %v9143_v12  ;;  %6800 = vmatprep.subr.bf16.mxu0 %v9024_v13  ;;  %v838_v6 = vld [vmem:[%s10765_s22 + $0xbf8] sm:$0xff] }
 0x3af   : > { %6841 = vmatprep.subr.bf16.mxu1 %v9152_v60  ;;  %v9200_v40 = vcombine.high %v834_v4, %v838_v6  ;;  %v842_v11 = vld [vmem:[%s10765_s22 + $0xc18] sm:$0xff]  ;;  %v9199_v28 = vcombine.low %v834_v4, %v838_v6 }
 0x3b0   : > { %v846_v12 = vld [vmem:[%s10765_s22 + $0xc38] sm:$0xff] }
 0x3b1   : > { %6801 = vmatpush1.bf16.msra.mxu0 %v9023_v24  ;;  %v970_v13 = vld [vmem:[%s10765_s22 + $0x1018] sm:$0xff]  ;;  %v9208_v19 = vcombine.high %v842_v11, %v846_v12  ;;  %v9207_v25 = vcombine.low %v842_v11, %v846_v12 }
 0x3b2   : > { %6842 = vmatpush1.bf16.msra.mxu1 %v9151_v18  ;;  %6802 = vmatprep.subr.bf16.mxu0 %v9032_v55  ;;  %v974_v60 = vld [vmem:[%s10765_s22 + $0x1038] sm:$0xff] }
 0x3b3   : > { %6843 = vmatprep.subr.bf16.mxu1 %v9160_v22  ;;  %v9336_v43 = vcombine.high %v970_v13, %v974_v60  ;;  %v850_v24 = vld [vmem:[%s10765_s22 + $0xc58] sm:$0xff]  ;;  %v9335_v26 = vcombine.low %v970_v13, %v974_v60 }
 0x3b4   : > { %v854_v18 = vld [vmem:[%s10765_s22 + $0xc78] sm:$0xff] }
 0x3b5   : > { %6803 = vmatpush1.bf16.msra.mxu0 %v9031_v54  ;;  %v978_v55 = vld [vmem:[%s10765_s22 + $0x1058] sm:$0xff]  ;;  %v9216_v16 = vcombine.high %v850_v24, %v854_v18  ;;  %v9215_v31 = vcombine.low %v850_v24, %v854_v18 }
 0x3b6   : > { %6844 = vmatpush1.bf16.msra.mxu1 %v9159_v59  ;;  %6804 = vmatprep.subr.bf16.mxu0 %v9040_v29  ;;  %v982_v22 = vld [vmem:[%s10765_s22 + $0x1078] sm:$0xff] }
 0x3b7   : > { %6845 = vmatprep.subr.bf16.mxu1 %v9168_v33  ;;  %v9344_v27 = vcombine.high %v978_v55, %v982_v22  ;;  %v858_v54 = vld [vmem:[%s10765_s22 + $0xc98] sm:$0xff]  ;;  %v9343_v32 = vcombine.low %v978_v55, %v982_v22 }
 0x3b8   : > { %v862_v59 = vld [vmem:[%s10765_s22 + $0xcb8] sm:$0xff] }
 0x3b9   : > { %6805 = vmatpush1.bf16.msra.mxu0 %v9039_v38  ;;  %v986_v29 = vld [vmem:[%s10765_s22 + $0x1098] sm:$0xff]  ;;  %v9224_v34 = vcombine.high %v858_v54, %v862_v59 }
 0x3ba   : > { %6846 = vmatpush1.bf16.msra.mxu1 %v9167_v44  ;;  %6806 = vmatprep.subr.bf16.mxu0 %v9048_v36  ;;  %v990_v33 = vld [vmem:[%s10765_s22 + $0x10b8] sm:$0xff] }
 0x3bb   : > { %6847 = vmatprep.subr.bf16.mxu1 %v9176_v23  ;;  %v9352_v35 = vcombine.high %v986_v29, %v990_v33  ;;  %v866_v38 = vld [vmem:[%s10765_s22 + $0xcd8] sm:$0xff]  ;;  %v9351_v23 = vcombine.low %v986_v29, %v990_v33 }
 0x3bc   : > { %v870_v44 = vld [vmem:[%s10765_s22 + $0xcf8] sm:$0xff] }
 0x3bd   : > { %6807 = vmatpush1.bf16.msra.mxu0 %v9047_v51  ;;  %v998_v36 = vld [vmem:[%s10765_s22 + $0x10f8] sm:$0xff]  ;;  %v9232_v39 = vcombine.high %v866_v38, %v870_v44 }
 0x3be   : > { %6848 = vmatpush1.bf16.msra.mxu1 %v9175_v49  ;;  %6808 = vmatprep.subr.bf16.mxu0 %v9056_v52  ;;  %v874_v20 = vld [vmem:[%s10765_s22 + $0xd18] sm:$0xff]  ;;  %v9231_v49 = vcombine.low %v866_v38, %v870_v44 }
 0x3bf   : > { %6849 = vmatprep.subr.bf16.mxu1 %v9184_v53  ;;  %v878_v47 = vld [vmem:[%s10765_s22 + $0xd38] sm:$0xff] }
 0x3c0   : > { %v1002_v51 = vld [vmem:[%s10765_s22 + $0x1118] sm:$0xff]  ;;  %v9240_v52 = vcombine.high %v874_v20, %v878_v47 }
 0x3c1   : > { %6809 = vmatpush1.bf16.msra.mxu0 %v9055_v62  ;;  %v882_v56 = vld [vmem:[%s10765_s22 + $0xd58] sm:$0xff]  ;;  %v9239_v62 = vcombine.low %v874_v20, %v878_v47 }
 0x3c2   : > { %6850 = vmatpush1.bf16.msra.mxu1 %v9183_v63  ;;  %6810 = vmatprep.subr.bf16.mxu0 %v9064_v0  ;;  %v886_v57 = vld [vmem:[%s10765_s22 + $0xd78] sm:$0xff] }
 0x3c3   : > { %6851 = vmatprep.subr.bf16.mxu1 %v9192_v1  ;;  %v1010_v58 = vld [vmem:[%s10765_s22 + $0x1158] sm:$0xff]  ;;  %v9248_v0 = vcombine.high %v882_v56, %v886_v57 }
 0x3c4   : > { %v1014_v61 = vld [vmem:[%s10765_s22 + $0x1178] sm:$0xff] }
 0x3c5   : > { %6811 = vmatpush1.bf16.msra.mxu0 %v9063_v17  ;;  %v9376_v1 = vcombine.high %v1010_v58, %v1014_v61  ;;  %v890_v2 = vld [vmem:[%s10765_s22 + $0xd98] sm:$0xff]  ;;  %v9247_v17 = vcombine.low %v882_v56, %v886_v57 }
 0x3c6   : > { %6852 = vmatpush1.bf16.msra.mxu1 %v9191_v7  ;;  %6812 = vmatprep.subr.bf16.mxu0 %v9072_v10  ;;  %v894_v3 = vld [vmem:[%s10765_s22 + $0xdb8] sm:$0xff]  ;;  %v9375_v7 = vcombine.low %v1010_v58, %v1014_v61 }
 0x3c7   : > { %6853 = vmatprep.subr.bf16.mxu1 %v9200_v40  ;;  %v1018_v4 = vld [vmem:[%s10765_s22 + $0x1198] sm:$0xff]  ;;  %v9256_v10 = vcombine.high %v890_v2, %v894_v3  ;;  %v9255_v22 = vcombine.low %v890_v2, %v894_v3 }
 0x3c8   : > { %v1022_v6 = vld [vmem:[%s10765_s22 + $0x11b8] sm:$0xff] }
 0x3c9   : > { %6813 = vmatpush1.bf16.msra.mxu0 %v9071_v14  ;;  %v9384_v11 = vcombine.high %v1018_v4, %v1022_v6  ;;  %v898_v12 = vld [vmem:[%s10765_s22 + $0xdd8] sm:$0xff] }
 0x3ca   : > { %6854 = vmatpush1.bf16.msra.mxu1 %v9199_v28  ;;  %6864 = vmatprep.subr.bf16.mxu0 %v9208_v19  ;;  %v902_v13 = vld [vmem:[%s10765_s22 + $0xdf8] sm:$0xff] }
 0x3cb   : > { %6905 = vmatprep.subr.bf16.mxu1 %v9336_v43  ;;  %v1026_v19 = vld [vmem:[%s10765_s22 + $0x11d8] sm:$0xff] }
 0x3cc   : > { %6815 = vmatmul.mubr.bf16.vlgmr.msra.gmra.mrb[44].mxu0 %v10888_v21  ;;  %v994_v21 = vld [vmem:[%s10765_s22 + $0x10d8] sm:$0xff] }
 0x3cd   : > { %6856 = vmatmul.mubr.bf16.vlgmr.msra.gmra.mrb[44].mxu1 %v10969_v37  ;;  %6865 = vmatpush1.bf16.msra.mxu0 %v9207_v25  ;;  %v9223_v37 = vcombine.low %v858_v54, %v862_v59  ;;  %v9360_v45 = vcombine.high %v994_v21, %v998_v36  ;;  %v1030_v43 = vld [vmem:[%s10765_s22 + $0x11f8] sm:$0xff] }
 0x3ce   : > { %6906 = vmatpush1.bf16.msra.mxu1 %v9335_v26  ;;  %6866 = vmatprep.subr.bf16.mxu0 %v9216_v16  ;;  %v9392_v59 = vcombine.high %v1026_v19, %v1030_v43  ;;  %v906_v29 = vld [vmem:[%s10765_s22 + $0xe18] sm:$0xff] }
 0x3cf   : > { %6907 = vmatprep.subr.bf16.mxu1 %v9344_v27  ;;  %6896 = vmatprep.mubr.bf16.mxu0 %v10904_v30  ;;  %v1006_v30 = vld [vmem:[%s10765_s22 + $0x1138] sm:$0xff]  ;;  %v9264_v27 = vcombine.high %v898_v12, %v902_v13 }
 0x3d0   : > { %6937 = vmatprep.mubr.bf16.mxu1 %v10987_v48  ;;  %v9359_v48 = vcombine.low %v994_v21, %v998_v36  ;;  %v9368_v53 = vcombine.high %v1002_v51, %v1006_v30  ;;  %v9367_v63 = vcombine.low %v1002_v51, %v1006_v30  ;;  %v910_v33 = vld [vmem:[%s10765_s22 + $0xe38] sm:$0xff] }
 0x3d1   : > { %6867 = vmatpush1.bf16.msra.mxu0 %v9215_v31  ;;  %v1034_v31 = vld [vmem:[%s10765_s22 + $0x1218] sm:$0xff]  ;;  %v9272_v38 = vcombine.high %v906_v29, %v910_v33 }
 0x3d2   : > { %6908 = vmatpush1.bf16.msra.mxu1 %v9343_v32  ;;  %6868 = vmatprep.subr.bf16.mxu0 %v9224_v34  ;;  %v1038_v32 = vld [vmem:[%s10765_s22 + $0x1238] sm:$0xff]  ;;  %v9263_v34 = vcombine.low %v898_v12, %v902_v13 }
 0x3d3   : > { %6909 = vmatprep.subr.bf16.mxu1 %v9352_v35  ;;  %v9391_v35 = vcombine.low %v1026_v19, %v1030_v43  ;;  %v9400_v44 = vcombine.high %v1034_v31, %v1038_v32  ;;  %v914_v21 = vld [vmem:[%s10765_s22 + $0xe58] sm:$0xff] }
 0x3d4   : > { %v918_v36 = vld [vmem:[%s10765_s22 + $0xe78] sm:$0xff] }
 0x3d5   : > { %6869 = vmatpush1.bf16.msra.mxu0 %v9223_v37  ;;  %v1042_v37 = vld [vmem:[%s10765_s22 + $0x1258] sm:$0xff]  ;;  %v9280_v20 = vcombine.high %v914_v21, %v918_v36 }
 0x3d6   : > { %6910 = vmatpush1.bf16.msra.mxu1 %v9351_v23  ;;  %6870 = vmatprep.subr.bf16.mxu0 %v9232_v39  ;;  %v1046_v23 = vld [vmem:[%s10765_s22 + $0x1278] sm:$0xff]  ;;  %v9271_v39 = vcombine.low %v906_v29, %v910_v33 }
 0x3d7   : > { %6911 = vmatprep.subr.bf16.mxu1 %v9360_v45  ;;  %v9399_v45 = vcombine.low %v1034_v31, %v1038_v32  ;;  %v9408_v47 = vcombine.high %v1042_v37, %v1046_v23  ;;  %v922_v51 = vld [vmem:[%s10765_s22 + $0xe98] sm:$0xff] }
 0x3d8   : > { %v926_v30 = vld [vmem:[%s10765_s22 + $0xeb8] sm:$0xff] }
 0x3d9   : > { %6871 = vmatpush1.bf16.msra.mxu0 %v9231_v49  ;;  %v1050_v49 = vld [vmem:[%s10765_s22 + $0x1298] sm:$0xff]  ;;  %v9288_v56 = vcombine.high %v922_v51, %v926_v30 }
 0x3da   : > { %6912 = vmatpush1.bf16.msra.mxu1 %v9359_v48  ;;  %6872 = vmatprep.subr.bf16.mxu0 %v9240_v52  ;;  %v1054_v48 = vld [vmem:[%s10765_s22 + $0x12b8] sm:$0xff]  ;;  %v9279_v52 = vcombine.low %v914_v21, %v918_v36 }
 0x3db   : > { %6913 = vmatprep.subr.bf16.mxu1 %v9368_v53  ;;  %v9407_v53 = vcombine.low %v1042_v37, %v1046_v23  ;;  %v9416_v57 = vcombine.high %v1050_v49, %v1054_v48  ;;  %v930_v58 = vld [vmem:[%s10765_s22 + $0xed8] sm:$0xff] }
 0x3dc   : > { %v934_v61 = vld [vmem:[%s10765_s22 + $0xef8] sm:$0xff] }
 0x3dd   : > { %6873 = vmatpush1.bf16.msra.mxu0 %v9239_v62  ;;  %v1058_v62 = vld [vmem:[%s10765_s22 + $0x12d8] sm:$0xff]  ;;  %v9296_v2 = vcombine.high %v930_v58, %v934_v61 }
 0x3de   : > { %6914 = vmatpush1.bf16.msra.mxu1 %v9367_v63  ;;  %6874 = vmatprep.subr.bf16.mxu0 %v9248_v0  ;;  %v1062_v63 = vld [vmem:[%s10765_s22 + $0x12f8] sm:$0xff]  ;;  %v9287_v0 = vcombine.low %v922_v51, %v926_v30 }
 0x3df   : > { %v6570_v40 = vpop.f32.mrb[32].mxu0  ;;  %6915 = vmatprep.subr.bf16.mxu1 %v9376_v1  ;;  %v9415_v1 = vcombine.low %v1050_v49, %v1054_v48  ;;  %v9424_v3 = vcombine.high %v1058_v62, %v1062_v63  ;;  %v946_v13 = vld [vmem:[%s10765_s22 + $0xf58] sm:$0xff] }
 0x3e0   : > { %v6571_v60 = vadd.f32 %v6570_v40, %v11686_v46  ;;  %v6611_v14 = vpop.f32.mrb[32].mxu1  ;;  %v6572_v28 = vpop.f32.mrb[33].mxu0  ;;  %v9383_v46 = vcombine.low %v1018_v4, %v1022_v6  ;;  %v938_v4 = vld [vmem:[%s10765_s22 + $0xf18] sm:$0xff]  ;;  %v9423_v40 = vcombine.low %v1058_v62, %v1062_v63 }
 0x3e1   : > { %v6573_v24 = vadd.f32 %v6572_v28, %v11688_v8  ;;  %v6613_v18 = vpop.f32.mrb[33].mxu1  ;;  %v6574_v55 = vpop.f32.mrb[34].mxu0  ;;  %6875 = vmatpush1.bf16.msra.mxu0 %v9247_v17  ;;  %v942_v6 = vld [vmem:[%s10765_s22 + $0xf38] sm:$0xff] }
 0x3e2   : > { %v11760_v25 = vadd.f32 %v6611_v14, %v6571_v60  ;;  %v6615_v26 = vpop.f32.mrb[34].mxu1  ;;  %6916 = vmatpush1.bf16.msra.mxu1 %v9375_v7  ;;  %v6575_v16 = vpop.f32.mrb[35].mxu0  ;;  %6876 = vmatprep.subr.bf16.mxu0 %v9256_v10  ;;  %v1066_v17 = vld [vmem:[%s10765_s22 + $0x1318] sm:$0xff]  ;;  %v9295_v10 = vcombine.low %v930_v58, %v934_v61  ;;  %v9303_v19 = vcombine.low %v938_v4, %v942_v6 }
 0x3e3   : > { %v11762_v54 = vadd.f32 %v6613_v18, %v6573_v24  ;;  %v6616_v8 = vpop.f32.mrb[35].mxu1  ;;  %6917 = vmatprep.subr.bf16.mxu1 %v9384_v11  ;;  %v1070_v7 = vld [vmem:[%s10765_s22 + $0x1338] sm:$0xff]  ;;  %v9304_v11 = vcombine.high %v938_v4, %v942_v6 }
 0x3e4   : > { %v9432_v12 = vcombine.high %v1066_v17, %v1070_v7  ;;  %v950_v60 = vld [vmem:[%s10765_s22 + $0xf78] sm:$0xff]  ;;  %v9431_v43 = vcombine.low %v1066_v17, %v1070_v7 }
 0x3e5   : > { %6877 = vmatpush1.bf16.msra.mxu0 %v9255_v22  ;;  %v1074_v14 = vld [vmem:[%s10765_s22 + $0x1358] sm:$0xff]  ;;  %v9312_v24 = vcombine.high %v946_v13, %v950_v60 }
 0x3e6   : > { %6918 = vmatpush1.bf16.msra.mxu1 %v9383_v46  ;;  %6878 = vmatprep.subr.bf16.mxu0 %v9264_v27  ;;  %v1078_v28 = vld [vmem:[%s10765_s22 + $0x1378] sm:$0xff]  ;;  %v9311_v46 = vcombine.low %v946_v13, %v950_v60 }
 0x3e7   : > { %6919 = vmatprep.subr.bf16.mxu1 %v9392_v59  ;;  %v9440_v18 = vcombine.high %v1074_v14, %v1078_v28  ;;  %v954_v55 = vld [vmem:[%s10765_s22 + $0xf98] sm:$0xff]  ;;  %v9439_v27 = vcombine.low %v1074_v14, %v1078_v28 }
 0x3e8   : > { %v958_v22 = vld [vmem:[%s10765_s22 + $0xfb8] sm:$0xff] }
 0x3e9   : > { %6879 = vmatpush1.bf16.msra.mxu0 %v9263_v34  ;;  %v1082_v26 = vld [vmem:[%s10765_s22 + $0x1398] sm:$0xff]  ;;  %v9320_v8 = vcombine.high %v954_v55, %v958_v22  ;;  %v9319_v34 = vcombine.low %v954_v55, %v958_v22 }
 0x3ea   : > { %6920 = vmatpush1.bf16.msra.mxu1 %v9391_v35  ;;  %6880 = vmatprep.subr.bf16.mxu0 %v9272_v38  ;;  %v1086_v16 = vld [vmem:[%s10765_s22 + $0x13b8] sm:$0xff] }
 0x3eb   : > { %6921 = vmatprep.subr.bf16.mxu1 %v9400_v44  ;;  %v9448_v59 = vcombine.high %v1082_v26, %v1086_v16  ;;  %v962_v29 = vld [vmem:[%s10765_s22 + $0xfd8] sm:$0xff]  ;;  %v9447_v35 = vcombine.low %v1082_v26, %v1086_v16 }
 0x3ec   : > { %v966_v33 = vld [vmem:[%s10765_s22 + $0xff8] sm:$0xff] }
 0x3ed   : > { %6881 = vmatpush1.bf16.msra.mxu0 %v9271_v39  ;;  %v1090_v31 = vld [vmem:[%s10765_s22 + $0x13d8] sm:$0xff]  ;;  %v9328_v38 = vcombine.high %v962_v29, %v966_v33  ;;  %v9327_v39 = vcombine.low %v962_v29, %v966_v33 }
 0x3ee   : > { %6922 = vmatpush1.bf16.msra.mxu1 %v9399_v45  ;;  %6882 = vmatprep.subr.bf16.mxu0 %v9280_v20  ;;  %v1094_v32 = vld [vmem:[%s10765_s22 + $0x13f8] sm:$0xff] }
 0x3ef   : > { %6923 = vmatprep.subr.bf16.mxu1 %v9408_v47  ;;  %v9456_v44 = vcombine.high %v1090_v31, %v1094_v32  ;;  %v1098_v21 = vld [vmem:[%s10765_s22 + $0x1418] sm:$0xff]  ;;  %v9455_v45 = vcombine.low %v1090_v31, %v1094_v32 }
 0x3f0   : > { %v1102_v36 = vld [vmem:[%s10765_s22 + $0x1438] sm:$0xff] }
 0x3f1   : > { %6883 = vmatpush1.bf16.msra.mxu0 %v9279_v52  ;;  %v1226_v37 = vld [vmem:[%s10765_s22 + $0x1818] sm:$0xff]  ;;  %v9464_v20 = vcombine.high %v1098_v21, %v1102_v36  ;;  %v9463_v52 = vcombine.low %v1098_v21, %v1102_v36 }
 0x3f2   : > { %6924 = vmatpush1.bf16.msra.mxu1 %v9407_v53  ;;  %6884 = vmatprep.subr.bf16.mxu0 %v9288_v56  ;;  %v1230_v23 = vld [vmem:[%s10765_s22 + $0x1838] sm:$0xff] }
 0x3f3   : > { %6925 = vmatprep.subr.bf16.mxu1 %v9416_v57  ;;  %v9592_v47 = vcombine.high %v1226_v37, %v1230_v23  ;;  %v1106_v51 = vld [vmem:[%s10765_s22 + $0x1458] sm:$0xff]  ;;  %v9591_v53 = vcombine.low %v1226_v37, %v1230_v23 }
 0x3f4   : > { %v1110_v30 = vld [vmem:[%s10765_s22 + $0x1478] sm:$0xff] }
 0x3f5   : > { %6885 = vmatpush1.bf16.msra.mxu0 %v9287_v0  ;;  %v1234_v49 = vld [vmem:[%s10765_s22 + $0x1858] sm:$0xff]  ;;  %v9472_v56 = vcombine.high %v1106_v51, %v1110_v30  ;;  %v9471_v0 = vcombine.low %v1106_v51, %v1110_v30 }
 0x3f6   : > { %6926 = vmatpush1.bf16.msra.mxu1 %v9415_v1  ;;  %6886 = vmatprep.subr.bf16.mxu0 %v9296_v2  ;;  %v1238_v48 = vld [vmem:[%s10765_s22 + $0x1878] sm:$0xff] }
 0x3f7   : > { %6927 = vmatprep.subr.bf16.mxu1 %v9424_v3  ;;  %v9600_v57 = vcombine.high %v1234_v49, %v1238_v48  ;;  %v1114_v58 = vld [vmem:[%s10765_s22 + $0x1498] sm:$0xff]  ;;  %v9599_v1 = vcombine.low %v1234_v49, %v1238_v48 }
 0x3f8   : > { %v1118_v61 = vld [vmem:[%s10765_s22 + $0x14b8] sm:$0xff] }
 0x3f9   : > { %6887 = vmatpush1.bf16.msra.mxu0 %v9295_v10  ;;  %v1242_v62 = vld [vmem:[%s10765_s22 + $0x1898] sm:$0xff]  ;;  %v9480_v2 = vcombine.high %v1114_v58, %v1118_v61 }
 0x3fa   : > { %6928 = vmatpush1.bf16.msra.mxu1 %v9423_v40  ;;  %6888 = vmatprep.subr.bf16.mxu0 %v9304_v11  ;;  %v1246_v63 = vld [vmem:[%s10765_s22 + $0x18b8] sm:$0xff] }
 0x3fb   : > { %6929 = vmatprep.subr.bf16.mxu1 %v9432_v12  ;;  %v9608_v3 = vcombine.high %v1242_v62, %v1246_v63  ;;  %v1122_v4 = vld [vmem:[%s10765_s22 + $0x14d8] sm:$0xff]  ;;  %v9607_v7 = vcombine.low %v1242_v62, %v1246_v63 }
 0x3fc   : > { %v1126_v6 = vld [vmem:[%s10765_s22 + $0x14f8] sm:$0xff] }
 0x3fd   : > { %6889 = vmatpush1.bf16.msra.mxu0 %v9303_v19  ;;  %v1254_v17 = vld [vmem:[%s10765_s22 + $0x18f8] sm:$0xff]  ;;  %v9488_v10 = vcombine.high %v1122_v4, %v1126_v6  ;;  %v9487_v60 = vcombine.low %v1122_v4, %v1126_v6 }
 0x3fe   : > { %6930 = vmatpush1.bf16.msra.mxu1 %v9431_v43  ;;  %6890 = vmatprep.subr.bf16.mxu0 %v9312_v24  ;;  %v1130_v11 = vld [vmem:[%s10765_s22 + $0x1518] sm:$0xff] }
 0x3ff   : > { %6931 = vmatprep.subr.bf16.mxu1 %v9440_v18  ;;  %v1134_v12 = vld [vmem:[%s10765_s22 + $0x1538] sm:$0xff] }
 0x400   : > { %v1258_v13 = vld [vmem:[%s10765_s22 + $0x1918] sm:$0xff]  ;;  %v9496_v14 = vcombine.high %v1130_v11, %v1134_v12  ;;  %v9495_v55 = vcombine.low %v1130_v11, %v1134_v12 }
 0x401   : > { %6891 = vmatpush1.bf16.msra.mxu0 %v9311_v46  ;;  %v1138_v19 = vld [vmem:[%s10765_s22 + $0x1558] sm:$0xff] }
 0x402   : > { %6932 = vmatpush1.bf16.msra.mxu1 %v9439_v27  ;;  %6892 = vmatprep.subr.bf16.mxu0 %v9320_v8  ;;  %v1142_v43 = vld [vmem:[%s10765_s22 + $0x1578] sm:$0xff] }
 0x403   : > { %6933 = vmatprep.subr.bf16.mxu1 %v9448_v59  ;;  %v1266_v24 = vld [vmem:[%s10765_s22 + $0x1958] sm:$0xff]  ;;  %v9504_v26 = vcombine.high %v1138_v19, %v1142_v43  ;;  %v9503_v29 = vcombine.low %v1138_v19, %v1142_v43 }
 0x404   : > { %v1270_v18 = vld [vmem:[%s10765_s22 + $0x1978] sm:$0xff] }
 0x405   : > { %6893 = vmatpush1.bf16.msra.mxu0 %v9319_v34  ;;  %v9632_v16 = vcombine.high %v1266_v24, %v1270_v18  ;;  %v1146_v46 = vld [vmem:[%s10765_s22 + $0x1598] sm:$0xff]  ;;  %v9631_v33 = vcombine.low %v1266_v24, %v1270_v18 }
 0x406   : > { %6934 = vmatpush1.bf16.msra.mxu1 %v9447_v35  ;;  %6894 = vmatprep.subr.bf16.mxu0 %v9328_v38  ;;  %v1150_v27 = vld [vmem:[%s10765_s22 + $0x15b8] sm:$0xff] }
 0x407   : > { %6935 = vmatprep.subr.bf16.mxu1 %v9456_v44  ;;  %v1274_v8 = vld [vmem:[%s10765_s22 + $0x1998] sm:$0xff]  ;;  %v9512_v31 = vcombine.high %v1146_v46, %v1150_v27 }
 0x408   : > { %v1278_v59 = vld [vmem:[%s10765_s22 + $0x19b8] sm:$0xff] }
 0x409   : > { %6895 = vmatpush1.bf16.msra.mxu0 %v9327_v39  ;;  %v9640_v34 = vcombine.high %v1274_v8, %v1278_v59  ;;  %v1154_v35 = vld [vmem:[%s10765_s22 + $0x15d8] sm:$0xff] }
 0x40a   : > { %6936 = vmatpush1.bf16.msra.mxu1 %v9455_v45  ;;  %6946 = vmatprep.subr.bf16.mxu0 %v9464_v20  ;;  %v1158_v38 = vld [vmem:[%s10765_s22 + $0x15f8] sm:$0xff] }
 0x40b   : > { %6987 = vmatprep.subr.bf16.mxu1 %v9592_v47  ;;  %v1282_v37 = vld [vmem:[%s10765_s22 + $0x19d8] sm:$0xff]  ;;  %v9511_v47 = vcombine.low %v1146_v46, %v1150_v27  ;;  %v9520_v48 = vcombine.high %v1154_v35, %v1158_v38  ;;  %v9519_v62 = vcombine.low %v1154_v35, %v1158_v38 }
 0x40c   : > { %6897 = vmatmul.mubr.bf16.vlgmr.msra.gmra.mrb[48].mxu0 %v10978_v41  ;;  %v1250_v41 = vld [vmem:[%s10765_s22 + $0x18d8] sm:$0xff] }
 0x40d   : > { %6938 = vmatmul.mubr.bf16.vlgmr.msra.gmra.mrb[48].mxu1 %v11059_v5  ;;  %6947 = vmatpush1.bf16.msra.mxu0 %v9463_v52  ;;  %v9479_v5 = vcombine.low %v1114_v58, %v1118_v61  ;;  %v9616_v40 = vcombine.high %v1250_v41, %v1254_v17  ;;  %v1286_v23 = vld [vmem:[%s10765_s22 + $0x19f8] sm:$0xff] }
 0x40e   : > { %6988 = vmatpush1.bf16.msra.mxu1 %v9591_v53  ;;  %6948 = vmatprep.subr.bf16.mxu0 %v9472_v56  ;;  %v9648_v53 = vcombine.high %v1282_v37, %v1286_v23  ;;  %v1162_v56 = vld [vmem:[%s10765_s22 + $0x1618] sm:$0xff]  ;;  %v9647_v63 = vcombine.low %v1282_v37, %v1286_v23 }
 0x40f   : > { %6989 = vmatprep.subr.bf16.mxu1 %v9600_v57  ;;  %6978 = vmatprep.mubr.bf16.mxu0 %v10994_v50  ;;  %v1262_v50 = vld [vmem:[%s10765_s22 + $0x1938] sm:$0xff] }
 0x410   : > { %7019 = vmatprep.mubr.bf16.mxu1 %v11074_v15  ;;  %v9615_v15 = vcombine.low %v1250_v41, %v1254_v17  ;;  %v9624_v28 = vcombine.high %v1258_v13, %v1262_v50  ;;  %v9623_v22 = vcombine.low %v1258_v13, %v1262_v50  ;;  %v1166_v57 = vld [vmem:[%s10765_s22 + $0x1638] sm:$0xff] }
 0x411   : > { %6949 = vmatpush1.bf16.msra.mxu0 %v9471_v0  ;;  %v1290_v58 = vld [vmem:[%s10765_s22 + $0x1a18] sm:$0xff]  ;;  %v9528_v0 = vcombine.high %v1162_v56, %v1166_v57  ;;  %v9527_v41 = vcombine.low %v1162_v56, %v1166_v57 }
 0x412   : > { %6990 = vmatpush1.bf16.msra.mxu1 %v9599_v1  ;;  %6950 = vmatprep.subr.bf16.mxu0 %v9480_v2  ;;  %v1294_v61 = vld [vmem:[%s10765_s22 + $0x1a38] sm:$0xff] }
 0x413   : > { %6991 = vmatprep.subr.bf16.mxu1 %v9608_v3  ;;  %v9656_v1 = vcombine.high %v1290_v58, %v1294_v61  ;;  %v1170_v2 = vld [vmem:[%s10765_s22 + $0x1658] sm:$0xff]  ;;  %v9655_v17 = vcombine.low %v1290_v58, %v1294_v61 }
 0x414   : > { %v1174_v3 = vld [vmem:[%s10765_s22 + $0x1678] sm:$0xff] }
 0x415   : > { %6951 = vmatpush1.bf16.msra.mxu0 %v9479_v5  ;;  %v1298_v4 = vld [vmem:[%s10765_s22 + $0x1a58] sm:$0xff]  ;;  %v9536_v5 = vcombine.high %v1170_v2, %v1174_v3  ;;  %v9535_v13 = vcombine.low %v1170_v2, %v1174_v3 }
 0x416   : > { %6992 = vmatpush1.bf16.msra.mxu1 %v9607_v7  ;;  %6952 = vmatprep.subr.bf16.mxu0 %v9488_v10  ;;  %v1302_v6 = vld [vmem:[%s10765_s22 + $0x1a78] sm:$0xff] }
 0x417   : > { %6993 = vmatprep.subr.bf16.mxu1 %v9616_v40  ;;  %v9664_v7 = vcombine.high %v1298_v4, %v1302_v6  ;;  %v1178_v10 = vld [vmem:[%s10765_s22 + $0x1698] sm:$0xff]  ;;  %v9663_v50 = vcombine.low %v1298_v4, %v1302_v6  ;;  %v445_v4 = vld [vmem:[#allocation2 + $0x28] sm:$0xff] }
 0x418   : > { %v1182_v40 = vld [vmem:[%s10765_s22 + $0x16b8] sm:$0xff] }
 0x419   : > { %6953 = vmatpush1.bf16.msra.mxu0 %v9487_v60  ;;  %v1306_v11 = vld [vmem:[%s10765_s22 + $0x1a98] sm:$0xff]  ;;  %v9544_v60 = vcombine.high %v1178_v10, %v1182_v40  ;;  %v9543_v24 = vcombine.low %v1178_v10, %v1182_v40 }
 0x41a   : > { %6994 = vmatpush1.bf16.msra.mxu1 %v9615_v15  ;;  %6954 = vmatprep.subr.bf16.mxu0 %v9496_v14  ;;  %v1310_v12 = vld [vmem:[%s10765_s22 + $0x1ab8] sm:$0xff] }
 0x41b   : > { %6995 = vmatprep.subr.bf16.mxu1 %v9624_v28  ;;  %v9672_v15 = vcombine.high %v1306_v11, %v1310_v12  ;;  %v1186_v14 = vld [vmem:[%s10765_s22 + $0x16d8] sm:$0xff]  ;;  %v9671_v18 = vcombine.low %v1306_v11, %v1310_v12 }
 0x41c   : > { %v1190_v28 = vld [vmem:[%s10765_s22 + $0x16f8] sm:$0xff] }
 0x41d   : > { %6955 = vmatpush1.bf16.msra.mxu0 %v9495_v55  ;;  %v1314_v19 = vld [vmem:[%s10765_s22 + $0x1ad8] sm:$0xff]  ;;  %v9552_v55 = vcombine.high %v1186_v14, %v1190_v28 }
 0x41e   : > { %6996 = vmatpush1.bf16.msra.mxu1 %v9623_v22  ;;  %6956 = vmatprep.subr.bf16.mxu0 %v9504_v26  ;;  %v1318_v43 = vld [vmem:[%s10765_s22 + $0x1af8] sm:$0xff] }
 0x41f   : > { %v6652_v32 = vpop.f32.mrb[36].mxu0  ;;  %6997 = vmatprep.subr.bf16.mxu1 %v9632_v16  ;;  %v9680_v22 = vcombine.high %v1314_v19, %v1318_v43  ;;  %v1194_v26 = vld [vmem:[%s10765_s22 + $0x1718] sm:$0xff] }
 0x420   : > { %v6653_v44 = vadd.f32 %v6652_v32, %v11760_v25  ;;  %v6693_v21 = vpop.f32.mrb[36].mxu1  ;;  %v6654_v36 = vpop.f32.mrb[37].mxu0  ;;  %v9639_v25 = vcombine.low %v1274_v8, %v1278_v59  ;;  %v1198_v16 = vld [vmem:[%s10765_s22 + $0x1738] sm:$0xff]  ;;  %v9551_v8 = vcombine.low %v1186_v14, %v1190_v28  ;;  %v9679_v59 = vcombine.low %v1314_v19, %v1318_v43 }
 0x421   : > { %v6655_v39 = vadd.f32 %v6654_v36, %v11762_v54  ;;  %v6695_v45 = vpop.f32.mrb[37].mxu1  ;;  %v6656_v20 = vpop.f32.mrb[38].mxu0  ;;  %6957 = vmatpush1.bf16.msra.mxu0 %v9503_v29  ;;  %v1322_v46 = vld [vmem:[%s10765_s22 + $0x1b18] sm:$0xff]  ;;  %v9560_v29 = vcombine.high %v1194_v26, %v1198_v16  ;;  %v9559_v38 = vcombine.low %v1194_v26, %v1198_v16 }
 0x422   : > { %v11834_v51 = vadd.f32 %v6693_v21, %v6653_v44  ;;  %v6697_v30 = vpop.f32.mrb[38].mxu1  ;;  %6998 = vmatpush1.bf16.msra.mxu1 %v9631_v33  ;;  %v6657_v49 = vpop.f32.mrb[39].mxu0  ;;  %6958 = vmatprep.subr.bf16.mxu0 %v9512_v31  ;;  %v1326_v27 = vld [vmem:[%s10765_s22 + $0x1b38] sm:$0xff] }
 0x423   : > { %v11836_v52 = vadd.f32 %v6695_v45, %v6655_v39  ;;  %v6698_v54 = vpop.f32.mrb[39].mxu1  ;;  %6999 = vmatprep.subr.bf16.mxu1 %v9640_v34  ;;  %v9688_v33 = vcombine.high %v1322_v46, %v1326_v27  ;;  %v1202_v31 = vld [vmem:[%s10765_s22 + $0x1758] sm:$0xff]  ;;  %v9687_v44 = vcombine.low %v1322_v46, %v1326_v27 }
 0x424   : > { %v1206_v32 = vld [vmem:[%s10765_s22 + $0x1778] sm:$0xff] }
 0x425   : > { %6959 = vmatpush1.bf16.msra.mxu0 %v9511_v47  ;;  %v1330_v34 = vld [vmem:[%s10765_s22 + $0x1b58] sm:$0xff]  ;;  %v9568_v21 = vcombine.high %v1202_v31, %v1206_v32  ;;  %v9567_v20 = vcombine.low %v1202_v31, %v1206_v32 }
 0x426   : > { %7000 = vmatpush1.bf16.msra.mxu1 %v9639_v25  ;;  %6960 = vmatprep.subr.bf16.mxu0 %v9520_v48  ;;  %v1334_v35 = vld [vmem:[%s10765_s22 + $0x1b78] sm:$0xff] }
 0x427   : > { %7001 = vmatprep.subr.bf16.mxu1 %v9648_v53  ;;  %v9696_v36 = vcombine.high %v1330_v34, %v1334_v35  ;;  %v1210_v37 = vld [vmem:[%s10765_s22 + $0x1798] sm:$0xff]  ;;  %v9695_v47 = vcombine.low %v1330_v34, %v1334_v35 }
 0x428   : > { %v1214_v23 = vld [vmem:[%s10765_s22 + $0x17b8] sm:$0xff] }
 0x429   : > { %6961 = vmatpush1.bf16.msra.mxu0 %v9519_v62  ;;  %v1338_v39 = vld [vmem:[%s10765_s22 + $0x1b98] sm:$0xff]  ;;  %v9576_v30 = vcombine.high %v1210_v37, %v1214_v23  ;;  %v9575_v56 = vcombine.low %v1210_v37, %v1214_v23 }
 0x42a   : > { %7002 = vmatpush1.bf16.msra.mxu1 %v9647_v63  ;;  %6962 = vmatprep.subr.bf16.mxu0 %v9528_v0  ;;  %v1342_v45 = vld [vmem:[%s10765_s22 + $0x1bb8] sm:$0xff]  ;;  %v444_v0 = vld [vmem:[#allocation2 + $0x20] sm:$0xff] }
 0x42b   : > { %7003 = vmatprep.subr.bf16.mxu1 %v9656_v1  ;;  %v9704_v49 = vcombine.high %v1338_v39, %v1342_v45  ;;  %v1218_v25 = vld [vmem:[%s10765_s22 + $0x17d8] sm:$0xff]  ;;  %v9703_v57 = vcombine.low %v1338_v39, %v1342_v45 }
 0x42c   : > { %v1222_v48 = vld [vmem:[%s10765_s22 + $0x17f8] sm:$0xff] }
 0x42d   : > { %6963 = vmatpush1.bf16.msra.mxu0 %v9527_v41  ;;  %v1346_v54 = vld [vmem:[%s10765_s22 + $0x1bd8] sm:$0xff]  ;;  %v9584_v58 = vcombine.high %v1218_v25, %v1222_v48  ;;  %v9583_v62 = vcombine.low %v1218_v25, %v1222_v48  ;;  %v10036_v25 = vld [vmem:[#allocation7 + $0x4] ss:$8 sps:$4 sm:$0xff] (!%p9713_p12)  }
 0x42e   : > { %7004 = vmatpush1.bf16.msra.mxu1 %v9655_v17  ;;  %6964 = vmatprep.subr.bf16.mxu0 %v9536_v5  ;;  %v1350_v53 = vld [vmem:[%s10765_s22 + $0x1bf8] sm:$0xff]  ;;  %v10038_v48 = vld [vmem:[#allocation7 + $0x204] ss:$8 sps:$4 sm:$0xff] (!%p9713_p12)  }
 0x42f   : > { %7005 = vmatprep.subr.bf16.mxu1 %v9664_v7  ;;  %v9712_v61 = vcombine.high %v1346_v54, %v1350_v53  ;;  %v9711_v63 = vcombine.low %v1346_v54, %v1350_v53  ;;  %v447_v23 = vld [vmem:[#allocation2 + $0x38] sm:$0xff]  ;;  %v10040_v54 = vld [vmem:[#allocation7] ss:$8 sps:$4 sm:$0xff] (!%p9713_p12)  }
 0x430   : > { %v10041_v53 = vld [vmem:[#allocation7 + $0x200] ss:$8 sps:$4 sm:$0xff] (!%p9713_p12)  }
 0x431   : > { %6965 = vmatpush1.bf16.msra.mxu0 %v9535_v13 }
 0x432   : > { %7006 = vmatpush1.bf16.msra.mxu1 %v9663_v50  ;;  %6966 = vmatprep.subr.bf16.mxu0 %v9544_v60 }
 0x433   : > { %7007 = vmatprep.subr.bf16.mxu1 %v9672_v15 }
 0x435   : > { %6967 = vmatpush1.bf16.msra.mxu0 %v9543_v24 }
 0x436   : > { %7008 = vmatpush1.bf16.msra.mxu1 %v9671_v18  ;;  %6968 = vmatprep.subr.bf16.mxu0 %v9552_v55 }
 0x437   : > { %7009 = vmatprep.subr.bf16.mxu1 %v9680_v22 }
 0x439   : > { %6969 = vmatpush1.bf16.msra.mxu0 %v9551_v8 }
 0x43a   : > { %7010 = vmatpush1.bf16.msra.mxu1 %v9679_v59  ;;  %6970 = vmatprep.subr.bf16.mxu0 %v9560_v29 }
 0x43b   : > { %7011 = vmatprep.subr.bf16.mxu1 %v9688_v33 }
 0x43d   : > { %6971 = vmatpush1.bf16.msra.mxu0 %v9559_v38  ;;  %v446_v38 = vld [vmem:[#allocation2 + $0x30] sm:$0xff] }
 0x43e   : > { %7012 = vmatpush1.bf16.msra.mxu1 %v9687_v44  ;;  %6972 = vmatprep.subr.bf16.mxu0 %v9568_v21 }
 0x43f   : > { %7013 = vmatprep.subr.bf16.mxu1 %v9696_v36 }
 0x441   : > { %6973 = vmatpush1.bf16.msra.mxu0 %v9567_v20 }
 0x442   : > { %7014 = vmatpush1.bf16.msra.mxu1 %v9695_v47  ;;  %6974 = vmatprep.subr.bf16.mxu0 %v9576_v30 }
 0x443   : > { %7015 = vmatprep.subr.bf16.mxu1 %v9704_v49 }
 0x445   : > { %6975 = vmatpush1.bf16.msra.mxu0 %v9575_v56  ;;  %v10042_v56 = vld [vmem:[#allocation7 + $0x14] ss:$8 sps:$4 sm:$0xff] (!%p9713_p12)  }
 0x446   : > { %7016 = vmatpush1.bf16.msra.mxu1 %v9703_v57  ;;  %6976 = vmatprep.subr.bf16.mxu0 %v9584_v58  ;;  %v10044_v57 = vld [vmem:[#allocation7 + $0x214] ss:$8 sps:$4 sm:$0xff] (!%p9713_p12)   ;;  %v10046_v58 = vld [vmem:[#allocation7 + $0x10] ss:$8 sps:$4 sm:$0xff] (!%p9713_p12)  }
 0x447   : > { %7017 = vmatprep.subr.bf16.mxu1 %v9712_v61  ;;  %v10047_v61 = vld [vmem:[#allocation7 + $0x210] ss:$8 sps:$4 sm:$0xff] (!%p9713_p12)  }
 0x449   : > { %6977 = vmatpush1.bf16.msra.mxu0 %v9583_v62  ;;  %v10048_v62 = vld [vmem:[#allocation7 + $0x24] ss:$8 sps:$4 sm:$0xff] (!%p9713_p12)  }
 0x44a   : > { %7018 = vmatpush1.bf16.msra.mxu1 %v9711_v63  ;;  %8239 = vmatprep.subr.bf16.mxu0 (!%p9713_p12), %v10038_v48  ;;  %v10050_v63 = vld [vmem:[#allocation7 + $0x224] ss:$8 sps:$4 sm:$0xff] (!%p9713_p12)  }
 0x44b   : > { %8157 = vmatprep.subr.bf16.mxu1 (!%p9713_p12), %v10036_v25  ;;  %v7048_v48 = vld [vmem:[#allocation2] sm:$0xff] (!%p9713_p12) }
 0x44c   : > { %6979 = vmatmul.mubr.bf16.vlgmr.msra.gmra.mrb[52].mxu0 %v11068_v9 }
 0x44d   : > { %7020 = vmatmul.mubr.bf16.vlgmr.msra.gmra.mrb[52].mxu1 %v11142_v42  ;;  %8240 = vmatpush1.bf16.msra.mxu0 (!%p9713_p12), %v10041_v53 }
 0x44e   : > { %8158 = vmatpush1.bf16.msra.mxu1 (!%p9713_p12), %v10040_v54  ;;  %8241 = vmatprep.subr.bf16.mxu0 (!%p9713_p12), %v10044_v57 }
 0x44f   : > { %8159 = vmatprep.subr.bf16.mxu1 (!%p9713_p12), %v10042_v56 }
 0x451   : > { %8242 = vmatpush1.bf16.msra.mxu0 (!%p9713_p12), %v10047_v61  ;;  %v10114_v61 = vld [vmem:[#allocation7 + $0xd4] ss:$8 sps:$4 sm:$0xff] (!%p9713_p12)  }
 0x452   : > { %8160 = vmatpush1.bf16.msra.mxu1 (!%p9713_p12), %v10046_v58  ;;  %8243 = vmatprep.subr.bf16.mxu0 (!%p9713_p12), %v10050_v63  ;;  %v10113_v58 = vld [vmem:[#allocation7 + $0x2c0] ss:$8 sps:$4 sm:$0xff] (!%p9713_p12)  }
 0x453   : > { %8161 = vmatprep.subr.bf16.mxu1 (!%p9713_p12), %v10048_v62 }
 0x45f   : > { %v6734_v1 = vpop.f32.mrb[40].mxu0 }
 0x460   : > { %v6735_v2 = vadd.f32 %v6734_v1, %v11834_v51  ;;  %v6775_v3 = vpop.f32.mrb[40].mxu1  ;;  %v6736_v6 = vpop.f32.mrb[41].mxu0  ;;  %v10053_v1 = vld [vmem:[#allocation7 + $0x220] ss:$8 sps:$4 sm:$0xff] (!%p9713_p12)  }
 0x461   : > { %v6737_v41 = vadd.f32 %v6736_v6, %v11836_v52  ;;  %v6777_v17 = vpop.f32.mrb[41].mxu1  ;;  %v6738_v5 = vpop.f32.mrb[42].mxu0  ;;  %8244 = vmatpush1.bf16.msra.mxu0 (!%p9713_p12), %v10053_v1  ;;  %v10059_v6 = vld [vmem:[#allocation7 + $0x230] ss:$8 sps:$4 sm:$0xff] (!%p9713_p12)  }
 0x462   : > { %v7032_v7 = vadd.f32 %v6735_v2, %v444_v0  ;;  %v6779_v10 = vpop.f32.mrb[42].mxu1  ;;  %v6739_v40 = vpop.f32.mrb[43].mxu0  ;;  %v10052_v0 = vld [vmem:[#allocation7 + $0x20] ss:$8 sps:$4 sm:$0xff] (!%p9713_p12)   ;;  %v10054_v2 = vld [vmem:[#allocation7 + $0x34] ss:$8 sps:$4 sm:$0xff] (!%p9713_p12)  }
 0x463   : > { %v7033_v11 = vadd.f32 %v6737_v41, %v445_v4  ;;  %v6780_v12 = vpop.f32.mrb[43].mxu1  ;;  %v10058_v4 = vld [vmem:[#allocation7 + $0x30] ss:$8 sps:$4 sm:$0xff] (!%p9713_p12)   ;;  %8162 = vmatpush1.bf16.msra.mxu1 (!%p9713_p12), %v10052_v0  ;;  %v10060_v41 = vld [vmem:[#allocation7 + $0x44] ss:$8 sps:$4 sm:$0xff] (!%p9713_p12)  }
 0x464   : > { %7040 = vst [vmem:[#allocation2 + $0x20] sm:$0xff] %v7032_v7  ;;  %8163 = vmatprep.subr.bf16.mxu1 (!%p9713_p12), %v10054_v2  ;;  %v10064_v5 = vld [vmem:[#allocation7 + $0x40] ss:$8 sps:$4 sm:$0xff] (!%p9713_p12)   ;;  %v10066_v10 = vld [vmem:[#allocation7 + $0x54] ss:$8 sps:$4 sm:$0xff] (!%p9713_p12)  }
 0x465   : > { %7041 = vst [vmem:[#allocation2 + $0x28] sm:$0xff] %v7033_v11  ;;  %v10065_v7 = vld [vmem:[#allocation7 + $0x240] ss:$8 sps:$4 sm:$0xff] (!%p9713_p12)   ;;  %v10068_v40 = vld [vmem:[#allocation7 + $0x254] ss:$8 sps:$4 sm:$0xff] (!%p9713_p12)  }
 0x466   : > { %v10070_v11 = vld [vmem:[#allocation7 + $0x50] ss:$8 sps:$4 sm:$0xff] (!%p9713_p12)   ;;  %v10116_v0 = vld [vmem:[#allocation7 + $0x2d4] ss:$8 sps:$4 sm:$0xff] (!%p9713_p12)  }
 0x467   : > { %8164 = vmatpush1.bf16.msra.mxu1 (!%p9713_p12), %v10058_v4  ;;  %v10071_v12 = vld [vmem:[#allocation7 + $0x250] ss:$8 sps:$4 sm:$0xff] (!%p9713_p12)  }
 0x468   : > { %8165 = vmatprep.subr.bf16.mxu1 (!%p9713_p12), %v10060_v41  ;;  %v10118_v41 = vld [vmem:[#allocation7 + $0xd0] ss:$8 sps:$4 sm:$0xff] (!%p9713_p12)  }
 0x46b   : > { %8166 = vmatpush1.bf16.msra.mxu1 (!%p9713_p12), %v10064_v5  ;;  %v7052_v54 = vld [vmem:[#allocation2 + $0x20] sm:$0xff] (!%p9713_p12) }
 0x46c   : > { %8167 = vmatprep.subr.bf16.mxu1 (!%p9713_p12), %v10066_v10 }
 0x46f   : > { %8168 = vmatpush1.bf16.msra.mxu1 (!%p9713_p12), %v10070_v11  ;;  %v10119_v11 = vld [vmem:[#allocation7 + $0x2d0] ss:$8 sps:$4 sm:$0xff] (!%p9713_p12)  }
 0x49f   : > { %v6816_v9 = vpop.f32.mrb[44].mxu0 }
 0x4a0   : > { %v6817_v42 = vadd.f32 %v6816_v9, %v6775_v3  ;;  %v6857_v13 = vpop.f32.mrb[44].mxu1  ;;  %v6818_v50 = vpop.f32.mrb[45].mxu0  ;;  %v10056_v3 = vld [vmem:[#allocation7 + $0x234] ss:$8 sps:$4 sm:$0xff] (!%p9713_p12)   ;;  %v10072_v9 = vld [vmem:[#allocation7 + $0x64] ss:$8 sps:$4 sm:$0xff] (!%p9713_p12)  }
 0x4a1   : > { %v6819_v60 = vadd.f32 %v6818_v50, %v6777_v17  ;;  %v6859_v51 = vpop.f32.mrb[45].mxu1  ;;  %v6820_v15 = vpop.f32.mrb[46].mxu0  ;;  %8245 = vmatprep.subr.bf16.mxu0 (!%p9713_p12), %v10056_v3  ;;  %v10062_v17 = vld [vmem:[#allocation7 + $0x244] ss:$8 sps:$4 sm:$0xff] (!%p9713_p12)   ;;  %v10077_v50 = vld [vmem:[#allocation7 + $0x260] ss:$8 sps:$4 sm:$0xff] (!%p9713_p12)   ;;  %8169 = vmatprep.subr.bf16.mxu1 (!%p9713_p12), %v10072_v9 }
 0x4a2   : > { %v6858_v14 = vadd.f32 %v6857_v13, %v6817_v42  ;;  %v6861_v28 = vpop.f32.mrb[46].mxu1  ;;  %v6821_v19 = vpop.f32.mrb[47].mxu0  ;;  %8246 = vmatpush1.bf16.msra.mxu0 (!%p9713_p12), %v10059_v6  ;;  %v10074_v42 = vld [vmem:[#allocation7 + $0x264] ss:$8 sps:$4 sm:$0xff] (!%p9713_p12)   ;;  %v10076_v13 = vld [vmem:[#allocation7 + $0x60] ss:$8 sps:$4 sm:$0xff] (!%p9713_p12)  }
 0x4a3   : > { %v6860_v52 = vadd.f32 %v6859_v51, %v6819_v60  ;;  %v6862_v43 = vpop.f32.mrb[47].mxu1  ;;  %8247 = vmatprep.subr.bf16.mxu0 (!%p9713_p12), %v10062_v17  ;;  %v10078_v60 = vld [vmem:[#allocation7 + $0x74] ss:$8 sps:$4 sm:$0xff] (!%p9713_p12)   ;;  %v10082_v15 = vld [vmem:[#allocation7 + $0x70] ss:$8 sps:$4 sm:$0xff] (!%p9713_p12)   ;;  %8170 = vmatpush1.bf16.msra.mxu1 (!%p9713_p12), %v10076_v13 }
 0x4a4   : > { %v10080_v51 = vld [vmem:[#allocation7 + $0x274] ss:$8 sps:$4 sm:$0xff] (!%p9713_p12)   ;;  %v10084_v28 = vld [vmem:[#allocation7 + $0x84] ss:$8 sps:$4 sm:$0xff] (!%p9713_p12)   ;;  %8171 = vmatprep.subr.bf16.mxu1 (!%p9713_p12), %v10078_v60  ;;  %v10089_v43 = vld [vmem:[#allocation7 + $0x280] ss:$8 sps:$4 sm:$0xff] (!%p9713_p12)  }
 0x4a5   : > { %v10086_v19 = vld [vmem:[#allocation7 + $0x284] ss:$8 sps:$4 sm:$0xff] (!%p9713_p12)  }
 0x4a6   : > { %8248 = vmatpush1.bf16.msra.mxu0 (!%p9713_p12), %v10065_v7  ;;  %v11915_v3 = vld [vmem:[#allocation5 + $0x1] ss:$4 sm:$0xff] (!%p9713_p12)  ;;  %v11919_v17 = vld [vmem:[#allocation5 + $0x2] ss:$4 sm:$0xff] (!%p9713_p12) }
 0x4a7   : > { %8249 = vmatprep.subr.bf16.mxu0 (!%p9713_p12), %v10068_v40  ;;  %8172 = vmatpush1.bf16.msra.mxu1 (!%p9713_p12), %v10082_v15  ;;  %v10122_v60 = vld [vmem:[#allocation7 + $0x2e4] ss:$8 sps:$4 sm:$0xff] (!%p9713_p12)  }
 0x4a8   : > { %8173 = vmatprep.subr.bf16.mxu1 (!%p9713_p12), %v10084_v28 }
 0x4aa   : > { %8250 = vmatpush1.bf16.msra.mxu0 (!%p9713_p12), %v10071_v12  ;;  %v10120_v12 = vld [vmem:[#allocation7 + $0xe4] ss:$8 sps:$4 sm:$0xff] (!%p9713_p12)  }
 0x4ab   : > { %8251 = vmatprep.subr.bf16.mxu0 (!%p9713_p12), %v10074_v42 }
 0x4ae   : > { %8252 = vmatpush1.bf16.msra.mxu0 (!%p9713_p12), %v10077_v50 }
 0x4af   : > { %8253 = vmatprep.subr.bf16.mxu0 (!%p9713_p12), %v10080_v51 }
 0x4df   : > { %v6898_v24 = vpop.f32.mrb[48].mxu0 }
 0x4e0   : > { %v6899_v18 = vadd.f32 %v6898_v24, %v6858_v14  ;;  %v6939_v55 = vpop.f32.mrb[48].mxu1  ;;  %v6900_v22 = vpop.f32.mrb[49].mxu0  ;;  %v10083_v14 = vld [vmem:[#allocation7 + $0x270] ss:$8 sps:$4 sm:$0xff] (!%p9713_p12)   ;;  %v10090_v24 = vld [vmem:[#allocation7 + $0x94] ss:$8 sps:$4 sm:$0xff] (!%p9713_p12)  }
 0x4e1   : > { %v6901_v26 = vadd.f32 %v6900_v22, %v6860_v52  ;;  %v6941_v16 = vpop.f32.mrb[49].mxu1  ;;  %v6902_v46 = vpop.f32.mrb[50].mxu0  ;;  %v10088_v52 = vld [vmem:[#allocation7 + $0x80] ss:$8 sps:$4 sm:$0xff] (!%p9713_p12)   ;;  %8254 = vmatpush1.bf16.msra.mxu0 (!%p9713_p12), %v10083_v14  ;;  %v10094_v22 = vld [vmem:[#allocation7 + $0x90] ss:$8 sps:$4 sm:$0xff] (!%p9713_p12)  }
 0x4e2   : > { %v6940_v27 = vadd.f32 %v6939_v55, %v6899_v18  ;;  %v6943_v8 = vpop.f32.mrb[50].mxu1  ;;  %v6903_v59 = vpop.f32.mrb[51].mxu0  ;;  %v7058_v18 = vlaneseq (!%p9713_p12)  ;;  %8255 = vmatprep.subr.bf16.mxu0 (!%p9713_p12), %v10086_v19  ;;  %v10092_v55 = vld [vmem:[#allocation7 + $0x294] ss:$8 sps:$4 sm:$0xff] (!%p9713_p12)   ;;  %8174 = vmatpush1.bf16.msra.mxu1 (!%p9713_p12), %v10088_v52 }
 0x4e3   : > { %v6942_v29 = vadd.f32 %v6941_v16, %v6901_v26  ;;  %v6944_v33 = vpop.f32.mrb[51].mxu1  ;;  %v10095_v26 = vld [vmem:[#allocation7 + $0x290] ss:$8 sps:$4 sm:$0xff] (!%p9713_p12)   ;;  %v10096_v16 = vld [vmem:[#allocation7 + $0xa4] ss:$8 sps:$4 sm:$0xff] (!%p9713_p12)   ;;  %8175 = vmatprep.subr.bf16.mxu1 (!%p9713_p12), %v10090_v24 }
 0x4e4   : > { %v11875_v46 = vshrl.u32 (!%p9713_p12), %v7058_v18, 7  ;;  %v10100_v8 = vld [vmem:[#allocation7 + $0xa0] ss:$8 sps:$4 sm:$0xff] (!%p9713_p12)  }
 0x4e5   : > { %8256 = vmatpush1.bf16.msra.mxu0 (!%p9713_p12), %v10089_v43  ;;  %v10101_v59 = vld [vmem:[#allocation7 + $0x2a0] ss:$8 sps:$4 sm:$0xff] (!%p9713_p12)  }
 0x4e6   : > { %8257 = vmatprep.subr.bf16.mxu0 (!%p9713_p12), %v10092_v55  ;;  %8176 = vmatpush1.bf16.msra.mxu1 (!%p9713_p12), %v10094_v22  ;;  %v11878_v33 = vsub.s32 (!%p9713_p12), 1, %v11875_v46  ;;  %v11904_v56 = vsub.s32 (!%p9713_p12), 2, %v11875_v46  ;;  %v11907_v57 = vsub.s32 (!%p9713_p12), 6, %v11875_v46  ;;  %v10124_v43 = vld [vmem:[#allocation7 + $0xe0] ss:$8 sps:$4 sm:$0xff] (!%p9713_p12)  }
 0x4e7   : > { %8177 = vmatprep.subr.bf16.mxu1 (!%p9713_p12), %v10096_v16  ;;  %v10125_v55 = vld [vmem:[#allocation7 + $0x2e0] ss:$8 sps:$4 sm:$0xff] (!%p9713_p12)   ;;  %v10126_v22 = vld [vmem:[#allocation7 + $0xf4] ss:$8 sps:$4 sm:$0xff] (!%p9713_p12)  }
 0x4e8   : > { %v7275_v40 = vrot.slane (!%p9713_p12), %v11915_v3, %v11904_v56  ;;  %v7324_v13 = vrot.slane (!%p9713_p12), %v11919_v17, %v11904_v56  ;;  %v7291_v14 = vrot.slane (!%p9713_p12), %v11915_v3, %v11907_v57  ;;  %v7340_v28 = vrot.slane (!%p9713_p12), %v11919_v17, %v11907_v57 }
 0x4e9   : > { %8258 = vmatpush1.bf16.msra.mxu0 (!%p9713_p12), %v10095_v26 }
 0x4ea   : > { %8178 = vmatpush1.bf16.msra.mxu1 (!%p9713_p12), %v10100_v8 }
 0x51f   : > { %v6980_v31 = vpop.f32.mrb[52].mxu0 }
 0x520   : > { %v6981_v32 = vadd.f32 %v6980_v31, %v6940_v27  ;;  %v7021_v34 = vpop.f32.mrb[52].mxu1  ;;  %v6982_v35 = vpop.f32.mrb[53].mxu0  ;;  %v10098_v27 = vld [vmem:[#allocation7 + $0x2a4] ss:$8 sps:$4 sm:$0xff] (!%p9713_p12)   ;;  %v10104_v31 = vld [vmem:[#allocation7 + $0x2b4] ss:$8 sps:$4 sm:$0xff] (!%p9713_p12)  }
 0x521   : > { %v6983_v44 = vadd.f32 %v6982_v35, %v6942_v29  ;;  %v7023_v21 = vpop.f32.mrb[53].mxu1  ;;  %v6984_v36 = vpop.f32.mrb[54].mxu0  ;;  %7047 = sbr.rel (%p9713_p12) target bundleno = 2205 (0x89d), region = 88  ;;  %v10102_v29 = vld [vmem:[#allocation7 + $0xb4] ss:$8 sps:$4 sm:$0xff] (!%p9713_p12)   ;;  %8259 = vmatprep.subr.bf16.mxu0 (!%p9713_p12), %v10098_v27  ;;  %v11884_v35 = vsub.s32 (!%p9713_p12), 0, %v11875_v46 }
 0x522   : > { %v7022_v37 = vadd.f32 %v7021_v34, %v6981_v32  ;;  %v7025_v39 = vpop.f32.mrb[54].mxu1  ;;  %v6985_v45 = vpop.f32.mrb[55].mxu0  ;;  %v11881_v32 = vsub.s32 (!%p9713_p12), 5, %v11875_v46  ;;  %v10106_v34 = vld [vmem:[#allocation7 + $0xb0] ss:$8 sps:$4 sm:$0xff] (!%p9713_p12)   ;;  %v11889_v36 = vsub.s32 (!%p9713_p12), 4, %v11875_v46  ;;  %8260 = vmatpush1.bf16.msra.mxu0 (!%p9713_p12), %v10101_v59  ;;  %8179 = vmatprep.subr.bf16.mxu1 (!%p9713_p12), %v10102_v29 }
 0x523   : > { %v7024_v20 = vadd.f32 %v7023_v21, %v6983_v44  ;;  %v7026_v47 = vpop.f32.mrb[55].mxu1  ;;  %v7049_v44 = vld [vmem:[#allocation2 + $0x8] sm:$0xff] (!%p9713_p12)  ;;  %8261 = vmatprep.subr.bf16.mxu0 (!%p9713_p12), %v10104_v31  ;;  %8180 = vmatpush1.bf16.msra.mxu1 (!%p9713_p12), %v10106_v34  ;;  %v10128_v27 = vld [vmem:[#allocation7 + $0x2f4] ss:$8 sps:$4 sm:$0xff] (!%p9713_p12)   ;;  %v10130_v34 = vld [vmem:[#allocation7 + $0xf0] ss:$8 sps:$4 sm:$0xff] (!%p9713_p12)  }
 0x524   : > { %v7034_v30 = vadd.f32 %v7022_v37, %v446_v38  ;;  %v10107_v38 = vld [vmem:[#allocation7 + $0x2b0] ss:$8 sps:$4 sm:$0xff] (!%p9713_p12)   ;;  %v10108_v37 = vld [vmem:[#allocation7 + $0xc4] ss:$8 sps:$4 sm:$0xff] (!%p9713_p12)   ;;  %v10112_v47 = vld [vmem:[#allocation7 + $0xc0] ss:$8 sps:$4 sm:$0xff] (!%p9713_p12)  }
 0x525   : > { %v7035_v49 = vadd.f32 %v7024_v20, %v447_v23  ;;  %v11886_v21 = vld [vmem:[#allocation5] ss:$4 sm:$0xff] (!%p9713_p12)  ;;  %8181 = vmatprep.subr.bf16.mxu1 (!%p9713_p12), %v10108_v37 }
 0x526   : > { %7042 = vst [vmem:[#allocation2 + $0x30] sm:$0xff] %v7034_v30  ;;  %v7065_v23 = vrot.slane (!%p9713_p12), %v11886_v21, %v11878_v33  ;;  %v10110_v39 = vld [vmem:[#allocation7 + $0x2c4] ss:$8 sps:$4 sm:$0xff] (!%p9713_p12)   ;;  %v7081_v20 = vrot.slane (!%p9713_p12), %v11886_v21, %v11881_v32  ;;  %v7077_v53 = vrot.slane (!%p9713_p12), %v11886_v21, %v11889_v36  ;;  %8262 = vmatpush1.bf16.msra.mxu0 (!%p9713_p12), %v10107_v38  ;;  %v10131_v37 = vld [vmem:[#allocation7 + $0x2f0] ss:$8 sps:$4 sm:$0xff] (!%p9713_p12)  }
 0x527   : > { %7043 = vst [vmem:[#allocation2 + $0x38] sm:$0xff] %v7035_v49  ;;  %v7053_v45 = vld [vmem:[#allocation2 + $0x28] sm:$0xff] (!%p9713_p12)  ;;  %v7061_v49 = vrot.slane (!%p9713_p12), %v11886_v21, %v11884_v35  ;;  %8263 = vmatprep.subr.bf16.mxu0 (!%p9713_p12), %v10110_v39  ;;  %v7069_v10 = vrot.slane (!%p9713_p12), %v11886_v21, %v11904_v56  ;;  %8182 = vmatpush1.bf16.msra.mxu1 (!%p9713_p12), %v10112_v47  ;;  %v10201_v56 = vld [vmem:[#allocation7 + $0x3b0] ss:$8 sps:$4 sm:$0xff] (!%p9713_p12)  }
 0x528   : > { %v11895_v30 = vadd.f32 %v7065_v23, %v7049_v44  ;;  %v11899_v25 = vadd.f32 %v7081_v20, %v7053_v45  ;;  %v11913_v2 = vadd.f32 %v7077_v53, %v7052_v54  ;;  %v7085_v50 = vrot.slane %v11886_v21, %v11907_v57  ;;  %8183 = vmatprep.subr.bf16.mxu1 %v10114_v61  ;;  %v10134_v39 = vld [vmem:[#allocation7 + $0x104] ss:$8 sps:$4 sm:$0xff]   ;;  %v10207_v57 = vld [vmem:[#allocation7 + $0x3c0] ss:$8 sps:$4 sm:$0xff]  }
 0x529   : > { %v11910_v63 = vadd.f32 %v7061_v49, %v7048_v48  ;;  %v10137_v47 = vld [vmem:[#allocation7 + $0x304] ss:$8 sps:$4 sm:$0xff]  }
 0x52a   : > { %v7116_v62 = vrot.slane %v11895_v30, 4  ;;  %v7140_v1 = vrot.slane %v11899_v25, 4  ;;  %v7134_v7 = vrot.slane %v11913_v2, 4  ;;  %8264 = vmatpush1.bf16.msra.mxu0 %v10113_v58 }
 0x52b   : > { %v7110_v6 = vrot.slane %v11910_v63, 4  ;;  %8265 = vmatprep.subr.bf16.mxu0 %v10116_v0  ;;  %8184 = vmatpush1.bf16.msra.mxu1 %v10118_v41 }
 0x52c   : > { %v7117_v4 = vadd.f32 %v7116_v62, %v11895_v30  ;;  %v7141_v5 = vadd.f32 %v7140_v1, %v11899_v25  ;;  %v7135_v15 = vadd.f32 %v7134_v7, %v11913_v2  ;;  %8185 = vmatprep.subr.bf16.mxu1 %v10120_v12 }
 0x52d   : > { %v7111_v42 = vadd.f32 %v7110_v6, %v11910_v63 }
 0x52e   : > { %v7118_v9 = vrot.slane %v7117_v4, 2  ;;  %v7142_v51 = vrot.slane %v7141_v5, 2  ;;  %v7136_v18 = vrot.slane %v7135_v15, 2  ;;  %8266 = vmatpush1.bf16.msra.mxu0 %v10119_v11 }
 0x52f   : > { %v7112_v52 = vrot.slane %v7111_v42, 2  ;;  %8267 = vmatprep.subr.bf16.mxu0 %v10122_v60  ;;  %8186 = vmatpush1.bf16.msra.mxu1 %v10124_v43 }
 0x530   : > { %v7119_v19 = vadd.f32 %v7118_v9, %v7117_v4  ;;  %v7143_v24 = vadd.f32 %v7142_v51, %v7141_v5  ;;  %v7137_v59 = vadd.f32 %v7136_v18, %v7135_v15  ;;  %8187 = vmatprep.subr.bf16.mxu1 %v10126_v22 }
 0x531   : > { %v7113_v16 = vadd.f32 %v7112_v52, %v7111_v42 }
 0x532   : > { %v7120_v26 = vrot.slane %v7119_v19, 1  ;;  %v7144_v8 = vrot.slane %v7143_v24, 1  ;;  %v7138_v44 = vrot.slane %v7137_v59, 1  ;;  %8268 = vmatpush1.bf16.msra.mxu0 %v10125_v55 }
 0x533   : > { %v7114_v31 = vrot.slane %v7113_v16, 1  ;;  %8269 = vmatprep.subr.bf16.mxu0 %v10128_v27  ;;  %8188 = vmatpush1.bf16.msra.mxu1 %v10130_v34 }
 0x534   : > { %v7121_v29 = vadd.f32 %v7120_v26, %v7119_v19  ;;  %v7145_v38 = vadd.f32 %v7144_v8, %v7143_v24  ;;  %v7139_v49 = vadd.f32 %v7138_v44, %v7137_v59  ;;  %8198 = vmatprep.subr.bf16.mxu1 %v10134_v39  ;;  %v11958_v44 = vsub.s32 3, %v11875_v46 }
 0x535   : > { %v7115_v45 = vadd.f32 %v7114_v31, %v7113_v16 }
 0x536   : > { %v7160_v23 = vmul.f32 0.125, %v7121_v29  ;;  %v7164_v20 = vmul.f32 0.125, %v7145_v38  ;;  %v7163_v58 = vmul.f32 0.125, %v7139_v49  ;;  %8270 = vmatpush1.bf16.msra.mxu0 %v10131_v37  ;;  %v11961_v37 = vsub.s32 7, %v11875_v46  ;;  %v7055_v49 = vld [vmem:[#allocation2 + $0x38] sm:$0xff]  ;;  %v7050_v46 = vld [vmem:[#allocation2 + $0x10] sm:$0xff] }
 0x537   : > { %v7159_v54 = vmul.f32 0.125, %v7115_v45  ;;  %8280 = vmatprep.subr.bf16.mxu0 %v10137_v47  ;;  %v7073_v45 = vrot.slane %v11886_v21, %v11958_v44  ;;  %v7051_v47 = vld [vmem:[#allocation2 + $0x18] sm:$0xff] }
 0x538   : > { %v11938_v48 = vsub.f32 %v11895_v30, %v7160_v23  ;;  %v11941_v53 = vsub.f32 %v11899_v25, %v7164_v20  ;;  %v11951_v30 = vsub.f32 %v11913_v2, %v7163_v58  ;;  %v7089_v20 = vrot.slane %v11886_v21, %v11961_v37 }
 0x539   : > { %v11946_v62 = vsub.f32 %v11910_v63, %v7159_v54  ;;  %v11967_v54 = vadd.f32 %v7073_v45, %v7051_v47 }
 0x53a   : > { %v7176_v61 = vmul.f32 %v11938_v48, %v11938_v48  ;;  %v7180_v0 = vmul.f32 %v11941_v53, %v11941_v53  ;;  %v7179_v6 = vmul.f32 %v11951_v30, %v11951_v30  ;;  %v11969_v58 = vadd.f32 %v7089_v20, %v7055_v49 }
 0x53b   : > { %v7175_v25 = vmul.f32 %v11946_v62, %v11946_v62 }
 0x53c   : > { %v7189_v1 = vrot.slane %v7176_v61, 4  ;;  %v7213_v4 = vrot.slane %v7180_v0, 4  ;;  %v7207_v7 = vrot.slane %v7179_v6, 4 }
 0x53d   : > { %v7183_v5 = vrot.slane %v7175_v25, 4 }
 0x53e   : > { %v7190_v41 = vadd.f32 %v7189_v1, %v7176_v61  ;;  %v7214_v63 = vadd.f32 %v7213_v4, %v7180_v0  ;;  %v7208_v42 = vadd.f32 %v7207_v7, %v7179_v6  ;;  %v7054_v61 = vld [vmem:[#allocation2 + $0x30] sm:$0xff]  ;;  %v7271_v0 = vrot.slane %v11915_v3, %v11878_v33 }
 0x53f   : > { %v7184_v12 = vadd.f32 %v7183_v5, %v7175_v25  ;;  %v7320_v1 = vrot.slane %v11919_v17, %v11878_v33  ;;  %v11978_v25 = vadd.f32 %v7069_v10, %v7050_v46  ;;  %v11983_v4 = vadd.f32 %v7085_v50, %v7054_v61 }
 0x540   : > { %v7191_v11 = vrot.slane %v7190_v41, 2  ;;  %v7215_v9 = vrot.slane %v7214_v63, 2  ;;  %v7209_v15 = vrot.slane %v7208_v42, 2  ;;  %v7287_v6 = vrot.slane %v11915_v3, %v11881_v32 }
 0x541   : > { %v7185_v51 = vrot.slane %v7184_v12, 2  ;;  %v7128_v5 = vrot.slane %v11967_v54, 4  ;;  %v7267_v10 = vrot.slane %v11915_v3, %v11884_v35  ;;  %v7122_v21 = vrot.slane %v11978_v25, 4 }
 0x542   : > { %v7192_v60 = vadd.f32 %v7191_v11, %v7190_v41  ;;  %v7216_v2 = vadd.f32 %v7215_v9, %v7214_v63  ;;  %v7210_v24 = vadd.f32 %v7209_v15, %v7208_v42  ;;  %v7336_v41 = vrot.slane %v11919_v17, %v11881_v32 }
 0x543   : > { %v7186_v52 = vadd.f32 %v7185_v51, %v7184_v12  ;;  %v7152_v63 = vrot.slane %v11969_v58, 4  ;;  %v7316_v11 = vrot.slane %v11919_v17, %v11884_v35  ;;  %v7146_v50 = vrot.slane %v11983_v4, 4 }
 0x544   : > { %v7193_v19 = vrot.slane %v7192_v60, 1  ;;  %v7217_v43 = vrot.slane %v7216_v2, 1  ;;  %v7211_v26 = vrot.slane %v7210_v24, 1  ;;  %v7283_v32 = vrot.slane %v11915_v3, %v11889_v36 }
 0x545   : > { %v7187_v55 = vrot.slane %v7186_v52, 1  ;;  %v7129_v42 = vadd.f32 %v7128_v5, %v11967_v54  ;;  %v7332_v15 = vrot.slane %v11919_v17, %v11889_v36 }
 0x546   : > { %v7194_v18 = vadd.f32 %v7193_v19, %v7192_v60  ;;  %v7218_v22 = vadd.f32 %v7217_v43, %v7216_v2  ;;  %v7212_v59 = vadd.f32 %v7211_v26, %v7210_v24  ;;  %v7153_v60 = vadd.f32 %v7152_v63, %v11969_v58 }
 0x547   : > { %v7188_v27 = vadd.f32 %v7187_v55, %v7186_v52  ;;  %v7123_v19 = vadd.f32 %v7122_v21, %v11978_v25  ;;  %v7147_v52 = vadd.f32 %v7146_v50, %v11983_v4 }
 0x548   : > { %v7232_v16 = vmul.f32 0.125, %v7194_v18  ;;  %v7236_v8 = vmul.f32 0.125, %v7218_v22  ;;  %v7235_v38 = vmul.f32 0.125, %v7212_v59  ;;  %v7130_v18 = vrot.slane %v7129_v42, 2 }
 0x549   : > { %v7231_v31 = vmul.f32 0.125, %v7188_v27  ;;  %v7154_v55 = vrot.slane %v7153_v60, 2  ;;  %v7148_v27 = vrot.slane %v7147_v52, 2 }
 0x54a   : > { %v7240_v29 = vadd.f32 1e-05, %v7232_v16  ;;  %v7244_v34 = vadd.f32 1e-05, %v7236_v8  ;;  %v7243_v39 = vadd.f32 1e-05, %v7235_v38  ;;  %v7131_v59 = vadd.f32 %v7130_v18, %v7129_v42 }
 0x54b   : > { %v7239_v23 = vadd.f32 1e-05, %v7231_v31  ;;  %v7124_v16 = vrot.slane %v7123_v19, 2  ;;  %v7149_v38 = vadd.f32 %v7148_v27, %v7147_v52  ;;  %v10138_v42 = vld [vmem:[#allocation7 + $0x110] ss:$8 sps:$4 sm:$0xff]  }
 0x54c   : > { %10248 = vrsqrt.f32 %v7240_v29  ;;  %v7155_v29 = vadd.f32 %v7154_v55, %v7153_v60  ;;  %v7132_v45 = vrot.slane %v7131_v59, 1  ;;  %v10147_v27 = vld [vmem:[#allocation7 + $0x320] ss:$8 sps:$4 sm:$0xff]  }
 0x54d   : > { %10250 = vrsqrt.f32 %v7244_v34  ;;  %v7125_v34 = vadd.f32 %v7124_v16, %v7123_v19  ;;  %v7150_v61 = vrot.slane %v7149_v38, 1 }
 0x54e   : > { %10252 = vrsqrt.f32 %v7239_v23  ;;  %v7156_v20 = vrot.slane %v7155_v29, 1  ;;  %v7133_v5 = vadd.f32 %v7132_v45, %v7131_v59 }
 0x54f   : > { %10254 = vrsqrt.f32 %v7243_v39  ;;  %v7126_v46 = vrot.slane %v7125_v34, 1  ;;  %v7151_v50 = vadd.f32 %v7150_v61, %v7149_v38 }
 0x550   : > { %v7157_v63 = vadd.f32 %v7156_v20, %v7155_v29  ;;  %v10155_v29 = vld [vmem:[#allocation7 + $0x334] ss:$8 sps:$4 sm:$0xff]   ;;  %v10153_v20 = vld [vmem:[#allocation7 + $0x330] ss:$8 sps:$4 sm:$0xff]  }
 0x551   : > { %v7127_v21 = vadd.f32 %v7126_v46, %v7125_v34  ;;  %v10161_v46 = vld [vmem:[#allocation7 + $0x344] ss:$8 sps:$4 sm:$0xff]  }
 0x553   : > { %v7161_v60 = vmul.f32 0.125, %v7127_v21 }
 0x555   : > { %v12016_v19 = vsub.f32 %v11978_v25, %v7161_v60  ;;  %v10165_v60 = vld [vmem:[#allocation7 + $0x350] ss:$8 sps:$4 sm:$0xff]  }
 0x556   : > { %v10249_v7 = vpop.eup %10248 }
 0x557   : > { %v10251_v12 = vpop.eup %10250  ;;  %v7256_v9 = vmul.f32 %v10249_v7, %v11938_v48  ;;  %v7177_v18 = vmul.f32 %v12016_v19, %v12016_v19 }
 0x558   : > { %v10253_v51 = vpop.eup %10252  ;;  %v7260_v2 = vmul.f32 %v10251_v12, %v11941_v53  ;;  %v7162_v12 = vmul.f32 0.125, %v7133_v5 }
 0x559   : > { %v10255_v43 = vpop.eup %10254  ;;  %v7305_v24 = vmul.f32 %v7271_v0, %v7256_v9  ;;  %v7255_v48 = vmul.f32 %v10253_v51, %v11946_v62  ;;  %v10132_v62 = vld [vmem:[#allocation7 + $0x100] ss:$8 sps:$4 sm:$0xff]   ;;  %v7166_v9 = vmul.f32 0.125, %v7157_v63  ;;  %v7165_v51 = vmul.f32 0.125, %v7151_v50  ;;  %v10167_v50 = vld [vmem:[#allocation7 + $0x354] ss:$8 sps:$4 sm:$0xff]  }
 0x55a   : > { %v7309_v22 = vmul.f32 %v7287_v6, %v7260_v2  ;;  %v7259_v26 = vmul.f32 %v10255_v43, %v11951_v30  ;;  %v10135_v0 = vld [vmem:[#allocation7 + $0x300] ss:$8 sps:$4 sm:$0xff]   ;;  %v12010_v2 = vsub.f32 %v11967_v54, %v7162_v12  ;;  %v10141_v43 = vld [vmem:[#allocation7 + $0x310] ss:$8 sps:$4 sm:$0xff]  }
 0x55b   : > { %v7354_v8 = vadd.f32 %v7320_v1, %v7305_v24  ;;  %v7304_v53 = vmul.f32 %v7267_v10, %v7255_v48  ;;  %v10140_v1 = vld [vmem:[#allocation7 + $0x114] ss:$8 sps:$4 sm:$0xff]   ;;  %v12019_v52 = vsub.f32 %v11983_v4, %v7165_v51  ;;  %v10146_v24 = vld [vmem:[#allocation7 + $0x124] ss:$8 sps:$4 sm:$0xff]  }
 0x55c   : > { %v7358_v36 = vadd.f32 %v7336_v41, %v7309_v22  ;;  %v7308_v31 = vmul.f32 %v7283_v32, %v7259_v26  ;;  %v10143_v10 = vld [vmem:[#allocation7 + $0x314] ss:$8 sps:$4 sm:$0xff]   ;;  %v7178_v48 = vmul.f32 %v12010_v2, %v12010_v2  ;;  %v10144_v22 = vld [vmem:[#allocation7 + $0x120] ss:$8 sps:$4 sm:$0xff]   ;;  %v7195_v26 = vrot.slane %v7177_v18, 4 }
 0x55d   : > { %v7362_v23 = vmax.f32 %v7354_v8, 0.0  ;;  %v7353_v39 = vadd.f32 %v7316_v11, %v7304_v53  ;;  %v7181_v25 = vmul.f32 %v12019_v52, %v12019_v52  ;;  %v10152_v8 = vld [vmem:[#allocation7 + $0x134] ss:$8 sps:$4 sm:$0xff]  }
 0x55e   : > { %v7366_v47 = vmax.f32 %v7358_v36, 0.0  ;;  %v7357_v49 = vadd.f32 %v7332_v15, %v7308_v31  ;;  %v12013_v15 = vsub.f32 %v11969_v58, %v7166_v9  ;;  %v10149_v58 = vld [vmem:[#allocation7 + $0x324] ss:$8 sps:$4 sm:$0xff]   ;;  %v7201_v4 = vrot.slane %v7178_v48, 4 }
 0x55f   : > { %v7370_v30 = vpack.c.bf16 %v7362_v23, %v7362_v23  ;;  %v7361_v6 = vmax.f32 %v7353_v39, 0.0  ;;  %v7219_v16 = vrot.slane %v7181_v25, 4  ;;  %v7196_v36 = vadd.f32 %v7195_v26, %v7177_v18  ;;  %v10150_v23 = vld [vmem:[#allocation7 + $0x130] ss:$8 sps:$4 sm:$0xff]   ;;  %v10179_v26 = vld [vmem:[#allocation7 + $0x374] ss:$8 sps:$4 sm:$0xff]  }
 0x560   : > { %v7374_v7 = vpack.c.bf16 %v7366_v47, %v7366_v47  ;;  %v7365_v41 = vmax.f32 %v7357_v49, 0.0  ;;  %v7182_v54 = vmul.f32 %v12013_v15, %v12013_v15  ;;  %v7202_v53 = vadd.f32 %v7201_v4, %v7178_v48  ;;  %v10168_v4 = vld [vmem:[#allocation7 + $0x160] ss:$8 sps:$4 sm:$0xff]  }
 0x561   : > { %8189 = vmatprep.mubr.bf16.mxu1 %v7370_v30  ;;  %v7369_v11 = vpack.c.bf16 %v7361_v6, %v7361_v6  ;;  %v7220_v31 = vadd.f32 %v7219_v16, %v7181_v25  ;;  %v7197_v39 = vrot.slane %v7196_v36, 2  ;;  %v10174_v16 = vld [vmem:[#allocation7 + $0x170] ss:$8 sps:$4 sm:$0xff]  }
 0x562   : > { %8271 = vmatprep.mubr.bf16.mxu0 %v7374_v7  ;;  %v7373_v32 = vpack.c.bf16 %v7365_v41, %v7365_v41  ;;  %v7225_v55 = vrot.slane %v7182_v54, 4  ;;  %v7203_v34 = vrot.slane %v7202_v53, 2  ;;  %v10159_v7 = vld [vmem:[#allocation7 + $0x340] ss:$8 sps:$4 sm:$0xff]   ;;  %v10164_v41 = vld [vmem:[#allocation7 + $0x154] ss:$8 sps:$4 sm:$0xff]  }
 0x563   : > { %8190 = vmatmul.mubr.bf16.vlgmr.msra.gmra.mrb[0].mxu1 %v7369_v11  ;;  %v7221_v45 = vrot.slane %v7220_v31, 2  ;;  %v7198_v61 = vadd.f32 %v7197_v39, %v7196_v36  ;;  %v10191_v39 = vld [vmem:[#allocation7 + $0x394] ss:$8 sps:$4 sm:$0xff]  }
 0x564   : > { %8199 = vmatpush1.bf16.msra.mxu1 %v10132_v62  ;;  %8272 = vmatmul.mubr.bf16.vlgmr.msra.gmra.mrb[0].mxu0 %v7373_v32  ;;  %v7226_v59 = vadd.f32 %v7225_v55, %v7182_v54  ;;  %v10158_v62 = vld [vmem:[#allocation7 + $0x144] ss:$8 sps:$4 sm:$0xff]   ;;  %v7204_v47 = vadd.f32 %v7203_v34, %v7202_v53  ;;  %v10171_v55 = vld [vmem:[#allocation7 + $0x360] ss:$8 sps:$4 sm:$0xff]   ;;  %v10188_v34 = vld [vmem:[#allocation7 + $0x194] ss:$8 sps:$4 sm:$0xff]  }
 0x565   : > { %8281 = vmatpush1.bf16.msra.mxu0 %v10135_v0  ;;  %8200 = vmatprep.subr.bf16.mxu1 %v10140_v1  ;;  %v7222_v30 = vadd.f32 %v7221_v45, %v7220_v31  ;;  %v10156_v1 = vld [vmem:[#allocation7 + $0x140] ss:$8 sps:$4 sm:$0xff]   ;;  %v7199_v5 = vrot.slane %v7198_v61, 1  ;;  %v10185_v53 = vld [vmem:[#allocation7 + $0x384] ss:$8 sps:$4 sm:$0xff]  }
 0x566   : > { %8282 = vmatprep.subr.bf16.mxu0 %v10143_v10  ;;  %v7227_v38 = vrot.slane %v7226_v59, 2  ;;  %v7205_v0 = vrot.slane %v7204_v47, 1  ;;  %v10183_v31 = vld [vmem:[#allocation7 + $0x380] ss:$8 sps:$4 sm:$0xff]  }
 0x567   : > { %v7223_v63 = vrot.slane %v7222_v30, 1  ;;  %v7200_v11 = vadd.f32 %v7199_v5, %v7198_v61  ;;  %v10186_v61 = vld [vmem:[#allocation7 + $0x190] ss:$8 sps:$4 sm:$0xff]  }
 0x568   : > { %8201 = vmatpush1.bf16.msra.mxu1 %v10138_v42  ;;  %v7228_v49 = vadd.f32 %v7227_v38, %v7226_v59  ;;  %v7206_v10 = vadd.f32 %v7205_v0, %v7204_v47  ;;  %v10162_v42 = vld [vmem:[#allocation7 + $0x150] ss:$8 sps:$4 sm:$0xff]   ;;  %v10180_v59 = vld [vmem:[#allocation7 + $0x180] ss:$8 sps:$4 sm:$0xff]   ;;  %v7295_v38 = vrot.slane %v11915_v3, %v11961_v37 }
 0x569   : > { %8283 = vmatpush1.bf16.msra.mxu0 %v10141_v43  ;;  %8202 = vmatprep.subr.bf16.mxu1 %v10146_v24  ;;  %v7224_v12 = vadd.f32 %v7223_v63, %v7222_v30  ;;  %v7233_v51 = vmul.f32 0.125, %v7200_v11  ;;  %v10170_v24 = vld [vmem:[#allocation7 + $0x164] ss:$8 sps:$4 sm:$0xff]   ;;  %v10203_v11 = vld [vmem:[#allocation7 + $0x3b4] ss:$8 sps:$4 sm:$0xff]  }
 0x56a   : > { %8284 = vmatprep.subr.bf16.mxu0 %v10149_v58  ;;  %v7229_v6 = vrot.slane %v7228_v49, 1  ;;  %v7234_v9 = vmul.f32 0.125, %v7206_v10  ;;  %v10173_v58 = vld [vmem:[#allocation7 + $0x364] ss:$8 sps:$4 sm:$0xff]  }
 0x56b   : > { %v7237_v43 = vmul.f32 0.125, %v7224_v12  ;;  %v7241_v18 = vadd.f32 1e-05, %v7233_v51  ;;  %v10198_v12 = vld [vmem:[#allocation7 + $0x1b0] ss:$8 sps:$4 sm:$0xff]  }
 0x56c   : > { %8203 = vmatpush1.bf16.msra.mxu1 %v10144_v22  ;;  %v7230_v21 = vadd.f32 %v7229_v6, %v7228_v49  ;;  %v7242_v48 = vadd.f32 1e-05, %v7234_v9  ;;  %v10176_v22 = vld [vmem:[#allocation7 + $0x174] ss:$8 sps:$4 sm:$0xff]   ;;  %v7344_v49 = vrot.slane %v11919_v17, %v11961_v37  ;;  %v10189_v6 = vld [vmem:[#allocation7 + $0x390] ss:$8 sps:$4 sm:$0xff]  }
 0x56d   : > { %8285 = vmatpush1.bf16.msra.mxu0 %v10147_v27  ;;  %8204 = vmatprep.subr.bf16.mxu1 %v10152_v8  ;;  %v7245_v25 = vadd.f32 1e-05, %v7237_v43  ;;  %v10177_v27 = vld [vmem:[#allocation7 + $0x370] ss:$8 sps:$4 sm:$0xff]   ;;  %v10182_v8 = vld [vmem:[#allocation7 + $0x184] ss:$8 sps:$4 sm:$0xff]  }
 0x56e   : > { %8286 = vmatprep.subr.bf16.mxu0 %v10155_v29  ;;  %v7238_v32 = vmul.f32 0.125, %v7230_v21  ;;  %10256 = vrsqrt.f32 %v7242_v48  ;;  %v7279_v29 = vrot.slane %v11915_v3, %v11958_v44  ;;  %v10200_v21 = vld [vmem:[#allocation7 + $0x1b4] ss:$8 sps:$4 sm:$0xff]   ;;  %v10209_v9 = vld [vmem:[#allocation7 + $0x3c4] ss:$8 sps:$4 sm:$0xff]  }
 0x56f   : > { %v10218_v51 = vld [vmem:[#allocation7 + $0x1e4] ss:$8 sps:$4 sm:$0xff]   ;;  %v10219_v48 = vld [vmem:[#allocation7 + $0x3e0] ss:$8 sps:$4 sm:$0xff]  }
 0x570   : > { %8205 = vmatpush1.bf16.msra.mxu1 %v10150_v23  ;;  %v7246_v54 = vadd.f32 1e-05, %v7238_v32  ;;  %v10204_v32 = vld [vmem:[#allocation7 + $0x1c0] ss:$8 sps:$4 sm:$0xff]   ;;  %v10221_v43 = vld [vmem:[#allocation7 + $0x3e4] ss:$8 sps:$4 sm:$0xff]  }
 0x571   : > { %8287 = vmatpush1.bf16.msra.mxu0 %v10153_v20  ;;  %8206 = vmatprep.subr.bf16.mxu1 %v10158_v62  ;;  %v7328_v20 = vrot.slane %v11919_v17, %v11958_v44  ;;  %v10197_v44 = vld [vmem:[#allocation7 + $0x3a4] ss:$8 sps:$4 sm:$0xff]   ;;  %v10212_v17 = vld [vmem:[#allocation7 + $0x1d4] ss:$8 sps:$4 sm:$0xff]  }
 0x572   : > { %8288 = vmatprep.subr.bf16.mxu0 %v10161_v46  ;;  %10258 = vrsqrt.f32 %v7246_v54  ;;  %v10224_v54 = vld [vmem:[#allocation7 + $0x1f4] ss:$8 sps:$4 sm:$0xff]  }
 0x573   : > { %10260 = vrsqrt.f32 %v7241_v18 }
 0x574   : > { %8207 = vmatpush1.bf16.msra.mxu1 %v10156_v1  ;;  %10262 = vrsqrt.f32 %v7245_v25  ;;  %v10194_v1 = vld [vmem:[#allocation7 + $0x1a4] ss:$8 sps:$4 sm:$0xff]   ;;  %v10222_v25 = vld [vmem:[#allocation7 + $0x1f0] ss:$8 sps:$4 sm:$0xff]  }
 0x575   : > { %8289 = vmatpush1.bf16.msra.mxu0 %v10159_v7  ;;  %8208 = vmatprep.subr.bf16.mxu1 %v10164_v41 }
 0x576   : > { %8290 = vmatprep.subr.bf16.mxu0 %v10167_v50 }
 0x578   : > { %8209 = vmatpush1.bf16.msra.mxu1 %v10162_v42  ;;  %v10257_v36 = vpop.eup %10256  ;;  %v10210_v42 = vld [vmem:[#allocation7 + $0x1d0] ss:$8 sps:$4 sm:$0xff]  }
 0x579   : > { %8291 = vmatpush1.bf16.msra.mxu0 %v10165_v60  ;;  %8210 = vmatprep.subr.bf16.mxu1 %v10170_v24  ;;  %v7258_v45 = vmul.f32 %v10257_v36, %v12010_v2  ;;  %v10213_v60 = vld [vmem:[#allocation7 + $0x3d0] ss:$8 sps:$4 sm:$0xff]   ;;  %v10216_v24 = vld [vmem:[#allocation7 + $0x1e0] ss:$8 sps:$4 sm:$0xff]  }
 0x57a   : > { %8292 = vmatprep.subr.bf16.mxu0 %v10173_v58  ;;  %v10227_v58 = vld [vmem:[#allocation7 + $0x3f4] ss:$8 sps:$4 sm:$0xff]  }
 0x57b   : > { %v7307_v30 = vmul.f32 %v7279_v29, %v7258_v45  ;;  %v10233_v29 = vld [vmem:[%s12143_s5 + $0x10] sm:$0xff]   ;;  %v10234_v36 = vld [vmem:[%s12143_s5 + $0x58] sm:$0xff]  }
 0x57c   : > { %8211 = vmatpush1.bf16.msra.mxu1 %v10168_v4  ;;  %v10259_v23 = vpop.eup %10258  ;;  %v10240_v45 = vld [vmem:[%s12143_s5 + $0x70] sm:$0xff]  }
 0x57d   : > { %8293 = vmatpush1.bf16.msra.mxu0 %v10171_v55  ;;  %8212 = vmatprep.subr.bf16.mxu1 %v10176_v22  ;;  %v10261_v62 = vpop.eup %10260  ;;  %v7262_v47 = vmul.f32 %v10259_v23, %v12013_v15  ;;  %v7356_v63 = vadd.f32 %v7328_v20, %v7307_v30  ;;  %v10225_v55 = vld [vmem:[#allocation7 + $0x3f0] ss:$8 sps:$4 sm:$0xff]   ;;  %v10238_v23 = vld [vmem:[%s12143_s5 + $0x68] sm:$0xff]  }
 0x57e   : > { %8294 = vmatprep.subr.bf16.mxu0 %v10179_v26  ;;  %v10263_v46 = vpop.eup %10262  ;;  %v7257_v0 = vmul.f32 %v10261_v62, %v12016_v19  ;;  %v10192_v19 = vld [vmem:[#allocation7 + $0x1a0] ss:$8 sps:$4 sm:$0xff]   ;;  %v10241_v20 = vld [vmem:[%s12143_s5 + $0x30] sm:$0xff]   ;;  %v10242_v62 = vld [vmem:[%s12143_s5 + $0x78] sm:$0xff]  }
 0x57f   : > { %v7311_v2 = vmul.f32 %v7295_v38, %v7262_v47  ;;  %v7261_v5 = vmul.f32 %v10263_v46, %v12019_v52  ;;  %v7364_v41 = vmax.f32 %v7356_v63, 0.0  ;;  %v10195_v52 = vld [vmem:[#allocation7 + $0x3a0] ss:$8 sps:$4 sm:$0xff]   ;;  %v10243_v47 = vld [vmem:[%s12143_s5 + $0x38] sm:$0xff]  }
 0x580   : > { %8213 = vmatpush1.bf16.msra.mxu1 %v10174_v16  ;;  %v7306_v37 = vmul.f32 %v7275_v40, %v7257_v0  ;;  %v10228_v16 = vld [vmem:[%s12143_s5 + $0x40] sm:$0xff]  }
 0x581   : > { %8295 = vmatpush1.bf16.msra.mxu0 %v10177_v27  ;;  %8214 = vmatprep.subr.bf16.mxu1 %v10182_v8  ;;  %v7360_v15 = vadd.f32 %v7344_v49, %v7311_v2  ;;  %v7310_v7 = vmul.f32 %v7291_v14, %v7261_v5  ;;  %v7372_v3 = vpack.c.bf16 %v7364_v41, %v7364_v41  ;;  %v10229_v27 = vld [vmem:[%s12143_s5] sm:$0xff]   ;;  %v10230_v8 = vld [vmem:[%s12143_s5 + $0x48] sm:$0xff]  }
 0x582   : > { %8296 = vmatprep.subr.bf16.mxu0 %v10185_v53  ;;  %v7355_v10 = vadd.f32 %v7324_v13, %v7306_v37  ;;  %v10206_v13 = vld [vmem:[#allocation7 + $0x1c4] ss:$8 sps:$4 sm:$0xff]  }
 0x583   : > { %v7368_v50 = vmax.f32 %v7360_v15, 0.0  ;;  %v7359_v40 = vadd.f32 %v7340_v28, %v7310_v7  ;;  %8230 = vmatprep.mubr.bf16.mxu1 %v7372_v3  ;;  %v10215_v28 = vld [vmem:[#allocation7 + $0x3d4] ss:$8 sps:$4 sm:$0xff]   ;;  %v10231_v53 = vld [vmem:[%s12143_s5 + $0x8] sm:$0xff]   ;;  %v10237_v38 = vld [vmem:[%s12143_s5 + $0x20] sm:$0xff]  }
 0x584   : > { %8215 = vmatpush1.bf16.msra.mxu1 %v10180_v59  ;;  %v7363_v18 = vmax.f32 %v7355_v10, 0.0  ;;  %v10232_v59 = vld [vmem:[%s12143_s5 + $0x50] sm:$0xff]   ;;  %v7505_v49 = vld [vmem:[#allocation8] ss:$4 sm:$0x3] }
 0x585   : > { %8297 = vmatpush1.bf16.msra.mxu0 %v10183_v31  ;;  %8216 = vmatprep.subr.bf16.mxu1 %v10188_v34  ;;  %v7376_v14 = vpack.c.bf16 %v7368_v50, %v7368_v50  ;;  %v7367_v4 = vmax.f32 %v7359_v40, 0.0  ;;  %v10235_v31 = vld [vmem:[%s12143_s5 + $0x18] sm:$0xff]   ;;  %v10236_v34 = vld [vmem:[%s12143_s5 + $0x60] sm:$0xff]   ;;  %v7510_v46 = vrot.slane %v7505_v49, %v11884_v35 }
 0x586   : > { %8298 = vmatprep.subr.bf16.mxu0 %v10191_v39  ;;  %v7371_v22 = vpack.c.bf16 %v7363_v18, %v7363_v18  ;;  %v10239_v39 = vld [vmem:[%s12143_s5 + $0x28] sm:$0xff]  }
 0x587   : > { %8312 = vmatprep.mubr.bf16.mxu0 %v7376_v14  ;;  %v7375_v26 = vpack.c.bf16 %v7367_v4, %v7367_v4 }
 0x588   : > { %8217 = vmatpush1.bf16.msra.mxu1 %v10186_v61  ;;  %v7514_v61 = vrot.slane %v7505_v49, %v11878_v33 }
 0x589   : > { %8299 = vmatpush1.bf16.msra.mxu0 %v10189_v6  ;;  %8218 = vmatprep.subr.bf16.mxu1 %v10194_v1 }
 0x58a   : > { %8300 = vmatprep.subr.bf16.mxu0 %v10197_v44 }
 0x58c   : > { %8219 = vmatpush1.bf16.msra.mxu1 %v10192_v19 }
 0x58d   : > { %8301 = vmatpush1.bf16.msra.mxu0 %v10195_v52  ;;  %8220 = vmatprep.subr.bf16.mxu1 %v10200_v21 }
 0x58e   : > { %8302 = vmatprep.subr.bf16.mxu0 %v10203_v11 }
 0x590   : > { %8221 = vmatpush1.bf16.msra.mxu1 %v10198_v12 }
 0x591   : > { %8303 = vmatpush1.bf16.msra.mxu0 %v10201_v56  ;;  %8222 = vmatprep.subr.bf16.mxu1 %v10206_v13 }
 0x592   : > { %8304 = vmatprep.subr.bf16.mxu0 %v10209_v9 }
 0x594   : > { %8223 = vmatpush1.bf16.msra.mxu1 %v10204_v32 }
 0x595   : > { %8305 = vmatpush1.bf16.msra.mxu0 %v10207_v57  ;;  %8224 = vmatprep.subr.bf16.mxu1 %v10212_v17 }
 0x596   : > { %8306 = vmatprep.subr.bf16.mxu0 %v10215_v28 }
 0x598   : > { %8225 = vmatpush1.bf16.msra.mxu1 %v10210_v42 }
 0x599   : > { %8307 = vmatpush1.bf16.msra.mxu0 %v10213_v60  ;;  %8226 = vmatprep.subr.bf16.mxu1 %v10218_v51 }
 0x59a   : > { %8308 = vmatprep.subr.bf16.mxu0 %v10221_v43 }
 0x59c   : > { %8227 = vmatpush1.bf16.msra.mxu1 %v10216_v24 }
 0x59d   : > { %8309 = vmatpush1.bf16.msra.mxu0 %v10219_v48  ;;  %8228 = vmatprep.subr.bf16.mxu1 %v10224_v54 }
 0x59e   : > { %8310 = vmatprep.subr.bf16.mxu0 %v10227_v58 }
 0x5a0   : > { %8229 = vmatpush1.bf16.msra.mxu1 %v10222_v25 }
 0x5a1   : > { %8311 = vmatpush1.bf16.msra.mxu0 %v10225_v55 }
 0x5a2   : > { %9872 = vmatprep.subr.bf16.mxu0 %v10228_v16 }
 0x5a3   : > { %8231 = vmatmul.mubr.bf16.vlgmr.msra.gmra.mrb[0].mxu1 %v7371_v22 }
 0x5a4   : > { %8313 = vmatmul.mubr.bf16.vlgmr.msra.gmra.mrb[0].mxu0 %v7375_v26 }
 0x5a5   : > { %9873 = vmatpush3.bf16.msra.mxu0 %v10229_v27 }
 0x5a6   : > { %9874 = vmatprep.subr.bf16.mxu0 %v10230_v8 }
 0x5a9   : > { %9875 = vmatpush3.bf16.msra.mxu0 %v10231_v53  ;;  %v8322_v53 = vld [vmem:[#allocation8 + $0x1] ss:$4 sm:$0x3] }
 0x5aa   : > { %9876 = vmatprep.subr.bf16.mxu0 %v10232_v59  ;;  %v8324_v59 = vld [vmem:[#allocation8 + $0x2] ss:$4 sm:$0x3] }
 0x5ad   : > { %9877 = vmatpush3.bf16.msra.mxu0 %v10233_v29  ;;  %v8367_v29 = vrot.slane %v8322_v53, %v11884_v35 }
 0x5ae   : > { %9878 = vmatprep.subr.bf16.mxu0 %v10234_v36 }
 0x5b1   : > { %9879 = vmatpush3.bf16.msra.mxu0 %v10235_v31  ;;  %v8371_v31 = vrot.slane %v8322_v53, %v11878_v33 }
 0x5b2   : > { %9880 = vmatprep.subr.bf16.mxu0 %v10236_v34 }
 0x5b5   : > { %9881 = vmatpush3.bf16.msra.mxu0 %v10237_v38 }
 0x5b6   : > { %9882 = vmatprep.subr.bf16.mxu0 %v10238_v23  ;;  %v8380_v23 = vrot.slane %v8324_v59, %v11884_v35  ;;  %v10246_v35 = vld [vmem:[%s12145_s7 + $0x10] sm:$0xff]  }
 0x5b9   : > { %9883 = vmatpush3.bf16.msra.mxu0 %v10239_v39 }
 0x5ba   : > { %9884 = vmatprep.subr.bf16.mxu0 %v10240_v45  ;;  %v8384_v45 = vrot.slane %v8324_v59, %v11878_v33  ;;  %v10245_v33 = vld [vmem:[%s12145_s7 + $0x8] sm:$0xff]  }
 0x5bd   : > { %9885 = vmatpush3.bf16.msra.mxu0 %v10241_v20 }
 0x5be   : > { %9886 = vmatprep.subr.bf16.mxu0 %v10242_v62 }
 0x5c1   : > { %9887 = vmatpush3.bf16.msra.mxu0 %v10243_v47 }
 0x676   : > { %v8232_v30 = vpop.f32.mrb[0].mxu1 }
 0x677   : > { %v9911_v0 = vadd.f32 %v8232_v30, %v7510_v46  ;;  %v8314_v6 = vpop.f32.mrb[0].mxu0  ;;  %v8234_v1 = vpop.f32.mrb[1].mxu1 }
 0x678   : > { %v9913_v2 = vadd.f32 %v8234_v1, %v7514_v61  ;;  %v8316_v5 = vpop.f32.mrb[1].mxu0  ;;  %v8236_v44 = vpop.f32.mrb[2].mxu1  ;;  %v10499_v1 = vmov 0.0  }
 0x679   : > { %v9912_v63 = vadd.f32 %v9911_v0, %v8314_v6  ;;  %v8318_v37 = vpop.f32.mrb[2].mxu0  ;;  %v8237_v15 = vpop.f32.mrb[3].mxu1  ;;  %v10244_v6 = vld [vmem:[%s12145_s7] sm:$0xff]   ;;  %9899 = vmatprep.subr.bf16.mxu1 %v10499_v1  ;;  %9907 = vmatprep.mubr.msk.bf16.mxu1 %vm10500_vm0, %v10499_v1  ;;  %v9842_v44 = vld [vmem:[#allocation10] ss:$0 sm:$0xff] }
 0x67a   : > { %v9914_v7 = vadd.f32 %v9913_v2, %v8316_v5  ;;  %v8319_v19 = vpop.f32.mrb[3].mxu0  ;;  %9900 = vmatpush3.bf16.msra.mxu1 %v10244_v6  ;;  %v10247_v2 = vld [vmem:[%s12145_s7 + $0x18] sm:$0xff]  }
 0x67b   : > { %v8325_v41 = vrot.slane %v9912_v63, 4  ;;  %9901 = vmatprep.subr.bf16.mxu1 %v10499_v1 }
 0x67c   : > { %v8331_v10 = vrot.slane %v9914_v7, 4 }
 0x67d   : > { %v8326_v52 = vadd.f32 %v9912_v63, %v8325_v41 }
 0x67e   : > { %v8332_v21 = vadd.f32 %v9914_v7, %v8331_v10  ;;  %9902 = vmatpush3.bf16.msra.mxu1 %v10245_v33 }
 0x67f   : > { %v8327_v50 = vrot.slane %v8326_v52, 2  ;;  %9903 = vmatprep.subr.bf16.mxu1 %v10499_v1 }
 0x680   : > { %v8333_v40 = vrot.slane %v8332_v21, 2 }
 0x681   : > { %v8328_v11 = vadd.f32 %v8327_v50, %v8326_v52 }
 0x682   : > { %v8334_v3 = vadd.f32 %v8333_v40, %v8332_v21  ;;  %9904 = vmatpush3.bf16.msra.mxu1 %v10246_v35 }
 0x683   : > { %v8329_v14 = vrot.slane %v8328_v11, 1  ;;  %9905 = vmatprep.subr.bf16.mxu1 %v10499_v1 }
 0x684   : > { %v8335_v12 = vrot.slane %v8334_v3, 1 }
 0x685   : > { %v8330_v56 = vadd.f32 %v8329_v14, %v8328_v11 }
 0x686   : > { %v8336_v13 = vadd.f32 %v8335_v12, %v8334_v3  ;;  %9906 = vmatpush3.bf16.msra.mxu1 %v10247_v2 }
 0x687   : > { %v8337_v9 = vmul.f32 0.125, %v8330_v56 }
 0x688   : > { %v8338_v32 = vmul.f32 0.125, %v8336_v13 }
 0x689   : > { %v8339_v57 = vsub.f32 %v9912_v63, %v8337_v9 }
 0x68a   : > { %v8340_v17 = vsub.f32 %v9914_v7, %v8338_v32 }
 0x68b   : > { %v8341_v28 = vmul.f32 %v8339_v57, %v8339_v57 }
 0x68c   : > { %v8342_v42 = vmul.f32 %v8340_v17, %v8340_v17 }
 0x68d   : > { %v8343_v60 = vrot.slane %v8341_v28, 4 }
 0x68e   : > { %v8349_v51 = vrot.slane %v8342_v42, 4 }
 0x68f   : > { %v8344_v43 = vadd.f32 %v8343_v60, %v8341_v28 }
 0x690   : > { %v8350_v24 = vadd.f32 %v8349_v51, %v8342_v42 }
 0x691   : > { %v8345_v48 = vrot.slane %v8344_v43, 2 }
 0x692   : > { %v8351_v54 = vrot.slane %v8350_v24, 2 }
 0x693   : > { %v8346_v58 = vadd.f32 %v8345_v48, %v8344_v43  ;;  %v9859_v43 = vld [vmem:[#allocation10 + $0x1] ss:$0 sm:$0xff]  ;;  %v9860_v48 = vld [vmem:[#allocation10 + $0x2] ss:$0 sm:$0xff] }
 0x694   : > { %v8352_v18 = vadd.f32 %v8351_v54, %v8350_v24 }
 0x695   : > { %v8347_v25 = vrot.slane %v8346_v58, 1 }
 0x696   : > { %v8353_v4 = vrot.slane %v8352_v18, 1 }
 0x697   : > { %v8348_v55 = vadd.f32 %v8347_v25, %v8346_v58 }
 0x698   : > { %v8354_v22 = vadd.f32 %v8353_v4, %v8352_v18  ;;  %v9861_v4 = vld [vmem:[#allocation11] ss:$0 sm:$0xff] }
 0x699   : > { %v8355_v26 = vmul.f32 0.125, %v8348_v55 }
 0x69a   : > { %v8356_v16 = vmul.f32 0.125, %v8354_v22 }
 0x69b   : > { %v8357_v27 = vadd.f32 1e-05, %v8355_v26 }
 0x69c   : > { %v8358_v8 = vadd.f32 1e-05, %v8356_v16 }
 0x69d   : > { %10264 = vrsqrt.f32 %v8357_v27 }
 0x69e   : > { %10266 = vrsqrt.f32 %v8358_v8 }
 0x6a7   : > { %v10265_v36 = vpop.eup %10264 }
 0x6a8   : > { %v10267_v34 = vpop.eup %10266  ;;  %v8361_v38 = vmul.f32 %v10265_v36, %v8339_v57 }
 0x6a9   : > { %v8362_v39 = vmul.f32 %v10267_v34, %v8340_v17 }
 0x6aa   : > { %v8374_v20 = vmul.f32 %v8367_v29, %v8361_v38 }
 0x6ab   : > { %v8375_v62 = vmul.f32 %v8371_v31, %v8362_v39 }
 0x6ac   : > { %v8387_v47 = vadd.f32 %v8380_v23, %v8374_v20 }
 0x6ad   : > { %v8388_v49 = vadd.f32 %v8384_v45, %v8375_v62 }
 0x6ae   : > { %v8389_v46 = vmax.f32 %v8387_v47, 0.0 }
 0x6af   : > { %v8390_v61 = vmax.f32 %v8388_v49, 0.0 }
 0x6b0   : > { %v8391_v0 = vpack.c.bf16 %v8389_v46, %v8389_v46 }
 0x6b1   : > { %v8392_v30 = vpack.c.bf16 %v8390_v61, %v8390_v61 }
 0x6b3   : > { %8558 = vmatprep.mubr.bf16.mxu0 %v8392_v30 }
 0x6b4   : > { %8559 = vmatmul.mubr.bf16.vlgmr.msra.gmra.mrb[4].mxu0 %v8391_v0 }
 0x787   : > { %v9888_v5 = vpop.f32.mrb[4].mxu0 }
 0x788   : > { %v9889_v63 = vpop.f32.mrb[5].mxu0 }
 0x789   : > { %v9890_v37 = vadd.f32 %v9889_v63, %v9888_v5  ;;  %v9891_v15 = vpop.f32.mrb[6].mxu0 }
 0x78a   : > { %v9892_v7 = vpop.f32.mrb[7].mxu0 }
 0x78b   : > { %v8561_v19 = vadd.f32 %v9890_v37, %v9842_v44 }
 0x78d   : > { %v8569_v41 = vsel %vm8568_vm1, %v8561_v19, 0.0 }
 0x78e   : > { %v8570_v10 = vrot.slane %v8569_v41, 4 }
 0x790   : > { %v8571_v52 = vadd.f32 %v8570_v10, %v8569_v41 }
 0x792   : > { %v8572_v21 = vrot.slane %v8571_v52, 2 }
 0x794   : > { %v8573_v50 = vadd.f32 %v8572_v21, %v8571_v52 }
 0x796   : > { %v8574_v40 = vrot.slane %v8573_v50, 1 }
 0x798   : > { %v8575_v11 = vadd.f32 %v8574_v40, %v8573_v50 }
 0x79a   : > { %v8576_v3 = vmul.f32 0.125, %v8575_v11 }
 0x79c   : > { %v8577_v14 = vsub.f32 %v8561_v19, %v8576_v3 }
 0x79e   : > { %v8578_v12 = vmul.f32 %v8577_v14, %v8577_v14 }
 0x7a0   : > { %v8579_v56 = vsel %vm8568_vm1, %v8578_v12, 0.0 }
 0x7a1   : > { %v8580_v13 = vrot.slane %v8579_v56, 4 }
 0x7a3   : > { %v8581_v9 = vadd.f32 %v8580_v13, %v8579_v56 }
 0x7a5   : > { %v8582_v32 = vrot.slane %v8581_v9, 2 }
 0x7a7   : > { %v8583_v57 = vadd.f32 %v8582_v32, %v8581_v9 }
 0x7a9   : > { %v8584_v17 = vrot.slane %v8583_v57, 1 }
 0x7ab   : > { %v8585_v28 = vadd.f32 %v8584_v17, %v8583_v57 }
 0x7ad   : > { %v8586_v42 = vmul.f32 0.125, %v8585_v28 }
 0x7af   : > { %v8587_v60 = vadd.f32 1e-05, %v8586_v42 }
 0x7b1   : > { %10268 = vrsqrt.f32 %v8587_v60 }
 0x7bb   : > { %v10269_v51 = vpop.eup %10268 }
 0x7bc   : > { %v8589_v24 = vmul.f32 %v10269_v51, %v8577_v14 }
 0x7be   : > { %v8594_v54 = vmul.f32 %v9859_v43, %v8589_v24 }
 0x7c0   : > { %v8599_v58 = vadd.f32 %v9860_v48, %v8594_v54 }
 0x7c2   : > { %v8600_v18 = vmax.f32 %v8599_v58, 0.0 }
 0x7c4   : > { %v8601_v25 = vpack.c.bf16 %v8600_v18, %v8600_v18 }
 0x7c6   : > { %9908 = vmatmul.mubr.msk.bf16.vlgmr.msra.gmra.mrb[4].mxu1 %vm8568_vm1, %v8601_v25 }
 0x899   : > { %v8678_v55 = vpop.f32.mrb[4].mxu1 }
 0x89a   : > { %v8679_v22 = vadd.f32 %v9861_v4, %v8678_v55  ;;  %v9909_v26 = vpop.f32.mrb[5].mxu1 }
 0x89b   : > { %v8681_v16 = vpop.f32.mrb[6].mxu1 }
 0x89c   : > { %8685 = vst.msk [vmem:[%s12169_s26] sm:$0xff] %vm8684_vm2, %v8679_v22  ;;  %v9910_v27 = vpop.f32.mrb[7].mxu1 }
 0x89d PF: > { %p22_p0 = scmp.ge.s32.totalorder %s10701_s27, 4   ;;  %s12170_s30 = smov %s10478_s10 }
 0x89e   : > { %s12171_s10 = smov %s10482_s11  ;;  %s12172_s11 = smov %s10712_s20 }
 0x89f   : > { %s12173_s12 = smov %s10701_s27  ;;  %24 = sbr.rel (!%p22_p0) target bundleno = 10 (0xa), region = 127 }
 0x8a6   :  { %8697 = vsyncpa [#allocation4], 1 }
 0x8a7   :  { %8699 = vsyncpa [#allocation4 + $0x1], 1 }
 0x8a8   :  { %8700 = vsyncpa [#allocation6], 1 }
 0x8a9   :  { %8701 = vsyncpa [#allocation9], 1 }
 0x8aa   :  { %8702 = vsyncpa [#allocation12], 1 }

</bundles_post_ra>
